<compile_context>
chip_gen: v7x
topology: tpu7x:2x2x1
jax: 0.10.0
libtpu: 0.0.40
codegen_flags: <defaults>
</compile_context>

<pallas_src>
import functools

import jax
import jax.numpy as jnp
from jax.experimental import pallas as pl
from jax.experimental.pallas import tpu as pltpu


def vsn_kernel(*refs, num_vars, newton):
    # refs = (x_0, ..., x_{V-1}, W, b, out)
    #   x_v : (tb, H)    batch tile of variable v (compute dtype, e.g. bf16)
    #   W   : (V, H, H)  per-variable linear weights (in x out), resident
    #   b   : (V, 1, H)  per-variable biases (fp32), resident
    #   out : (tb, H)
    x_refs = refs[:num_vars]
    w_ref = refs[num_vars]
    b_ref = refs[num_vars + 1]
    o_ref = refs[num_vars + 2]

    b_all = b_ref[...].astype(jnp.float32)  # (V, 1, H), loaded once per step

    # Single pass over variables: MXU matmul + online softmax-weighted sum.
    # Live fp32 temporaries are just m / denom / acc, independent of V.
    # TODO(synk): if MXU-bound on v6e/v7x (H=128 half-fills the 256-wide MXU),
    # pack variable pairs into block-diagonal (tb,2H)@(2H,2H) matmuls.
    m = denom = acc = None
    for v in range(num_vars):  # V is small & static -> unrolled
        x_v = x_refs[v][...]
        t = jnp.dot(x_v, w_ref[v], preferred_element_type=jnp.float32)
        t = t + b_all[v]                      # (1, H) broadcasts over tb
        x_f = x_v.astype(jnp.float32)
        if v == 0:
            m = t
            denom = jnp.ones_like(t)          # exp(t - m) == 1
            acc = x_f
        else:
            m_new = jnp.maximum(m, t)
            alpha = jnp.exp(m - m_new)        # rescale previous partial sums
            e = jnp.exp(t - m_new)
            denom = denom * alpha + e
            acc = acc * alpha + e * x_f
            m = m_new

    # One EUP reciprocal (separate VLIW slot); Newton step only for fp32 out.
    inv = pl.reciprocal(denom, approx=True)
    if newton:
        inv = inv * (2.0 - denom * inv)
    o_ref[...] = (acc * inv).astype(o_ref.dtype)


def vsn_forward(inputs_list, weights, biases, *, tb=None,
                compute_dtype=jnp.bfloat16, out_dtype=None,
                vmem_limit_bytes=None):
    """VSN forward.

    inputs_list: list of V arrays [B, H] (NOT pre-stacked - avoids an HBM copy)
    weights:     [V, H, H]  per-variable Linear weight, stored (H_in, H_out)
                 (i.e. transpose of torch Linear.weight)
    biases:      [V, H]
    """
    V = len(inputs_list)
    B, H = inputs_list[0].shape
    assert weights.shape == (V, H, H), weights.shape
    assert biases.shape == (V, H), biases.shape
    if out_dtype is None:
        out_dtype = inputs_list[0].dtype

    # Batch tile: default 512, but keep >= 2 grid steps so the "parallel" axis
    # can split across v7x's two TensorCores. Round to a sublane multiple.
    if tb is None:
        tb = 512
        while tb > 8 and pl.cdiv(B, tb) < 2:
            tb //= 2
    tb = max(8, min(int(tb), max(B, 8)))
    tb = -(-tb // 8) * 8
    Bp = pl.cdiv(B, tb) * tb                  # padded batch (masked-free tiles)

    # Cast to the compute dtype in the wrapper (bf16 default: halves HBM x/W
    # traffic, full-rate MXU on v6e/v7x). Accumulation stays fp32 in-kernel.
    xs = []
    for x in inputs_list:
        if x.dtype != compute_dtype:
            x = x.astype(compute_dtype)
        if Bp != B:
            x = jnp.pad(x, ((0, Bp - B), (0, 0)))
        xs.append(x)
    w = weights if weights.dtype == compute_dtype else weights.astype(compute_dtype)
    b3 = biases.reshape(V, 1, H).astype(jnp.float32)

    newton = jnp.dtype(out_dtype) == jnp.dtype(jnp.float32)
    kernel = functools.partial(vsn_kernel, num_vars=V, newton=newton)

    cdt = jnp.dtype(compute_dtype).itemsize
    odt = jnp.dtype(out_dtype).itemsize
    if vmem_limit_bytes is None:
        need = (V * 2 * tb * H * cdt          # double-buffered x tiles
                + V * H * H * cdt             # resident (single-buffered) W
                + V * H * 4                   # resident b
                + 2 * tb * H * odt            # double-buffered output tile
                + 6 * tb * H * 4)             # m/denom/acc fp32 temporaries + slack
        vmem_limit_bytes = min(max(int(1.5 * need) + (8 << 20), 16 << 20), 48 << 20)

    cost = pl.CostEstimate(
        flops=2 * Bp * H * H * V,
        transcendentals=2 * Bp * H * V,
        bytes_accessed=(V * Bp * H * cdt + V * H * H * cdt + V * H * 4
                        + Bp * H * odt),
    )

    def build(single_buffer_resident):
        resident_kwargs = (
            dict(pipeline_mode=pl.Buffered(1)) if single_buffer_resident else {})
        in_specs = (
            [pl.BlockSpec((tb, H), lambda i: (i, 0)) for _ in range(V)]
            + [pl.BlockSpec((V, H, H), lambda i: (0, 0, 0), **resident_kwargs),
               pl.BlockSpec((V, 1, H), lambda i: (0, 0, 0), **resident_kwargs)])
        return pl.pallas_call(
            kernel,
            out_shape=jax.ShapeDtypeStruct((Bp, H), out_dtype),
            grid_spec=pltpu.PrefetchScalarGridSpec(
                num_scalar_prefetch=0,
                grid=(Bp // tb,),
                in_specs=in_specs,
                out_specs=pl.BlockSpec((tb, H), lambda i: (i, 0)),
            ),
            compiler_params=pltpu.CompilerParams(
                dimension_semantics=("parallel",),   # shard batch across TCs
                vmem_limit_bytes=vmem_limit_bytes,
            ),
            cost_estimate=cost,
        )

    try:
        out = build(True)(*xs, w, b3)
    except Exception:
        # Fallback for jax builds without single-buffering via pipeline_mode;
        # resident W/b are then simply double-buffered (correctness identical).
        out = build(False)(*xs, w, b3)

    return out[:B] if Bp != B else out


if __name__ == "__main__":
    # Small, lane-dense demo shapes: H multiple of 128, 2 grid steps (tb=128).
    B, H, V = 256, 128, 4
    key = jax.random.PRNGKey(0)
    keys = jax.random.split(key, 3 * V)

    inputs = [jax.random.normal(keys[i], (B, H), dtype=jnp.float32) for i in range(V)]
    # W stored (H_in, H_out) per variable == transpose of torch Linear.weight.
    Ws = jnp.stack(
        [0.1 * jax.random.normal(keys[V + i], (H, H), dtype=jnp.float32) for i in range(V)],
        axis=0)
    bs = jnp.stack(
        [0.1 * jax.random.normal(keys[2 * V + i], (H,), dtype=jnp.float32) for i in range(V)],
        axis=0)

    # ---- default bf16 compute path ----
    out_bf = jax.block_until_ready(vsn_forward(inputs, Ws, bs, tb=128))
    assert out_bf.shape == (B, H) and out_bf.dtype == jnp.float32

    # Reference with the SAME bf16 input/weight quantization (fp32 accumulation),
    # matching the PyTorch forward exactly in structure.
    xs_bf = [x.astype(jnp.bfloat16).astype(jnp.float32) for x in inputs]
    t_bf = jnp.stack(
        [jnp.dot(inputs[i].astype(jnp.bfloat16), Ws[i].astype(jnp.bfloat16),
                 preferred_element_type=jnp.float32) + bs[i] for i in range(V)],
        axis=-1)
    ref_bf = jnp.sum(jax.nn.softmax(t_bf, axis=-1) * jnp.stack(xs_bf, axis=-1), axis=-1)
    err_bf = float(jnp.max(jnp.abs(out_bf - ref_bf)))
    assert jnp.allclose(out_bf, ref_bf, atol=2e-3, rtol=2e-3), err_bf

    # Full-precision reference of the original PyTorch semantics (sanity check
    # that the bf16 path is close to it too).
    t32 = jnp.stack(
        [jnp.dot(inputs[i], Ws[i], precision=jax.lax.Precision.HIGHEST) + bs[i]
         for i in range(V)], axis=-1)
    ref32 = jnp.sum(jax.nn.softmax(t32, axis=-1) * jnp.stack(inputs, axis=-1), axis=-1)
    assert jnp.allclose(out_bf, ref32, atol=1e-1), float(jnp.max(jnp.abs(out_bf - ref32)))

    # ---- fp32 compute path: tight numerical check ----
    out32 = jax.block_until_ready(
        vsn_forward(inputs, Ws, bs, tb=128, compute_dtype=jnp.float32))
    err32 = float(jnp.max(jnp.abs(out32 - ref32)))
    assert jnp.allclose(out32, ref32, atol=1e-3, rtol=1e-3), err32

    print("KERNEL_OK")
</pallas_src>

<mosaic_0001>
module attributes {stable_mosaic.version = 11 : i64} {
  func.func @vsn_kernel(%arg0: i32, %arg1: memref<128x128xbf16, #tpu.memory_space<vmem>>, %arg2: memref<128x128xbf16, #tpu.memory_space<vmem>>, %arg3: memref<128x128xbf16, #tpu.memory_space<vmem>>, %arg4: memref<128x128xbf16, #tpu.memory_space<vmem>>, %arg5: memref<4x128x128xbf16, #tpu.memory_space<vmem>>, %arg6: memref<4x1x128xf32, #tpu.memory_space<vmem>>, %arg7: memref<128x128xf32, #tpu.memory_space<vmem>>) attributes {dimension_semantics = [#tpu.dimension_semantics<parallel>], iteration_bounds = array<i64: 2>, scalar_prefetch = 0 : i64, scratch_operands = 0 : i64, tpu.core_type = #tpu.core_type<tc>, window_params = [{transform_indices = @transform_0, window_bounds = array<i64: 128, 128>}, {transform_indices = @transform_1, window_bounds = array<i64: 128, 128>}, {transform_indices = @transform_2, window_bounds = array<i64: 128, 128>}, {transform_indices = @transform_3, window_bounds = array<i64: 128, 128>}, {pipeline_mode = #tpu.pipeline_mode<synchronous>, transform_indices = @transform_4, window_bounds = array<i64: 4, 128, 128>}, {pipeline_mode = #tpu.pipeline_mode<synchronous>, transform_indices = @transform_5, window_bounds = array<i64: 4, 1, 128>}, {transform_indices = @transform_6, window_bounds = array<i64: 128, 128>}]} {
    %c0 = arith.constant 0 : index
    %c0_0 = arith.constant 0 : index
    %c0_1 = arith.constant 0 : index
    %0 = vector.load %arg6[%c0, %c0_0, %c0_1] : memref<4x1x128xf32, #tpu.memory_space<vmem>>, vector<4x1x128xf32>
    %c0_2 = arith.constant 0 : index
    %c0_3 = arith.constant 0 : index
    %1 = vector.load %arg1[%c0_2, %c0_3] : memref<128x128xbf16, #tpu.memory_space<vmem>>, vector<128x128xbf16>
    %c0_4 = arith.constant 0 : index
    %c0_5 = arith.constant 0 : index
    %c0_6 = arith.constant 0 : index
    %2 = vector.load %arg5[%c0_4, %c0_5, %c0_6] : memref<4x128x128xbf16, #tpu.memory_space<vmem>>, vector<1x128x128xbf16>
    %3 = vector.shape_cast %2 : vector<1x128x128xbf16> to vector<128x128xbf16>
    %cst = arith.constant dense<0.000000e+00> : vector<128x128xf32>
    %4 = tpu.matmul %1, %3, %cst {dimension_numbers = #tpu.dot_dimension_numbers<[1], [0], [0], [1], [0, 0, 1, 1], [], []>} : vector<128x128xbf16>, vector<128x128xbf16>, vector<128x128xf32> -> vector<128x128xf32>
    %5 = vector.extract_strided_slice %0 {offsets = [0, 0, 0], sizes = [1, 1, 128], strides = [1, 1, 1]} : vector<4x1x128xf32> to vector<1x1x128xf32>
    %6 = vector.shape_cast %5 : vector<1x1x128xf32> to vector<1x128xf32>
    %7 = vector.broadcast %6 : vector<1x128xf32> to vector<128x128xf32>
    %8 = arith.addf %4, %7 : vector<128x128xf32>
    %9 = arith.extf %1 : vector<128x128xbf16> to vector<128x128xf32>
    %cst_7 = arith.constant 1.000000e+00 : f32
    %10 = vector.broadcast %cst_7 : f32 to vector<128x128xf32>
    %c0_8 = arith.constant 0 : index
    %c0_9 = arith.constant 0 : index
    %11 = vector.load %arg2[%c0_8, %c0_9] : memref<128x128xbf16, #tpu.memory_space<vmem>>, vector<128x128xbf16>
    %c1 = arith.constant 1 : index
    %c0_10 = arith.constant 0 : index
    %c0_11 = arith.constant 0 : index
    %12 = vector.load %arg5[%c1, %c0_10, %c0_11] : memref<4x128x128xbf16, #tpu.memory_space<vmem>>, vector<1x128x128xbf16>
    %13 = vector.shape_cast %12 : vector<1x128x128xbf16> to vector<128x128xbf16>
    %cst_12 = arith.constant dense<0.000000e+00> : vector<128x128xf32>
    %14 = tpu.matmul %11, %13, %cst_12 {dimension_numbers = #tpu.dot_dimension_numbers<[1], [0], [0], [1], [0, 0, 1, 1], [], []>} : vector<128x128xbf16>, vector<128x128xbf16>, vector<128x128xf32> -> vector<128x128xf32>
    %15 = vector.extract_strided_slice %0 {offsets = [1, 0, 0], sizes = [1, 1, 128], strides = [1, 1, 1]} : vector<4x1x128xf32> to vector<1x1x128xf32>
    %16 = vector.shape_cast %15 : vector<1x1x128xf32> to vector<1x128xf32>
    %17 = vector.broadcast %16 : vector<1x128xf32> to vector<128x128xf32>
    %18 = arith.addf %14, %17 : vector<128x128xf32>
    %19 = arith.extf %11 : vector<128x128xbf16> to vector<128x128xf32>
    %20 = arith.maximumf %8, %18 : vector<128x128xf32>
    %21 = arith.subf %8, %20 : vector<128x128xf32>
    %22 = math.exp %21 : vector<128x128xf32>
    %23 = arith.subf %18, %20 : vector<128x128xf32>
    %24 = math.exp %23 : vector<128x128xf32>
    %25 = arith.mulf %10, %22 : vector<128x128xf32>
    %26 = arith.addf %25, %24 : vector<128x128xf32>
    %27 = arith.mulf %9, %22 : vector<128x128xf32>
    %28 = arith.mulf %24, %19 : vector<128x128xf32>
    %29 = arith.addf %27, %28 : vector<128x128xf32>
    %c0_13 = arith.constant 0 : index
    %c0_14 = arith.constant 0 : index
    %30 = vector.load %arg3[%c0_13, %c0_14] : memref<128x128xbf16, #tpu.memory_space<vmem>>, vector<128x128xbf16>
    %c2 = arith.constant 2 : index
    %c0_15 = arith.constant 0 : index
    %c0_16 = arith.constant 0 : index
    %31 = vector.load %arg5[%c2, %c0_15, %c0_16] : memref<4x128x128xbf16, #tpu.memory_space<vmem>>, vector<1x128x128xbf16>
    %32 = vector.shape_cast %31 : vector<1x128x128xbf16> to vector<128x128xbf16>
    %cst_17 = arith.constant dense<0.000000e+00> : vector<128x128xf32>
    %33 = tpu.matmul %30, %32, %cst_17 {dimension_numbers = #tpu.dot_dimension_numbers<[1], [0], [0], [1], [0, 0, 1, 1], [], []>} : vector<128x128xbf16>, vector<128x128xbf16>, vector<128x128xf32> -> vector<128x128xf32>
    %34 = vector.extract_strided_slice %0 {offsets = [2, 0, 0], sizes = [1, 1, 128], strides = [1, 1, 1]} : vector<4x1x128xf32> to vector<1x1x128xf32>
    %35 = vector.shape_cast %34 : vector<1x1x128xf32> to vector<1x128xf32>
    %36 = vector.broadcast %35 : vector<1x128xf32> to vector<128x128xf32>
    %37 = arith.addf %33, %36 : vector<128x128xf32>
    %38 = arith.extf %30 : vector<128x128xbf16> to vector<128x128xf32>
    %39 = arith.maximumf %20, %37 : vector<128x128xf32>
    %40 = arith.subf %20, %39 : vector<128x128xf32>
    %41 = math.exp %40 : vector<128x128xf32>
    %42 = arith.subf %37, %39 : vector<128x128xf32>
    %43 = math.exp %42 : vector<128x128xf32>
    %44 = arith.mulf %26, %41 : vector<128x128xf32>
    %45 = arith.addf %44, %43 : vector<128x128xf32>
    %46 = arith.mulf %29, %41 : vector<128x128xf32>
    %47 = arith.mulf %43, %38 : vector<128x128xf32>
    %48 = arith.addf %46, %47 : vector<128x128xf32>
    %c0_18 = arith.constant 0 : index
    %c0_19 = arith.constant 0 : index
    %49 = vector.load %arg4[%c0_18, %c0_19] : memref<128x128xbf16, #tpu.memory_space<vmem>>, vector<128x128xbf16>
    %c3 = arith.constant 3 : index
    %c0_20 = arith.constant 0 : index
    %c0_21 = arith.constant 0 : index
    %50 = vector.load %arg5[%c3, %c0_20, %c0_21] : memref<4x128x128xbf16, #tpu.memory_space<vmem>>, vector<1x128x128xbf16>
    %51 = vector.shape_cast %50 : vector<1x128x128xbf16> to vector<128x128xbf16>
    %cst_22 = arith.constant dense<0.000000e+00> : vector<128x128xf32>
    %52 = tpu.matmul %49, %51, %cst_22 {dimension_numbers = #tpu.dot_dimension_numbers<[1], [0], [0], [1], [0, 0, 1, 1], [], []>} : vector<128x128xbf16>, vector<128x128xbf16>, vector<128x128xf32> -> vector<128x128xf32>
    %53 = vector.extract_strided_slice %0 {offsets = [3, 0, 0], sizes = [1, 1, 128], strides = [1, 1, 1]} : vector<4x1x128xf32> to vector<1x1x128xf32>
    %54 = vector.shape_cast %53 : vector<1x1x128xf32> to vector<1x128xf32>
    %55 = vector.broadcast %54 : vector<1x128xf32> to vector<128x128xf32>
    %56 = arith.addf %52, %55 : vector<128x128xf32>
    %57 = arith.extf %49 : vector<128x128xbf16> to vector<128x128xf32>
    %58 = arith.maximumf %39, %56 : vector<128x128xf32>
    %59 = arith.subf %39, %58 : vector<128x128xf32>
    %60 = math.exp %59 : vector<128x128xf32>
    %61 = arith.subf %56, %58 : vector<128x128xf32>
    %62 = math.exp %61 : vector<128x128xf32>
    %63 = arith.mulf %45, %60 : vector<128x128xf32>
    %64 = arith.addf %63, %62 : vector<128x128xf32>
    %65 = arith.mulf %48, %60 : vector<128x128xf32>
    %66 = arith.mulf %62, %57 : vector<128x128xf32>
    %67 = arith.addf %65, %66 : vector<128x128xf32>
    %68 = tpu.reciprocal %64 {approx = true} : vector<128x128xf32> -> vector<128x128xf32>
    %69 = arith.mulf %64, %68 : vector<128x128xf32>
    %cst_23 = arith.constant 2.000000e+00 : f32
    %70 = vector.broadcast %cst_23 : f32 to vector<128x128xf32>
    %71 = arith.subf %70, %69 : vector<128x128xf32>
    %72 = arith.mulf %68, %71 : vector<128x128xf32>
    %73 = arith.mulf %67, %72 : vector<128x128xf32>
    %c0_24 = arith.constant 0 : index
    %c0_25 = arith.constant 0 : index
    %74 = vector.load %arg7[%c0_24, %c0_25] : memref<128x128xf32, #tpu.memory_space<vmem>>, vector<128x128xf32>
    tpu.vector_store %arg7[%c0_24, %c0_25], %73 {strides = array<i32>} : memref<128x128xf32, #tpu.memory_space<vmem>>, vector<128x128xf32>,
    return
  }
  func.func @transform_0(%arg0: i32) -> (i32, i32) {
    %c0_i32 = arith.constant 0 : i32
    %c0_i32_0 = arith.constant 0 : i32
    return %arg0, %c0_i32 : i32, i32
  }
  func.func @transform_1(%arg0: i32) -> (i32, i32) {
    %c0_i32 = arith.constant 0 : i32
    %c0_i32_0 = arith.constant 0 : i32
    return %arg0, %c0_i32 : i32, i32
  }
  func.func @transform_2(%arg0: i32) -> (i32, i32) {
    %c0_i32 = arith.constant 0 : i32
    %c0_i32_0 = arith.constant 0 : i32
    return %arg0, %c0_i32 : i32, i32
  }
  func.func @transform_3(%arg0: i32) -> (i32, i32) {
    %c0_i32 = arith.constant 0 : i32
    %c0_i32_0 = arith.constant 0 : i32
    return %arg0, %c0_i32 : i32, i32
  }
  func.func @transform_4(%arg0: i32) -> (i32, i32, i32) {
    %c0_i32 = arith.constant 0 : i32
    %c0_i32_0 = arith.constant 0 : i32
    %c0_i32_1 = arith.constant 0 : i32
    %c0_i32_2 = arith.constant 0 : i32
    return %c0_i32, %c0_i32_0, %c0_i32_1 : i32, i32, i32
  }
  func.func @transform_5(%arg0: i32) -> (i32, i32, i32) {
    %c0_i32 = arith.constant 0 : i32
    %c0_i32_0 = arith.constant 0 : i32
    %c0_i32_1 = arith.constant 0 : i32
    %c0_i32_2 = arith.constant 0 : i32
    return %c0_i32, %c0_i32_0, %c0_i32_1 : i32, i32, i32
  }
  func.func @transform_6(%arg0: i32) -> (i32, i32) {
    %c0_i32 = arith.constant 0 : i32
    %c0_i32_0 = arith.constant 0 : i32
    return %arg0, %c0_i32 : i32, i32
  }
}

module attributes {stable_mosaic.version = 11 : i64} {
  func.func @vsn_kernel(%arg0: i32, %arg1: memref<128x128xbf16, #tpu.memory_space<vmem>>, %arg2: memref<128x128xbf16, #tpu.memory_space<vmem>>, %arg3: memref<128x128xbf16, #tpu.memory_space<vmem>>, %arg4: memref<128x128xbf16, #tpu.memory_space<vmem>>, %arg5: memref<4x128x128xbf16, #tpu.memory_space<vmem>>, %arg6: memref<4x1x128xf32, #tpu.memory_space<vmem>>, %arg7: memref<128x128xf32, #tpu.memory_space<vmem>>) attributes {dimension_semantics = [#tpu.dimension_semantics<parallel>], iteration_bounds = array<i64: 2>, scalar_prefetch = 0 : i64, scratch_operands = 0 : i64, tpu.core_type = #tpu.core_type<tc>, window_params = [{transform_indices = @transform_0, window_bounds = array<i64: 128, 128>}, {transform_indices = @transform_1, window_bounds = array<i64: 128, 128>}, {transform_indices = @transform_2, window_bounds = array<i64: 128, 128>}, {transform_indices = @transform_3, window_bounds = array<i64: 128, 128>}, {pipeline_mode = #tpu.pipeline_mode<synchronous>, transform_indices = @transform_4, window_bounds = array<i64: 4, 128, 128>}, {pipeline_mode = #tpu.pipeline_mode<synchronous>, transform_indices = @transform_5, window_bounds = array<i64: 4, 1, 128>}, {transform_indices = @transform_6, window_bounds = array<i64: 128, 128>}]} {
    %c0 = arith.constant 0 : index
    %c0_0 = arith.constant 0 : index
    %c0_1 = arith.constant 0 : index
    %0 = vector.load %arg6[%c0, %c0_0, %c0_1] : memref<4x1x128xf32, #tpu.memory_space<vmem>>, vector<4x1x128xf32>
    %c0_2 = arith.constant 0 : index
    %c0_3 = arith.constant 0 : index
    %1 = vector.load %arg1[%c0_2, %c0_3] : memref<128x128xbf16, #tpu.memory_space<vmem>>, vector<128x128xbf16>
    %c0_4 = arith.constant 0 : index
    %c0_5 = arith.constant 0 : index
    %c0_6 = arith.constant 0 : index
    %2 = vector.load %arg5[%c0_4, %c0_5, %c0_6] : memref<4x128x128xbf16, #tpu.memory_space<vmem>>, vector<1x128x128xbf16>
    %3 = vector.shape_cast %2 : vector<1x128x128xbf16> to vector<128x128xbf16>
    %cst = arith.constant dense<0.000000e+00> : vector<128x128xf32>
    %4 = tpu.matmul %1, %3, %cst {dimension_numbers = #tpu.dot_dimension_numbers<[1], [0], [0], [1], [0, 0, 1, 1], [], []>} : vector<128x128xbf16>, vector<128x128xbf16>, vector<128x128xf32> -> vector<128x128xf32>
    %5 = vector.extract_strided_slice %0 {offsets = [0, 0, 0], sizes = [1, 1, 128], strides = [1, 1, 1]} : vector<4x1x128xf32> to vector<1x1x128xf32>
    %6 = vector.shape_cast %5 : vector<1x1x128xf32> to vector<1x128xf32>
    %7 = vector.broadcast %6 : vector<1x128xf32> to vector<128x128xf32>
    %8 = arith.addf %4, %7 : vector<128x128xf32>
    %9 = arith.extf %1 : vector<128x128xbf16> to vector<128x128xf32>
    %cst_7 = arith.constant 1.000000e+00 : f32
    %10 = vector.broadcast %cst_7 : f32 to vector<128x128xf32>
    %c0_8 = arith.constant 0 : index
    %c0_9 = arith.constant 0 : index
    %11 = vector.load %arg2[%c0_8, %c0_9] : memref<128x128xbf16, #tpu.memory_space<vmem>>, vector<128x128xbf16>
    %c1 = arith.constant 1 : index
    %c0_10 = arith.constant 0 : index
    %c0_11 = arith.constant 0 : index
    %12 = vector.load %arg5[%c1, %c0_10, %c0_11] : memref<4x128x128xbf16, #tpu.memory_space<vmem>>, vector<1x128x128xbf16>
    %13 = vector.shape_cast %12 : vector<1x128x128xbf16> to vector<128x128xbf16>
    %cst_12 = arith.constant dense<0.000000e+00> : vector<128x128xf32>
    %14 = tpu.matmul %11, %13, %cst_12 {dimension_numbers = #tpu.dot_dimension_numbers<[1], [0], [0], [1], [0, 0, 1, 1], [], []>} : vector<128x128xbf16>, vector<128x128xbf16>, vector<128x128xf32> -> vector<128x128xf32>
    %15 = vector.extract_strided_slice %0 {offsets = [1, 0, 0], sizes = [1, 1, 128], strides = [1, 1, 1]} : vector<4x1x128xf32> to vector<1x1x128xf32>
    %16 = vector.shape_cast %15 : vector<1x1x128xf32> to vector<1x128xf32>
    %17 = vector.broadcast %16 : vector<1x128xf32> to vector<128x128xf32>
    %18 = arith.addf %14, %17 : vector<128x128xf32>
    %19 = arith.extf %11 : vector<128x128xbf16> to vector<128x128xf32>
    %20 = arith.maximumf %8, %18 : vector<128x128xf32>
    %21 = arith.subf %8, %20 : vector<128x128xf32>
    %22 = math.exp %21 : vector<128x128xf32>
    %23 = arith.subf %18, %20 : vector<128x128xf32>
    %24 = math.exp %23 : vector<128x128xf32>
    %25 = arith.mulf %10, %22 : vector<128x128xf32>
    %26 = arith.addf %25, %24 : vector<128x128xf32>
    %27 = arith.mulf %9, %22 : vector<128x128xf32>
    %28 = arith.mulf %24, %19 : vector<128x128xf32>
    %29 = arith.addf %27, %28 : vector<128x128xf32>
    %c0_13 = arith.constant 0 : index
    %c0_14 = arith.constant 0 : index
    %30 = vector.load %arg3[%c0_13, %c0_14] : memref<128x128xbf16, #tpu.memory_space<vmem>>, vector<128x128xbf16>
    %c2 = arith.constant 2 : index
    %c0_15 = arith.constant 0 : index
    %c0_16 = arith.constant 0 : index
    %31 = vector.load %arg5[%c2, %c0_15, %c0_16] : memref<4x128x128xbf16, #tpu.memory_space<vmem>>, vector<1x128x128xbf16>
    %32 = vector.shape_cast %31 : vector<1x128x128xbf16> to vector<128x128xbf16>
    %cst_17 = arith.constant dense<0.000000e+00> : vector<128x128xf32>
    %33 = tpu.matmul %30, %32, %cst_17 {dimension_numbers = #tpu.dot_dimension_numbers<[1], [0], [0], [1], [0, 0, 1, 1], [], []>} : vector<128x128xbf16>, vector<128x128xbf16>, vector<128x128xf32> -> vector<128x128xf32>
    %34 = vector.extract_strided_slice %0 {offsets = [2, 0, 0], sizes = [1, 1, 128], strides = [1, 1, 1]} : vector<4x1x128xf32> to vector<1x1x128xf32>
    %35 = vector.shape_cast %34 : vector<1x1x128xf32> to vector<1x128xf32>
    %36 = vector.broadcast %35 : vector<1x128xf32> to vector<128x128xf32>
    %37 = arith.addf %33, %36 : vector<128x128xf32>
    %38 = arith.extf %30 : vector<128x128xbf16> to vector<128x128xf32>
    %39 = arith.maximumf %20, %37 : vector<128x128xf32>
    %40 = arith.subf %20, %39 : vector<128x128xf32>
    %41 = math.exp %40 : vector<128x128xf32>
    %42 = arith.subf %37, %39 : vector<128x128xf32>
    %43 = math.exp %42 : vector<128x128xf32>
    %44 = arith.mulf %26, %41 : vector<128x128xf32>
    %45 = arith.addf %44, %43 : vector<128x128xf32>
    %46 = arith.mulf %29, %41 : vector<128x128xf32>
    %47 = arith.mulf %43, %38 : vector<128x128xf32>
    %48 = arith.addf %46, %47 : vector<128x128xf32>
    %c0_18 = arith.constant 0 : index
    %c0_19 = arith.constant 0 : index
    %49 = vector.load %arg4[%c0_18, %c0_19] : memref<128x128xbf16, #tpu.memory_space<vmem>>, vector<128x128xbf16>
    %c3 = arith.constant 3 : index
    %c0_20 = arith.constant 0 : index
    %c0_21 = arith.constant 0 : index
    %50 = vector.load %arg5[%c3, %c0_20, %c0_21] : memref<4x128x128xbf16, #tpu.memory_space<vmem>>, vector<1x128x128xbf16>
    %51 = vector.shape_cast %50 : vector<1x128x128xbf16> to vector<128x128xbf16>
    %cst_22 = arith.constant dense<0.000000e+00> : vector<128x128xf32>
    %52 = tpu.matmul %49, %51, %cst_22 {dimension_numbers = #tpu.dot_dimension_numbers<[1], [0], [0], [1], [0, 0, 1, 1], [], []>} : vector<128x128xbf16>, vector<128x128xbf16>, vector<128x128xf32> -> vector<128x128xf32>
    %53 = vector.extract_strided_slice %0 {offsets = [3, 0, 0], sizes = [1, 1, 128], strides = [1, 1, 1]} : vector<4x1x128xf32> to vector<1x1x128xf32>
    %54 = vector.shape_cast %53 : vector<1x1x128xf32> to vector<1x128xf32>
    %55 = vector.broadcast %54 : vector<1x128xf32> to vector<128x128xf32>
    %56 = arith.addf %52, %55 : vector<128x128xf32>
    %57 = arith.extf %49 : vector<128x128xbf16> to vector<128x128xf32>
    %58 = arith.maximumf %39, %56 : vector<128x128xf32>
    %59 = arith.subf %39, %58 : vector<128x128xf32>
    %60 = math.exp %59 : vector<128x128xf32>
    %61 = arith.subf %56, %58 : vector<128x128xf32>
    %62 = math.exp %61 : vector<128x128xf32>
    %63 = arith.mulf %45, %60 : vector<128x128xf32>
    %64 = arith.addf %63, %62 : vector<128x128xf32>
    %65 = arith.mulf %48, %60 : vector<128x128xf32>
    %66 = arith.mulf %62, %57 : vector<128x128xf32>
    %67 = arith.addf %65, %66 : vector<128x128xf32>
    %68 = tpu.reciprocal %64 {approx = true} : vector<128x128xf32> -> vector<128x128xf32>
    %69 = arith.mulf %64, %68 : vector<128x128xf32>
    %cst_23 = arith.constant 2.000000e+00 : f32
    %70 = vector.broadcast %cst_23 : f32 to vector<128x128xf32>
    %71 = arith.subf %70, %69 : vector<128x128xf32>
    %72 = arith.mulf %68, %71 : vector<128x128xf32>
    %73 = arith.mulf %67, %72 : vector<128x128xf32>
    %c0_24 = arith.constant 0 : index
    %c0_25 = arith.constant 0 : index
    %74 = vector.load %arg7[%c0_24, %c0_25] : memref<128x128xf32, #tpu.memory_space<vmem>>, vector<128x128xf32>
    tpu.vector_store %arg7[%c0_24, %c0_25], %73 {strides = array<i32>} : memref<128x128xf32, #tpu.memory_space<vmem>>, vector<128x128xf32>,
    return
  }
  func.func @transform_0(%arg0: i32) -> (i32, i32) {
    %c0_i32 = arith.constant 0 : i32
    %c0_i32_0 = arith.constant 0 : i32
    return %arg0, %c0_i32 : i32, i32
  }
  func.func @transform_1(%arg0: i32) -> (i32, i32) {
    %c0_i32 = arith.constant 0 : i32
    %c0_i32_0 = arith.constant 0 : i32
    return %arg0, %c0_i32 : i32, i32
  }
  func.func @transform_2(%arg0: i32) -> (i32, i32) {
    %c0_i32 = arith.constant 0 : i32
    %c0_i32_0 = arith.constant 0 : i32
    return %arg0, %c0_i32 : i32, i32
  }
  func.func @transform_3(%arg0: i32) -> (i32, i32) {
    %c0_i32 = arith.constant 0 : i32
    %c0_i32_0 = arith.constant 0 : i32
    return %arg0, %c0_i32 : i32, i32
  }
  func.func @transform_4(%arg0: i32) -> (i32, i32, i32) {
    %c0_i32 = arith.constant 0 : i32
    %c0_i32_0 = arith.constant 0 : i32
    %c0_i32_1 = arith.constant 0 : i32
    %c0_i32_2 = arith.constant 0 : i32
    return %c0_i32, %c0_i32_0, %c0_i32_1 : i32, i32, i32
  }
  func.func @transform_5(%arg0: i32) -> (i32, i32, i32) {
    %c0_i32 = arith.constant 0 : i32
    %c0_i32_0 = arith.constant 0 : i32
    %c0_i32_1 = arith.constant 0 : i32
    %c0_i32_2 = arith.constant 0 : i32
    return %c0_i32, %c0_i32_0, %c0_i32_1 : i32, i32, i32
  }
  func.func @transform_6(%arg0: i32) -> (i32, i32) {
    %c0_i32 = arith.constant 0 : i32
    %c0_i32_0 = arith.constant 0 : i32
    return %arg0, %c0_i32 : i32, i32
  }
}

</mosaic_0001>

<bundles_post_ra>
// kernel: tpu_custom_call.1
= control target key start
LH: loop header
LB: loop body
LE: loop exit
PB: predicated region body
PF: predicated region fallthrough
CT: control target
= control target key end

     0   :  { %s4437_s0 = inlined_call_operand.hbm [shape: bf16[256,128], index: 0, kind: input, shape index: {}]   ;;  %s4438_s1 = inlined_call_operand.hbm [shape: bf16[256,128], index: 1, kind: input, shape index: {}]   ;;  %s4439_s2 = inlined_call_operand.hbm [shape: bf16[256,128], index: 2, kind: input, shape index: {}]   ;;  %s4440_s3 = inlined_call_operand.hbm [shape: bf16[256,128], index: 3, kind: input, shape index: {}]   ;;  %s4441_s4 = inlined_call_operand.hbm [shape: bf16[4,128,128], index: 4, kind: input, shape index: {}]   ;;  %s4442_s5 = inlined_call_operand.vmem [shape: f32[4,1,128], index: 5, kind: input, shape index: {}]   ;;  %s4443_s6 = inlined_call_operand.hbm [shape: f32[256,128], index: 6, kind: output, shape index: {}]  }
   0x1   :  { %4498 = sst [smem:[#allocation67_spill]] %s4438_s1 }
   0x2   :  { %4499 = sst [smem:[#allocation68_spill]] %s4441_s4 }
   0x3   :  { %11 = vsyncpa [#allocation3], 0 }
   0x4   :  { %13 = vsyncpa [#allocation3 + $0x1], 0 }
   0x5   :  { %14 = vsyncpa [#allocation6], 0 }
   0x6   :  { %16 = vsyncpa [#allocation6 + $0x1], 0 }
   0x7   :  { %17 = vsyncpa [#allocation9], 0 }
   0x8   :  { %19 = vsyncpa [#allocation9 + $0x1], 0 }
   0x9   :  { %20 = vsyncpa [#allocation4], 0 }
   0xa   :  { %22 = vsyncpa [#allocation4 + $0x1], 0  ;;  %s3186_s21 = smov 0   ;;  %s3188_s22 = smov 0  }
   0xb   :  { %s3190_s23 = smov 0   ;;  %s3192_s24 = smov 0  }
   0xc LB: > { %s3207_s25 = sadd.s32 4294967295, %s3139_s24   ;;  %s2220_s26 = sadd.s32 4294967294, %s3139_s24   ;;  %s3139_s24 = sphi %s3192_s24, %s4680_s24   ;;  %s3135_s23 = sphi %s3190_s23, %s4684_s23   ;;  %s3131_s22 = sphi %s3188_s22, %s4683_s22   ;;  %s3127_s21 = sphi %s3186_s21, %s4682_s21  }
   0xd   : > { %s3211_s27 = sadd.s32 1, %s3139_s24   ;;  %s35_s28 = sadd.s32 1, %s3135_s23 }
   0xe   : > { %4500 = sst [smem:[#allocation17_spill]] %s3211_s27  ;;  %s32_s29 = ssub.s32 %s3139_s24, %s3211_s27 }
   0xf   : > { %p42_p0 = scmp.ne.s32.totalorder %s3135_s23, %s3131_s22  ;;  %p33_p1 = scmp.eq.s32.totalorder %s32_s29, 0 }
  0x10   : > { %p43_p2 = scmp.eq.s32.totalorder %s3139_s24, 0  ;;  %p48_p3 = scmp.ne.s32.totalorder %s3131_s22, %s3127_s21 }
  0x11   : > { %p4444_p4 = scmp.eq.s32.totalorder %s3207_s25, 0  ;;  %p192_p7 = scmp.eq.s32.totalorder %s3207_s25, 1 }
  0x12   : > { %s3223_s30 = scalar_select %p33_p1, %s3135_s23, %s35_s28  }
  0x13   : > { %p3225_p5 = por %p43_p2, %p42_p0  ;;  %p3231_p6 = por %p4444_p4, %p48_p3 }
  0x14   : > { %4501 = sst [smem:[#allocation18_spill]] %s3223_s30  ;;  %p198_p8 = scmp.eq.s32.totalorder %s2220_s26, 1 }
  0x15   : > { %s4502_s7 = scalar_select %p3225_p5, 1, 0 }
  0x16   : > { %s4503_s8 = scalar_select %p3231_p6, 1, 0 }
  0x17   : > { %p2221_p9 = scmp.ge.s32.totalorder %s3139_s24, 1  ;;  %p205_p10 = scmp.lt.s32.totalorder %s3139_s24, 3 }
  0x18   : > { %p3238_p11 = por %p192_p7, %p42_p0  ;;  %p3242_p12 = por %p198_p8, %p48_p3 }
  0x19   : > { %p3246_p13 = pnand %p2221_p9, %p205_p10  ;;  %s3141_s12 = smov [#allocation10]  }
  0x1a   : > { %s4504_s9 = scalar_select %p3238_p11, 1, 0 }
  0x1b   : > { %s4505_s10 = scalar_select %p3242_p12, 1, 0 }
  0x1c   : > { %s4507_s11 = scalar_select %p3246_p13, 1, 0 }
  0x1d   : > { %4506 = sst [smem:[#allocation19_spill]] %s4505_s10  ;;  %p2527_p1 = pneg %p3246_p13 }
  0x1e   : > { %s217_s13 = sshll.u32 %s3141_s12, 4  ;;  %s4448_s15 = sand.u32 1, %s3135_s23   ;;  %s218_s13 = int_to_ptr.vmem [resolvable:$true] %s217_s13 }
  0x1f   : > { %p3254_p2 = pnand %p2527_p1, %p4444_p4  ;;  %s3263_s16 = sshll.u32 %s4448_s15, 6 }
  0x20   : > { %s4509_s4 = sld [smem:[#allocation68_spill]] }
  0x21   : > { %p2915_p8 = pneg %p3254_p2 }
  0x26   : > { %s2913_s19 = scalar_lea.hbm %s4509_s4, 4096 }
  0x27   : > { %p2914_p7 = scmp.ne.s32.totalorder %s4509_s4, %s2913_s19  ;;  %p2920_p1 = scmp.lt.u32.totalorder %s2913_s19, %s4509_s4 }
  0x29   : > { %p2916_p9 = pnand %p2915_p8, %p2914_p7 }
  0x2b   : > { %p2917_p10 = pneg %p2916_p9 }
  0x2d   : > { %p2922_p0 = pnand %p2920_p1, %p2917_p10 }
  0x2f   : > { %2925 = shalt.err (!%p2922_p0)
}
  0x30   : > { %s2926_s12 = scalar_lea.vmem %s218_s13, 4096  ;;  %p2934_p11 = scmp.lt.s32.totalorder %s218_s13, %s218_s13 }
  0x31   : > { %p2927_p4 = scmp.ne.s32.totalorder %s218_s13, %s2926_s12  ;;  %p2935_p6 = scmp.lt.s32.totalorder %s2926_s12, %s2926_s12 }
  0x33   : > { %p2929_p3 = pnand %p2927_p4, %p2915_p8  ;;  %p2936_p13 = por %p2935_p6, %p2934_p11 }
  0x35   : > { %p2930_p12 = pneg %p2929_p3 }
  0x37   : > { %p2937_p5 = pnand %p2936_p13, %p2930_p12 }
  0x39   : > { %2940 = shalt.err (!%p2937_p5)
}
  0x3a   : > { %s4449_s17 = smov 64   ;;  %s4451_s18 = smov 4  }
  0x3b   : > { %2530 = dma.hbm_to_vmem [thread:$0]  (!%p3254_p2), %s4509_s4, 4096, %s218_s13, [#allocation9], %s4449_s17, %s4449_s17, %s4451_s18  }
  0x3c   : > { %s3285_s26 = sshll.u32 %s3139_s24, 10  ;;  %p4510_p4 = scmp.ne.s32.totalorder %s4502_s7, 0 }
  0x3d   : > { %p4511_p5 = scmp.lt.s32.totalorder %s3139_s24, 2  ;;  %s4453_s29 = sand.u32 1, %s3139_s24  }
  0x3e   : > { %s4513_s1 = sld [smem:[#allocation67_spill]]  ;;  %s259_s13 = scalar_lea.vmem [#allocation5], %s3263_s16 }
  0x3f   : > { %p3291_p6 = pnand %p4511_p5, %p4510_p4  ;;  %s266_s19 = sshll.u32 %s259_s13, 4  ;;  %s3303_s19 = int_to_ptr.vmem [resolvable:$true] %s266_s19 }
  0x40   : > { %s3307_s7 = scalar_lea.sflag [#allocation6], %s4453_s29 }
  0x41   : > { %p3313_p12 = pneg %p3291_p6 }
  0x44   : > { %s3300_s15 = scalar_lea.hbm %s4513_s1, %s3285_s26  ;;  %s2946_s13 = scalar_lea.hbm %s4513_s1, 2048 }
  0x45   : > { %s2941_s20 = scalar_lea.hbm %s3300_s15, 1024  ;;  %p2947_p0 = scmp.lt.u32.totalorder %s3300_s15, %s4513_s1 }
  0x46   : > { %p2942_p11 = scmp.ne.s32.totalorder %s3300_s15, %s2941_s20  ;;  %p2948_p3 = scmp.lt.u32.totalorder %s2946_s13, %s2941_s20 }
  0x47   : > { %p2950_p8 = scmp.lt.u32.totalorder %s2941_s20, %s3300_s15 }
  0x48   : > { %p2944_p13 = pnand %p3313_p12, %p2942_p11  ;;  %p2949_p7 = por %p2948_p3, %p2947_p0 }
  0x4a   : > { %p2945_p2 = pneg %p2944_p13  ;;  %p2951_p9 = por %p2950_p8, %p2949_p7 }
  0x4c   : > { %p2952_p10 = pnand %p2951_p9, %p2945_p2 }
  0x4e   : > { %2955 = shalt.err (!%p2952_p10)
}
  0x4f   : > { %s2956_s29 = scalar_lea.vmem %s3303_s19, 1024  ;;  %s3144_s12 = smov [#allocation5]  }
  0x50   : > { %p2957_p1 = scmp.ne.s32.totalorder %s3303_s19, %s2956_s29  ;;  %s2961_s14 = sshll.u32 %s3144_s12, 4  ;;  %s2962_s14 = int_to_ptr.vmem [resolvable:$false] %s2961_s14 }
  0x51   : > { %s2963_s4 = scalar_lea.vmem %s2962_s14, 2048  ;;  %p2964_p11 = scmp.lt.s32.totalorder %s3303_s19, %s2962_s14 }
  0x52   : > { %p2959_p4 = pnand %p2957_p1, %p3313_p12  ;;  %p2965_p13 = scmp.lt.s32.totalorder %s2963_s4, %s2956_s29 }
  0x54   : > { %p2960_p5 = pneg %p2959_p4  ;;  %p2966_p0 = por %p2965_p13, %p2964_p11 }
  0x56   : > { %p2967_p3 = pnand %p2966_p0, %p2960_p5 }
  0x58   : > { %2970 = shalt.err (!%p2967_p3)
}
  0x59   : > { %s4515_s18 = smov 4   ;;  %s4516_s20 = smov 64  }
  0x5a   : > { %2537 = dma.hbm_to_vmem [thread:$0]  (!%p3291_p6), %s3300_s15, 1024, %s3303_s19, %s3307_s7, %s4516_s20, %s4516_s20, %s4515_s18  }
  0x5b   : > { %s3344_s29 = scalar_lea.hbm %s4437_s0, %s3285_s26  ;;  %s238_s14 = scalar_lea.vmem [#allocation2], %s3263_s16 }
  0x5c   : > { %s245_s4 = sshll.u32 %s238_s14, 4  ;;  %s4517_s1 = sand.u32 1, %s3135_s23   ;;  %s3347_s4 = int_to_ptr.vmem [resolvable:$true] %s245_s4 }
  0x5d   : > { %s3351_s30 = scalar_lea.sflag [#allocation3], %s4517_s1  ;;  %s2971_s27 = scalar_lea.hbm %s3344_s29, 1024 }
  0x5e   : > { %p2972_p2 = scmp.ne.s32.totalorder %s3344_s29, %s2971_s27  ;;  %s2976_s13 = scalar_lea.hbm %s4437_s0, 2048 }
  0x5f   : > { %p2977_p9 = scmp.lt.u32.totalorder %s3344_s29, %s4437_s0  ;;  %p2978_p10 = scmp.lt.u32.totalorder %s2976_s13, %s2971_s27 }
  0x60   : > { %p2974_p7 = pnand %p2972_p2, %p3313_p12  ;;  %p2980_p4 = scmp.lt.u32.totalorder %s2971_s27, %s3344_s29 }
  0x61   : > { %p2979_p1 = por %p2978_p10, %p2977_p9 }
  0x62   : > { %p2975_p8 = pneg %p2974_p7 }
  0x63   : > { %p2981_p5 = por %p2980_p4, %p2979_p1 }
  0x65   : > { %p2982_p11 = pnand %p2981_p5, %p2975_p8 }
  0x67   : > { %2985 = shalt.err (!%p2982_p11)
}
  0x68   : > { %s2986_s1 = scalar_lea.vmem %s3347_s4, 1024  ;;  %s3145_s14 = smov [#allocation2]  }
  0x69   : > { %p2987_p13 = scmp.ne.s32.totalorder %s3347_s4, %s2986_s1  ;;  %s2991_s15 = sshll.u32 %s3145_s14, 4  ;;  %s2992_s15 = int_to_ptr.vmem [resolvable:$false] %s2991_s15 }
  0x6a   : > { %s2993_s10 = scalar_lea.vmem %s2992_s15, 2048  ;;  %p2994_p2 = scmp.lt.s32.totalorder %s3347_s4, %s2992_s15 }
  0x6b   : > { %p2989_p0 = pnand %p2987_p13, %p3313_p12  ;;  %p2995_p7 = scmp.lt.s32.totalorder %s2993_s10, %s2986_s1 }
  0x6d   : > { %p2990_p3 = pneg %p2989_p0  ;;  %p2996_p9 = por %p2995_p7, %p2994_p2 }
  0x6f   : > { %p2997_p10 = pnand %p2996_p9, %p2990_p3 }
  0x71   : > { %3000 = shalt.err (!%p2997_p10)
}
  0x72   : > { %2534 = dma.hbm_to_vmem [thread:$0]  (!%p3291_p6), %s3344_s29, 1024, %s3347_s4, %s3351_s30, %s4516_s20, %s4516_s20, %s4515_s18  }
  0x73   : > { %s3382_s13 = scalar_lea.hbm %s4439_s2, %s3285_s26  ;;  %s280_s12 = scalar_lea.vmem [#allocation7], %s3263_s16 }
  0x74   : > { %s287_s1 = sshll.u32 %s280_s12, 4  ;;  %s3001_s14 = scalar_lea.hbm %s3382_s13, 1024  ;;  %s3385_s1 = int_to_ptr.vmem [resolvable:$true] %s287_s1 }
  0x75   : > { %p3002_p8 = scmp.ne.s32.totalorder %s3382_s13, %s3001_s14  ;;  %s3006_s29 = scalar_lea.hbm %s4439_s2, 2048 }
  0x76   : > { %p3007_p5 = scmp.lt.u32.totalorder %s3382_s13, %s4439_s2  ;;  %p3008_p11 = scmp.lt.u32.totalorder %s3006_s29, %s3001_s14 }
  0x77   : > { %p3004_p1 = pnand %p3002_p8, %p3313_p12  ;;  %p3010_p0 = scmp.lt.u32.totalorder %s3001_s14, %s3382_s13 }
  0x78   : > { %p3009_p13 = por %p3008_p11, %p3007_p5 }
  0x79   : > { %p3005_p4 = pneg %p3004_p1 }
  0x7a   : > { %p3011_p3 = por %p3010_p0, %p3009_p13 }
  0x7c   : > { %p3012_p2 = pnand %p3011_p3, %p3005_p4 }
  0x7e   : > { %3015 = shalt.err (!%p3012_p2)
}
  0x7f   : > { %s3016_s27 = scalar_lea.vmem %s3385_s1, 1024  ;;  %s3146_s19 = smov [#allocation7]  }
  0x80   : > { %p3017_p7 = scmp.ne.s32.totalorder %s3385_s1, %s3016_s27  ;;  %s3021_s12 = sshll.u32 %s3146_s19, 4  ;;  %s3022_s12 = int_to_ptr.vmem [resolvable:$false] %s3021_s12 }
  0x81   : > { %s3023_s15 = scalar_lea.vmem %s3022_s12, 2048  ;;  %p3024_p8 = scmp.lt.s32.totalorder %s3385_s1, %s3022_s12 }
  0x82   : > { %p3019_p9 = pnand %p3017_p7, %p3313_p12  ;;  %p3025_p1 = scmp.lt.s32.totalorder %s3023_s15, %s3016_s27 }
  0x84   : > { %p3020_p10 = pneg %p3019_p9  ;;  %p3026_p5 = por %p3025_p1, %p3024_p8 }
  0x86   : > { %p3027_p11 = pnand %p3026_p5, %p3020_p10 }
  0x88   : > { %3030 = shalt.err (!%p3027_p11)
}
  0x89   : > { %2540 = dma.hbm_to_vmem [thread:$0]  (!%p3291_p6), %s3382_s13, 1024, %s3385_s1, %s3307_s7, %s4516_s20, %s4516_s20, %s4515_s18  }
  0x8a   : > { %s3416_s29 = scalar_lea.hbm %s4440_s3, %s3285_s26  ;;  %s301_s4 = scalar_lea.vmem [#allocation8], %s3263_s16 }
  0x8b   : > { %s308_s10 = sshll.u32 %s301_s4, 4  ;;  %s4518_s27 = sand.u32 1, %s3139_s24   ;;  %s3419_s10 = int_to_ptr.vmem [resolvable:$true] %s308_s10 }
  0x8c   : > { %s3423_s19 = scalar_lea.sflag [#allocation9], %s4518_s27  ;;  %s3031_s12 = scalar_lea.hbm %s3416_s29, 1024 }
  0x8d   : > { %p3032_p4 = scmp.ne.s32.totalorder %s3416_s29, %s3031_s12  ;;  %s3036_s26 = scalar_lea.hbm %s4440_s3, 2048 }
  0x8e   : > { %p3037_p3 = scmp.lt.u32.totalorder %s3416_s29, %s4440_s3  ;;  %p3038_p2 = scmp.lt.u32.totalorder %s3036_s26, %s3031_s12 }
  0x8f   : > { %p3034_p13 = pnand %p3032_p4, %p3313_p12  ;;  %p3040_p9 = scmp.lt.u32.totalorder %s3031_s12, %s3416_s29 }
  0x90   : > { %p3039_p7 = por %p3038_p2, %p3037_p3 }
  0x91   : > { %p3035_p0 = pneg %p3034_p13 }
  0x92   : > { %p3041_p10 = por %p3040_p9, %p3039_p7 }
  0x94   : > { %p3042_p8 = pnand %p3041_p10, %p3035_p0 }
  0x96   : > { %3045 = shalt.err (!%p3042_p8)
}
  0x97   : > { %s3046_s16 = scalar_lea.vmem %s3419_s10, 1024  ;;  %s3147_s14 = smov [#allocation8]  }
  0x98   : > { %p3047_p1 = scmp.ne.s32.totalorder %s3419_s10, %s3046_s16  ;;  %s3051_s30 = sshll.u32 %s3147_s14, 4  ;;  %s3052_s30 = int_to_ptr.vmem [resolvable:$false] %s3051_s30 }
  0x99   : > { %s3053_s4 = scalar_lea.vmem %s3052_s30, 2048  ;;  %p3054_p4 = scmp.lt.s32.totalorder %s3419_s10, %s3052_s30 }
  0x9a   : > { %p3049_p5 = pnand %p3047_p1, %p3313_p12  ;;  %p3055_p13 = scmp.lt.s32.totalorder %s3053_s4, %s3046_s16 }
  0x9c   : > { %p3050_p11 = pneg %p3049_p5  ;;  %p3056_p3 = por %p3055_p13, %p3054_p4 }
  0x9e   : > { %p3057_p2 = pnand %p3056_p3, %p3050_p11 }
  0xa0   : > { %3060 = shalt.err (!%p3057_p2)
}
  0xa1   : > { %2543 = dma.hbm_to_vmem [thread:$0]  (!%p3291_p6), %s3416_s29, 1024, %s3419_s10, %s3423_s19, %s4516_s20, %s4516_s20, %s4515_s18  }
  0xa2   : > { %p4519_p12 = scmp.ne.s32.totalorder %s4507_s11, 0 }
  0xa4   : > { %320 = sbr.rel (%p4519_p12) target bundleno = 664 (0x298), region = 44 }
  0xab   : > { %s3453_s17 = sand.u32 1, %s3131_s22   ;;  %p4520_p0 = scmp.ne.s32.totalorder %s4503_s8, 0 }
  0xac   : > { %s2237_s27 = sshll.u32 %s3453_s17, 6  ;;  %s323_s12 = scalar_lea.sflag [#allocation3], %s3453_s17 }
  0xad   : > { %s3457_s7 = scalar_lea.vmem [#allocation2], %s2237_s27 }
  0xae   : > { %3106 = dma.done.wait (%p4520_p0), %s323_s12, 1024  }
  0xaf   : > { %3108 = vsyncadd (%p4520_p0), %s323_s12, 4294966272  ;;  %s331_s28 = sand.u32 1, %s3207_s25   ;;  %s3464_s18 = scalar_lea.vmem [#allocation5], %s2237_s27 }
  0xb0   : > { %s332_s11 = scalar_lea.sflag [#allocation6], %s331_s28 }
  0xb1   : > { %3110 = dma.done.wait (%p4520_p0), %s332_s11, 2048  }
  0xb2   : > { %3112 = vsyncadd (%p4520_p0), %s332_s11, 4294965248  ;;  %s3470_s20 = scalar_lea.vmem [#allocation7], %s2237_s27  ;;  %s350_s29 = scalar_lea.sflag [#allocation9], %s331_s28 }
  0xb3   : > { %s3472_s10 = scalar_lea.vmem [#allocation8], %s2237_s27 }
  0xb4   : > { %3114 = dma.done.wait (%p4520_p0), %s350_s29, 1024  }
  0xb5   : > { %3116 = vsyncadd (%p4520_p0), %s350_s29, 4294966272  ;;  %p4521_p6 = scmp.eq.s32.totalorder %s3207_s25, 0 }
  0xb7   : > { %3118 = dma.done.wait (%p4521_p6), [#allocation9], 4096   ;;  %p4522_p7 = pmov %p4521_p6 }
  0xb8   : > { %v2589_v0 = vld [vmem:[#allocation10] sm:$0xff]   ;;  %v2591_v2 = vld [vmem:[#allocation10 + $0x8] sm:$0xff]   ;;  %v2593_v4 = vld [vmem:[#allocation10 + $0x10] sm:$0xff]   ;;  %s2242_s30 = sshll.u32 %s3453_s17, 7  ;;  %s2059_s29 = scalar_lea.sflag [#allocation4], %s3453_s17 }
  0xb9   : > { %3120 = vsyncadd (%p4522_p7), [#allocation9], 4294963200  ;;  %v2590_v1 = vld [vmem:[#allocation10 + $0x40] sm:$0xff]   ;;  %2385 = vmatprep.subr.bf16.mxu0 %v2589_v0  ;;  %v2592_v3 = vld [vmem:[#allocation10 + $0x48] sm:$0xff]   ;;  %s4165_s4 = scalar_lea.vmem [#allocation11], %s2242_s30  ;;  %p4676_p10 = scmp.ne.s32.totalorder %s4504_s9, 0 }
  0xba   : > { %2417 = vmatprep.subr.bf16.mxu1 %v2590_v1  ;;  %2386 = vmatpush3.bf16.msra.mxu0 %v2589_v0  ;;  %v2594_v5 = vld [vmem:[#allocation10 + $0x50] sm:$0xff]   ;;  %v2595_v6 = vld [vmem:[#allocation10 + $0x18] sm:$0xff]   ;;  %v2597_v8 = vld [vmem:[#allocation10 + $0x20] sm:$0xff]   ;;  %s2072_s28 = sshll.u32 %s4165_s4, 4  ;;  %s4392_s28 = int_to_ptr.vmem [resolvable:$true] %s2072_s28 }
  0xbb   : > { %2418 = vmatpush3.bf16.msra.mxu1 %v2590_v1  ;;  %2387 = vmatprep.subr.bf16.mxu0 %v2591_v2  ;;  %v2596_v7 = vld [vmem:[#allocation10 + $0x58] sm:$0xff]   ;;  %v2598_v9 = vld [vmem:[#allocation10 + $0x60] sm:$0xff]   ;;  %v2599_v10 = vld [vmem:[#allocation10 + $0x28] sm:$0xff]  }
  0xbc   : > { %2419 = vmatprep.subr.bf16.mxu1 %v2592_v3  ;;  %v3483_v11 = vld [vmem:[%s3457_s7] sm:$0xff]   ;;  %v2600_v13 = vld [vmem:[#allocation10 + $0x68] sm:$0xff]   ;;  %v2601_v14 = vld [vmem:[#allocation10 + $0x30] sm:$0xff]  }
  0xbd   : > { %v3486_v12 = vld [vmem:[%s3464_s18] sm:$0xff]   ;;  %2401 = vmatprep.mubr.bf16.mxu0 %v3483_v11  ;;  %v2602_v15 = vld [vmem:[#allocation10 + $0x70] sm:$0xff]   ;;  %v2603_v16 = vld [vmem:[#allocation10 + $0x38] sm:$0xff]  }
  0xbe   : > { %2388 = vmatpush3.bf16.msra.mxu0 %v2591_v2  ;;  %2433 = vmatprep.mubr.bf16.mxu1 %v3486_v12  ;;  %v2604_v17 = vld [vmem:[#allocation10 + $0x78] sm:$0xff]   ;;  %v3491_v18 = vld [vmem:[%s3457_s7 + $0x8] sm:$0xff]   ;;  %v2609_v20 = vld [vmem:[#allocation10 + $0x80] sm:$0xff]  }
  0xbf   : > { %2420 = vmatpush3.bf16.msra.mxu1 %v2592_v3  ;;  %2389 = vmatprep.subr.bf16.mxu0 %v2593_v4  ;;  %v3494_v19 = vld [vmem:[%s3464_s18 + $0x8] sm:$0xff]   ;;  %v2610_v21 = vld [vmem:[#allocation10 + $0xc0] sm:$0xff]   ;;  %v3497_v22 = vld [vmem:[%s3457_s7 + $0x10] sm:$0xff]  }
  0xc0   : > { %2421 = vmatprep.subr.bf16.mxu1 %v2594_v5  ;;  %v3500_v23 = vld [vmem:[%s3464_s18 + $0x10] sm:$0xff]   ;;  %v2611_v24 = vld [vmem:[#allocation10 + $0x88] sm:$0xff]   ;;  %v3504_v26 = vld [vmem:[%s3457_s7 + $0x18] sm:$0xff]  }
  0xc1   : > { %v2612_v25 = vld [vmem:[#allocation10 + $0xc8] sm:$0xff]   ;;  %v3508_v27 = vld [vmem:[%s3464_s18 + $0x18] sm:$0xff]   ;;  %v2617_v28 = vld [vmem:[#allocation10 + $0x90] sm:$0xff]  }
  0xc2   : > { %2390 = vmatpush3.bf16.msra.mxu0 %v2593_v4  ;;  %v2618_v29 = vld [vmem:[#allocation10 + $0xd0] sm:$0xff]   ;;  %v3513_v30 = vld [vmem:[%s3457_s7 + $0x20] sm:$0xff]   ;;  %v2619_v32 = vld [vmem:[#allocation10 + $0x98] sm:$0xff]  }
  0xc3   : > { %2422 = vmatpush3.bf16.msra.mxu1 %v2594_v5  ;;  %2391 = vmatprep.subr.bf16.mxu0 %v2595_v6  ;;  %v3516_v31 = vld [vmem:[%s3464_s18 + $0x20] sm:$0xff]   ;;  %v2620_v33 = vld [vmem:[#allocation10 + $0xd8] sm:$0xff]   ;;  %v3521_v34 = vld [vmem:[%s3457_s7 + $0x28] sm:$0xff]  }
  0xc4   : > { %2423 = vmatprep.subr.bf16.mxu1 %v2596_v7  ;;  %v3524_v35 = vld [vmem:[%s3464_s18 + $0x28] sm:$0xff]   ;;  %v2625_v36 = vld [vmem:[#allocation10 + $0xa0] sm:$0xff]   ;;  %v3529_v38 = vld [vmem:[%s3457_s7 + $0x30] sm:$0xff]  }
  0xc5   : > { %v2626_v37 = vld [vmem:[#allocation10 + $0xe0] sm:$0xff]   ;;  %v3532_v39 = vld [vmem:[%s3464_s18 + $0x30] sm:$0xff]   ;;  %v2627_v40 = vld [vmem:[#allocation10 + $0xa8] sm:$0xff]  }
  0xc6   : > { %2392 = vmatpush3.bf16.msra.mxu0 %v2595_v6  ;;  %v2628_v41 = vld [vmem:[#allocation10 + $0xe8] sm:$0xff]   ;;  %v3537_v42 = vld [vmem:[%s3457_s7 + $0x38] sm:$0xff]   ;;  %v2633_v44 = vld [vmem:[#allocation10 + $0xb0] sm:$0xff]   ;;  %s2320_s7 = sshll.u32 %s3207_s25, 11  ;;  %s3148_s25 = smov [#allocation11]  }
  0xc7   : > { %2424 = vmatpush3.bf16.msra.mxu1 %v2596_v7  ;;  %2393 = vmatprep.subr.bf16.mxu0 %v2597_v8  ;;  %v3540_v43 = vld [vmem:[%s3464_s18 + $0x38] sm:$0xff]   ;;  %v2634_v45 = vld [vmem:[#allocation10 + $0xf0] sm:$0xff]   ;;  %v3545_v46 = vld [vmem:[%s3470_s20] sm:$0xff]   ;;  %s3065_s8 = sshll.u32 %s3148_s25, 4  ;;  %s3066_s8 = int_to_ptr.vmem [resolvable:$false] %s3065_s8 }
  0xc8   : > { %2425 = vmatprep.subr.bf16.mxu1 %v2598_v9  ;;  %v3548_v47 = vld [vmem:[%s3472_s10] sm:$0xff]   ;;  %v2635_v48 = vld [vmem:[#allocation10 + $0xb8] sm:$0xff]   ;;  %v3553_v50 = vld [vmem:[%s3470_s20 + $0x8] sm:$0xff]   ;;  %s3067_s19 = scalar_lea.vmem %s3066_s8, 4096  ;;  %p3068_p5 = scmp.lt.s32.totalorder %s4392_s28, %s3066_s8 }
  0xc9   : > { %4523 = vst [vmem:[#allocation20_spill] sm:$0xff] %v3548_v47  ;;  %v2636_v49 = vld [vmem:[#allocation10 + $0xf8] sm:$0xff]   ;;  %v3556_v51 = vld [vmem:[%s3472_s10 + $0x8] sm:$0xff]   ;;  %v3559_v52 = vld [vmem:[%s3470_s20 + $0x10] sm:$0xff]  }
  0xca   : > { %2394 = vmatpush3.bf16.msra.mxu0 %v2597_v8  ;;  %4524 = vst [vmem:[#allocation21_spill] sm:$0xff] %v3559_v52  ;;  %v3563_v53 = vld [vmem:[%s3472_s10 + $0x10] sm:$0xff]   ;;  %v3570_v54 = vld [vmem:[%s3470_s20 + $0x18] sm:$0xff]   ;;  %v3577_v56 = vld [vmem:[%s3470_s20 + $0x20] sm:$0xff]  }
  0xcb   : > { %2426 = vmatpush3.bf16.msra.mxu1 %v2598_v9  ;;  %2395 = vmatprep.subr.bf16.mxu0 %v2599_v10  ;;  %4525 = vst [vmem:[#allocation22_spill] sm:$0xff] %v3563_v53  ;;  %4526 = vst [vmem:[#allocation23_spill] sm:$0xff] %v3570_v54  ;;  %v3574_v55 = vld [vmem:[%s3472_s10 + $0x18] sm:$0xff]   ;;  %v3580_v57 = vld [vmem:[%s3472_s10 + $0x20] sm:$0xff]  }
  0xcc   : > { %2427 = vmatprep.subr.bf16.mxu1 %v2600_v13  ;;  %4527 = vst [vmem:[#allocation24_spill] sm:$0xff] %v3574_v55  ;;  %4528 = vst [vmem:[#allocation25_spill] sm:$0xff] %v3577_v56  ;;  %v3586_v58 = vld [vmem:[%s3470_s20 + $0x28] sm:$0xff]   ;;  %v3593_v60 = vld [vmem:[%s3470_s20 + $0x30] sm:$0xff]  }
  0xcd   : > { %4529 = vst [vmem:[#allocation26_spill] sm:$0xff] %v3580_v57  ;;  %4530 = vst [vmem:[#allocation27_spill] sm:$0xff] %v3586_v58  ;;  %v3590_v59 = vld [vmem:[%s3472_s10 + $0x28] sm:$0xff]   ;;  %v1534_v61 = vld [vmem:[%s3472_s10 + $0x30] sm:$0xff]  }
  0xce   : > { %2396 = vmatpush3.bf16.msra.mxu0 %v2599_v10  ;;  %4531 = vst [vmem:[#allocation28_spill] sm:$0xff] %v3590_v59  ;;  %4532 = vst [vmem:[#allocation29_spill] sm:$0xff] %v3593_v60  ;;  %v3600_v62 = vld [vmem:[%s3470_s20 + $0x38] sm:$0xff]  }
  0xcf   : > { %2428 = vmatpush3.bf16.msra.mxu1 %v2600_v13  ;;  %2397 = vmatprep.subr.bf16.mxu0 %v2601_v14  ;;  %4533 = vst [vmem:[#allocation30_spill] sm:$0xff] %v3600_v62  ;;  %v1536_v63 = vld [vmem:[%s3472_s10 + $0x38] sm:$0xff]  }
  0xd0   : > { %2429 = vmatprep.subr.bf16.mxu1 %v2602_v15 }
  0xd2   : > { %2398 = vmatpush3.bf16.msra.mxu0 %v2601_v14 }
  0xd3   : > { %2430 = vmatpush3.bf16.msra.mxu1 %v2602_v15  ;;  %2399 = vmatprep.subr.bf16.mxu0 %v2603_v16 }
  0xd4   : > { %2431 = vmatprep.subr.bf16.mxu1 %v2604_v17 }
  0xd6   : > { %2400 = vmatpush3.bf16.msra.mxu0 %v2603_v16 }
  0xd7   : > { %2432 = vmatpush3.bf16.msra.mxu1 %v2604_v17  ;;  %2449 = vmatprep.subr.bf16.mxu0 %v2609_v20 }
  0xd8   : > { %2481 = vmatprep.subr.bf16.mxu1 %v2610_v21 }
  0xd9   : > { %2402 = vmatmul.mubr.bf16.vlgmr.msra.gmra.mrb[0].mxu0 %v3491_v18 }
  0xda   : > { %2434 = vmatmul.mubr.bf16.vlgmr.msra.gmra.mrb[0].mxu1 %v3494_v19  ;;  %2450 = vmatpush3.bf16.msra.mxu0 %v2609_v20 }
  0xdb   : > { %2482 = vmatpush3.bf16.msra.mxu1 %v2610_v21  ;;  %2451 = vmatprep.subr.bf16.mxu0 %v2611_v24 }
  0xdc   : > { %2483 = vmatprep.subr.bf16.mxu1 %v2612_v25  ;;  %2405 = vmatprep.mubr.bf16.mxu0 %v3497_v22 }
  0xdd   : > { %2437 = vmatprep.mubr.bf16.mxu1 %v3500_v23 }
  0xde   : > { %2452 = vmatpush3.bf16.msra.mxu0 %v2611_v24 }
  0xdf   : > { %2484 = vmatpush3.bf16.msra.mxu1 %v2612_v25  ;;  %2453 = vmatprep.subr.bf16.mxu0 %v2617_v28 }
  0xe0   : > { %2485 = vmatprep.subr.bf16.mxu1 %v2618_v29 }
  0xe1   : > { %2406 = vmatmul.mubr.bf16.gmra.mrb[4].mxu0 %v3504_v26 }
  0xe2   : > { %2438 = vmatmul.mubr.bf16.gmra.mrb[4].mxu1 %v3508_v27  ;;  %2454 = vmatpush3.bf16.msra.mxu0 %v2617_v28 }
  0xe3   : > { %2486 = vmatpush3.bf16.msra.mxu1 %v2618_v29  ;;  %2455 = vmatprep.subr.bf16.mxu0 %v2619_v32 }
  0xe4   : > { %2487 = vmatprep.subr.bf16.mxu1 %v2620_v33  ;;  %2409 = vmatprep.mubr.bf16.mxu0 %v3513_v30 }
  0xe5   : > { %2441 = vmatprep.mubr.bf16.mxu1 %v3516_v31 }
  0xe6   : > { %2456 = vmatpush3.bf16.msra.mxu0 %v2619_v32 }
  0xe7   : > { %2488 = vmatpush3.bf16.msra.mxu1 %v2620_v33  ;;  %2457 = vmatprep.subr.bf16.mxu0 %v2625_v36 }
  0xe8   : > { %2489 = vmatprep.subr.bf16.mxu1 %v2626_v37 }
  0xe9   : > { %2410 = vmatmul.mubr.bf16.gmra.mrb[8].mxu0 %v3521_v34 }
  0xea   : > { %2442 = vmatmul.mubr.bf16.gmra.mrb[8].mxu1 %v3524_v35  ;;  %2458 = vmatpush3.bf16.msra.mxu0 %v2625_v36 }
  0xeb   : > { %2490 = vmatpush3.bf16.msra.mxu1 %v2626_v37  ;;  %2459 = vmatprep.subr.bf16.mxu0 %v2627_v40  ;;  %v3654_v37 = vld [vmem:[%s4442_s5 + $0x1] ss:$0 sm:$0xff] }
  0xec   : > { %2491 = vmatprep.subr.bf16.mxu1 %v2628_v41  ;;  %2413 = vmatprep.mubr.bf16.mxu0 %v3529_v38 }
  0xed   : > { %2445 = vmatprep.mubr.bf16.mxu1 %v3532_v39 }
  0xee   : > { %2460 = vmatpush3.bf16.msra.mxu0 %v2627_v40 }
  0xef   : > { %2492 = vmatpush3.bf16.msra.mxu1 %v2628_v41  ;;  %2461 = vmatprep.subr.bf16.mxu0 %v2633_v44 }
  0xf0   : > { %2493 = vmatprep.subr.bf16.mxu1 %v2634_v45 }
  0xf1   : > { %2414 = vmatmul.mubr.bf16.gmra.mrb[12].mxu0 %v3537_v42 }
  0xf2   : > { %2446 = vmatmul.mubr.bf16.gmra.mrb[12].mxu1 %v3540_v43  ;;  %2462 = vmatpush3.bf16.msra.mxu0 %v2633_v44 }
  0xf3   : > { %2494 = vmatpush3.bf16.msra.mxu1 %v2634_v45  ;;  %2463 = vmatprep.subr.bf16.mxu0 %v2635_v48  ;;  %v3645_v45 = vld [vmem:[%s4442_s5] ss:$0 sm:$0xff] }
  0xf4   : > { %2495 = vmatprep.subr.bf16.mxu1 %v2636_v49  ;;  %2465 = vmatprep.mubr.bf16.mxu0 %v3545_v46 }
  0xf5   : > { %2497 = vmatprep.mubr.bf16.mxu1 %v3548_v47 }
  0xf6   : > { %2464 = vmatpush3.bf16.msra.mxu0 %v2635_v48 }
  0xf7   : > { %2496 = vmatpush3.bf16.msra.mxu1 %v2636_v49 }
  0xf9   : > { %2466 = vmatmul.mubr.bf16.vlgmr.msra.gmra.mrb[16].mxu0 %v3553_v50 }
  0xfa   : > { %2498 = vmatmul.mubr.bf16.vlgmr.msra.gmra.mrb[16].mxu1 %v3556_v51  ;;  %2469 = vmatprep.mubr.bf16.mxu0 %v3559_v52 }
  0xfb   : > { %2501 = vmatprep.mubr.bf16.mxu1 %v3563_v53 }
 0x101   : > { %2470 = vmatmul.mubr.bf16.gmra.mrb[20].mxu0 %v3570_v54 }
 0x102   : > { %2502 = vmatmul.mubr.bf16.gmra.mrb[20].mxu1 %v3574_v55  ;;  %2473 = vmatprep.mubr.bf16.mxu0 %v3577_v56 }
 0x103   : > { %2505 = vmatprep.mubr.bf16.mxu1 %v3580_v57  ;;  %v4537_v57 = vunpack.c.l.bf16 %v3494_v19 }
 0x109   : > { %2474 = vmatmul.mubr.bf16.gmra.mrb[24].mxu0 %v3586_v58 }
 0x10a   : > { %2506 = vmatmul.mubr.bf16.gmra.mrb[24].mxu1 %v3590_v59  ;;  %2477 = vmatprep.mubr.bf16.mxu0 %v3593_v60 }
 0x10b   : > { %2509 = vmatprep.mubr.bf16.mxu1 %v1534_v61 }
 0x111   : > { %2478 = vmatmul.mubr.bf16.gmra.mrb[28].mxu0 %v3600_v62 }
 0x112   : > { %2510 = vmatmul.mubr.bf16.gmra.mrb[28].mxu1 %v1536_v63 }
 0x1ac   : > { %v2403_v48 = vpop.f32.mrb[0].mxu0 }
 0x1ad   : > { %v588_v25 = vadd.f32 %v2403_v48, %v3645_v45  ;;  %v2435_v21 = vpop.f32.mrb[0].mxu1  ;;  %v579_v33 = vpop.f32.mrb[1].mxu0 }
 0x1ae   : > { %v836_v40 = vadd.f32 %v2435_v21, %v3654_v37  ;;  %v580_v36 = vadd.f32 %v3645_v45, %v579_v33  ;;  %v827_v44 = vpop.f32.mrb[1].mxu1  ;;  %v2404_v24 = vpop.f32.mrb[2].mxu0 }
 0x1af   : > { %v828_v63 = vadd.f32 %v3654_v37, %v827_v44  ;;  %v591_v48 = vadd.f32 %v2404_v24, %v3645_v45  ;;  %v2436_v20 = vpop.f32.mrb[2].mxu1  ;;  %v582_v32 = vpop.f32.mrb[3].mxu0 }
 0x1b0   : > { %v3673_v28 = vmax.f32 %v588_v25, %v836_v40  ;;  %v839_v21 = vadd.f32 %v2436_v20, %v3654_v37  ;;  %v583_v33 = vadd.f32 %v3645_v45, %v582_v32  ;;  %v830_v41 = vpop.f32.mrb[3].mxu1 }
 0x1b1   : > { %v3679_v61 = vmax.f32 %v580_v36, %v828_v63  ;;  %v831_v44 = vadd.f32 %v3654_v37, %v830_v41 }
 0x1b2   : > { %v924_v9 = vsub.f32 %v588_v25, %v3673_v28  ;;  %v972_v29 = vsub.f32 %v836_v40, %v3673_v28  ;;  %v3685_v17 = vmax.f32 %v591_v48, %v839_v21 }
 0x1b3   : > { %v922_v32 = vsub.f32 %v580_v36, %v3679_v61  ;;  %v970_v13 = vsub.f32 %v828_v63, %v3679_v61  ;;  %v3690_v15 = vmax.f32 %v583_v33, %v831_v44 }
 0x1b4   : > { %v942_v49 = vmul.f32 1.442695, %v924_v9  ;;  %v990_v10 = vmul.f32 1.442695, %v972_v29  ;;  %v925_v41 = vsub.f32 %v591_v48, %v3685_v17  ;;  %v973_v24 = vsub.f32 %v839_v21, %v3685_v17  ;;  %v2407_v8 = vpop.f32.mrb[4].mxu0 }
 0x1b5   : > { %v938_v25 = vmul.f32 1.442695, %v922_v32  ;;  %v986_v16 = vmul.f32 1.442695, %v970_v13  ;;  %v923_v40 = vsub.f32 %v583_v33, %v3690_v15  ;;  %v971_v14 = vsub.f32 %v831_v44, %v3690_v15  ;;  %v2439_v20 = vpop.f32.mrb[4].mxu1  ;;  %v595_v3 = vpop.f32.mrb[5].mxu0 }
 0x1b6   : > { %2685 = vpow2.f32 %v942_v49  ;;  %v944_v36 = vmul.f32 1.442695, %v925_v41  ;;  %v992_v63 = vmul.f32 1.442695, %v973_v24  ;;  %v604_v1 = vadd.f32 %v2407_v8, %v3645_v45  ;;  %v843_v9 = vpop.f32.mrb[5].mxu1  ;;  %v2408_v29 = vpop.f32.mrb[6].mxu0 }
 0x1b7   : > { %2687 = vpow2.f32 %v990_v10  ;;  %v940_v48 = vmul.f32 1.442695, %v923_v40  ;;  %v988_v7 = vmul.f32 1.442695, %v971_v14  ;;  %v852_v21 = vadd.f32 %v2439_v20, %v3654_v37  ;;  %v2440_v32 = vpop.f32.mrb[6].mxu1  ;;  %v598_v13 = vpop.f32.mrb[7].mxu0 }
 0x1b8   : > { %2689 = vpow2.f32 %v938_v25  ;;  %v596_v33 = vadd.f32 %v3645_v45, %v595_v3  ;;  %v844_v44 = vadd.f32 %v3654_v37, %v843_v9  ;;  %v607_v49 = vadd.f32 %v2408_v29, %v3645_v45  ;;  %v846_v41 = vpop.f32.mrb[7].mxu1 }
 0x1b9   : > { %2691 = vpow2.f32 %v986_v16  ;;  %v3701_v24 = vmax.f32 %v604_v1, %v852_v21  ;;  %v855_v8 = vadd.f32 %v2440_v32, %v3654_v37  ;;  %v599_v10 = vadd.f32 %v3645_v45, %v598_v13 }
 0x1ba   : > { %2693 = vpow2.f32 %v944_v36  ;;  %v3706_v20 = vmax.f32 %v596_v33, %v844_v44  ;;  %v847_v25 = vadd.f32 %v3654_v37, %v846_v41 }
 0x1bb   : > { %2695 = vpow2.f32 %v992_v63  ;;  %v928_v3 = vsub.f32 %v604_v1, %v3701_v24  ;;  %v976_v40 = vsub.f32 %v852_v21, %v3701_v24  ;;  %v3711_v9 = vmax.f32 %v607_v49, %v855_v8 }
 0x1bc   : > { %2697 = vpow2.f32 %v940_v48  ;;  %v926_v16 = vsub.f32 %v596_v33, %v3706_v20  ;;  %v974_v29 = vsub.f32 %v844_v44, %v3706_v20  ;;  %v3715_v32 = vmax.f32 %v599_v10, %v847_v25  ;;  %v2411_v13 = vpop.f32.mrb[8].mxu0 }
 0x1bd   : > { %4534 = vst [vmem:[#allocation31_spill] sm:$0xff] %v3711_v9  ;;  %2699 = vpow2.f32 %v988_v7  ;;  %v950_v36 = vmul.f32 1.442695, %v928_v3  ;;  %v998_v14 = vmul.f32 1.442695, %v976_v40  ;;  %v929_v41 = vsub.f32 %v607_v49, %v3711_v9  ;;  %v2443_v63 = vpop.f32.mrb[8].mxu1 }
 0x1be   : > { %4535 = vst [vmem:[#allocation32_spill] sm:$0xff] %v3715_v32  ;;  %v611_v5 = vpop.f32.mrb[9].mxu0  ;;  %v946_v1 = vmul.f32 1.442695, %v926_v16  ;;  %v994_v2 = vmul.f32 1.442695, %v974_v29  ;;  %v977_v21 = vsub.f32 %v855_v8, %v3711_v9  ;;  %v927_v48 = vsub.f32 %v599_v10, %v3715_v32 }
 0x1bf   : > { %v859_v0 = vpop.f32.mrb[9].mxu1  ;;  %v2412_v33 = vpop.f32.mrb[10].mxu0  ;;  %2701 = vpow2.f32 %v950_v36  ;;  %v952_v44 = vmul.f32 1.442695, %v929_v41  ;;  %v975_v6 = vsub.f32 %v847_v25, %v3715_v32  ;;  %v620_v7 = vadd.f32 %v2411_v13, %v3645_v45 }
 0x1c0   : > { %v2444_v3 = vpop.f32.mrb[10].mxu1  ;;  %v614_v40 = vpop.f32.mrb[11].mxu0  ;;  %2703 = vpow2.f32 %v998_v14  ;;  %v1000_v49 = vmul.f32 1.442695, %v977_v21  ;;  %v948_v60 = vmul.f32 1.442695, %v927_v48  ;;  %v868_v16 = vadd.f32 %v2443_v63, %v3654_v37 }
 0x1c1   : > { %v2686_v4 = vpop.eup %2685  ;;  %v3723_v29 = vpop.f32.mrb[11].mxu1  ;;  %v4536_v10 = vunpack.c.l.bf16 %v3491_v18  ;;  %2705 = vpow2.f32 %v946_v1  ;;  %v996_v36 = vmul.f32 1.442695, %v975_v6  ;;  %v612_v25 = vadd.f32 %v3645_v45, %v611_v5 }
 0x1c2   : > { %v2688_v8 = vpop.eup %2687  ;;  %2707 = vpow2.f32 %v994_v2  ;;  %v3732_v21 = vmax.f32 %v620_v7, %v868_v16  ;;  %v4539_v48 = vunpack.c.l.bf16 %v3483_v11  ;;  %v3738_v6 = vadd.f32 %v2412_v33, %v3645_v45 }
 0x1c3   : > { %v1036_v62 = vmul.f32 %v2686_v4, %v4536_v10  ;;  %v2690_v41 = vpop.eup %2689  ;;  %v3728_v13 = vadd.f32 %v2688_v8, %v2686_v4  ;;  %v1052_v14 = vmul.f32 %v2688_v8, %v4537_v57  ;;  %2709 = vpow2.f32 %v952_v44 }
 0x1c4   : > { %4538 = vst [vmem:[#allocation33_spill] sm:$0xff] %v3732_v21  ;;  %v2692_v63 = vpop.eup %2691  ;;  %v1034_v59 = vmul.f32 %v2690_v41, %v4539_v48  ;;  %v860_v10 = vadd.f32 %v3654_v37, %v859_v0  ;;  %v4540_v57 = vunpack.c.l.bf16 %v3486_v12  ;;  %2711 = vpow2.f32 %v1000_v49  ;;  %v3746_v8 = vpop.f32.mrb[12].mxu0 }
 0x1c5   : > { %v2694_v5 = vpop.eup %2693  ;;  %v3740_v1 = vadd.f32 %v1052_v14, %v1036_v62  ;;  %v3742_v4 = vadd.f32 %v2692_v63, %v2690_v41  ;;  %v4541_v48 = vunpack.c.h.bf16 %v3491_v18  ;;  %2713 = vpow2.f32 %v948_v60  ;;  %v3752_v58 = vpop.f32.mrb[12].mxu1 }
 0x1c6   : > { %v1050_v2 = vmul.f32 %v2692_v63, %v4540_v57  ;;  %v2696_v56 = vpop.eup %2695  ;;  %v932_v0 = vsub.f32 %v620_v7, %v3732_v21  ;;  %v980_v33 = vsub.f32 %v868_v16, %v3732_v21  ;;  %v3754_v62 = vpop.f32.mrb[13].mxu0  ;;  %v4542_v49 = vunpack.c.h.bf16 %v3494_v19 }
 0x1c7   : > { %v1037_v44 = vmul.f32 %v2694_v5, %v4541_v48  ;;  %v2698_v41 = vpop.eup %2697  ;;  %v3758_v63 = vadd.f32 %v2696_v56, %v2694_v5  ;;  %2715 = vpow2.f32 %v996_v36  ;;  %v3762_v18 = vpop.f32.mrb[13].mxu1  ;;  %v4543_v16 = vunpack.c.h.bf16 %v3483_v11 }
 0x1c8   : > { %v3756_v14 = vadd.f32 %v1050_v2, %v1034_v59  ;;  %v1053_v57 = vmul.f32 %v2696_v56, %v4542_v49  ;;  %v3764_v60 = vpop.f32.mrb[14].mxu0  ;;  %v2700_v7 = vpop.eup %2699  ;;  %v958_v53 = vmul.f32 1.442695, %v932_v0  ;;  %v1006_v21 = vmul.f32 1.442695, %v980_v33 }
 0x1c9   : > { %v1035_v48 = vmul.f32 %v2698_v41, %v4543_v16  ;;  %v3768_v55 = vmax.f32 %v612_v25, %v860_v10  ;;  %v3770_v59 = vpop.f32.mrb[14].mxu1  ;;  %v3772_v5 = vpop.f32.mrb[15].mxu0  ;;  %v3776_v19 = vadd.f32 %v2700_v7, %v2698_v41  ;;  %v4545_v56 = vunpack.c.h.bf16 %v3486_v12 }
 0x1ca   : > { %v3774_v2 = vadd.f32 %v1053_v57, %v1037_v44  ;;  %v871_v49 = vadd.f32 %v2444_v3, %v3654_v37  ;;  %v3781_v52 = vpop.f32.mrb[15].mxu1  ;;  %v2702_v11 = vpop.eup %2701  ;;  %2717 = vpow2.f32 %v958_v53  ;;  %v615_v16 = vadd.f32 %v3645_v45, %v614_v40 }
 0x1cb   : > { %4544 = vst [vmem:[#allocation34_spill] sm:$0xff] %v3768_v55  ;;  %v1051_v36 = vmul.f32 %v2700_v7, %v4545_v56  ;;  %v930_v0 = vsub.f32 %v612_v25, %v3768_v55  ;;  %v978_v33 = vsub.f32 %v860_v10, %v3768_v55  ;;  %v2704_v54 = vpop.eup %2703  ;;  %v4546_v41 = vunpack.c.l.bf16 %v3504_v26 }
 0x1cc   : > { %2719 = vpow2.f32 %v1006_v21  ;;  %v3791_v12 = vmax.f32 %v3738_v6, %v871_v49  ;;  %v2706_v3 = vpop.eup %2705  ;;  %v3793_v7 = vadd.f32 %v2704_v54, %v2702_v11  ;;  %v4549_v53 = vunpack.c.l.bf16 %v3508_v27  ;;  %v3804_v32 = vpop.f32.mrb[16].mxu0 }
 0x1cd   : > { %v3786_v44 = vadd.f32 %v1051_v36, %v1035_v48  ;;  %v1040_v57 = vmul.f32 %v2702_v11, %v4546_v41  ;;  %v954_v56 = vmul.f32 1.442695, %v930_v0  ;;  %v1002_v10 = vmul.f32 1.442695, %v978_v33  ;;  %v2708_v55 = vpop.eup %2707 }
 0x1ce   : > { %4547 = vst [vmem:[#allocation35_spill] sm:$0xff] %v3791_v12  ;;  %4548 = vst [vmem:[#allocation36_spill] sm:$0xff] %v3793_v7  ;;  %v1056_v25 = vmul.f32 %v2704_v54, %v4549_v53  ;;  %v4550_v40 = vunpack.c.l.bf16 %v3497_v22  ;;  %v933_v36 = vsub.f32 %v3738_v6, %v3791_v12  ;;  %v981_v21 = vsub.f32 %v871_v49, %v3791_v12  ;;  %v2710_v11 = vpop.eup %2709  ;;  %v3812_v53 = vpop.f32.mrb[17].mxu0 }
 0x1cf   : > { %v863_v41 = vadd.f32 %v3654_v37, %v3723_v29  ;;  %v3808_v54 = vadd.f32 %v2708_v55, %v2706_v3  ;;  %v4553_v0 = vunpack.c.l.bf16 %v3500_v23  ;;  %2721 = vpow2.f32 %v954_v56  ;;  %v2712_v6 = vpop.eup %2711  ;;  %v3818_v9 = vpop.f32.mrb[18].mxu0 }
 0x1d0   : > { %v1038_v48 = vmul.f32 %v2706_v3, %v4550_v40  ;;  %v3806_v7 = vadd.f32 %v1056_v25, %v1040_v57  ;;  %v3814_v40 = vpop.f32.mrb[16].mxu1  ;;  %v4554_v49 = vunpack.c.h.bf16 %v3504_v26  ;;  %2723 = vpow2.f32 %v1002_v10  ;;  %v2714_v3 = vpop.eup %2713 }
 0x1d1   : > { %4552 = vst [vmem:[#allocation38_spill] sm:$0xff] %v3808_v54  ;;  %v1054_v33 = vmul.f32 %v2708_v55, %v4553_v0  ;;  %v960_v29 = vmul.f32 1.442695, %v933_v36  ;;  %v1008_v47 = vmul.f32 1.442695, %v981_v21  ;;  %v3820_v57 = vpop.f32.mrb[17].mxu1  ;;  %v3824_v55 = vadd.f32 %v2712_v6, %v2710_v11  ;;  %v2716_v10 = vpop.eup %2715 }
 0x1d2   : > { %4551 = vst [vmem:[#allocation37_spill] sm:$0xff] %v3806_v7  ;;  %v1041_v12 = vmul.f32 %v2710_v11, %v4554_v49  ;;  %v4557_v56 = vunpack.c.h.bf16 %v3508_v27  ;;  %v3828_v54 = vmax.f32 %v615_v16, %v863_v41  ;;  %v3830_v7 = vpop.f32.mrb[19].mxu0  ;;  %v3832_v26 = vpop.f32.mrb[18].mxu1  ;;  %v4559_v36 = vunpack.c.h.bf16 %v3497_v22 }
 0x1d3   : > { %v3822_v25 = vadd.f32 %v1054_v33, %v1038_v48  ;;  %4556 = vst [vmem:[#allocation40_spill] sm:$0xff] %v3824_v55  ;;  %2725 = vpow2.f32 %v960_v29  ;;  %v636_v48 = vadd.f32 %v3746_v8, %v3645_v45  ;;  %v884_v11 = vadd.f32 %v3752_v58, %v3654_v37  ;;  %v3840_v33 = vpop.f32.mrb[19].mxu1 }
 0x1d4   : > { %v1057_v0 = vmul.f32 %v2712_v6, %v4557_v56  ;;  %4558 = vst [vmem:[#allocation41_spill] sm:$0xff] %v3828_v54  ;;  %v1039_v21 = vmul.f32 %v2714_v3, %v4559_v36  ;;  %v3844_v6 = vadd.f32 %v2716_v10, %v2714_v3  ;;  %v4562_v49 = vunpack.c.h.bf16 %v3500_v23  ;;  %v2718_v58 = vpop.eup %2717 }
 0x1d5   : > { %4555 = vst [vmem:[#allocation39_spill] sm:$0xff] %v3822_v25  ;;  %2727 = vpow2.f32 %v1008_v47  ;;  %v931_v22 = vsub.f32 %v615_v16, %v3828_v54  ;;  %v979_v29 = vsub.f32 %v863_v41, %v3828_v54  ;;  %v3850_v36 = vmax.f32 %v636_v48, %v884_v11 }
 0x1d6   : > { %v3842_v27 = vadd.f32 %v1057_v0, %v1041_v12  ;;  %4561 = vst [vmem:[#allocation43_spill] sm:$0xff] %v3844_v6  ;;  %v1055_v56 = vmul.f32 %v2716_v10, %v4562_v49  ;;  %v628_v8 = vadd.f32 %v3645_v45, %v3754_v62  ;;  %v876_v12 = vadd.f32 %v3654_v37, %v3762_v18  ;;  %v2720_v16 = vpop.eup %2719  ;;  %v3865_v49 = vpop.f32.mrb[20].mxu0 }
 0x1d7   : > { %4563 = vst [vmem:[#allocation44_spill] sm:$0xff] %v3850_v36  ;;  %v639_v23 = vadd.f32 %v3764_v60, %v3645_v45  ;;  %v887_v47 = vadd.f32 %v3770_v59, %v3654_v37  ;;  %v4565_v41 = vunpack.c.l.bf16 %v3521_v34  ;;  %v956_v0 = vmul.f32 1.442695, %v931_v22  ;;  %v3874_v59 = vpop.f32.mrb[21].mxu0 }
 0x1d8   : > { %4560 = vst [vmem:[#allocation42_spill] sm:$0xff] %v3842_v27  ;;  %v3854_v55 = vadd.f32 %v1055_v56, %v1039_v21  ;;  %v1004_v10 = vmul.f32 1.442695, %v979_v29  ;;  %v936_v62 = vsub.f32 %v636_v48, %v3850_v36  ;;  %v3867_v21 = vadd.f32 %v2720_v16, %v2718_v58 }
 0x1d9   : > { %v1044_v3 = vmul.f32 %v2718_v58, %v4565_v41  ;;  %v4567_v18 = vunpack.c.l.bf16 %v3524_v35  ;;  %v984_v60 = vsub.f32 %v884_v11, %v3850_v36  ;;  %v3872_v54 = vmax.f32 %v628_v8, %v876_v12  ;;  %v3884_v58 = vpop.f32.mrb[22].mxu0 }
 0x1da   : > { %4564 = vst [vmem:[#allocation45_spill] sm:$0xff] %v3854_v55  ;;  %4566 = vst [vmem:[#allocation46_spill] sm:$0xff] %v3867_v21  ;;  %v3876_v55 = vpop.f32.mrb[20].mxu1  ;;  %2729 = vpow2.f32 %v956_v0  ;;  %v966_v22 = vmul.f32 1.442695, %v936_v62  ;;  %v3878_v29 = vmax.f32 %v639_v23, %v887_v47  ;;  %v3882_v48 = vadd.f32 %v3645_v45, %v3772_v5  ;;  %v3891_v21 = vpop.f32.mrb[23].mxu0 }
 0x1db   : > { %v1060_v56 = vmul.f32 %v2720_v16, %v4567_v18  ;;  %4568 = vst [vmem:[#allocation47_spill] sm:$0xff] %v3872_v54  ;;  %v3886_v41 = vpop.f32.mrb[21].mxu1  ;;  %v2722_v16 = vpop.eup %2721  ;;  %2731 = vpow2.f32 %v1004_v10  ;;  %v1014_v18 = vmul.f32 1.442695, %v984_v60  ;;  %v934_v36 = vsub.f32 %v628_v8, %v3872_v54 }
 0x1dc   : > { %4569 = vst [vmem:[#allocation48_spill] sm:$0xff] %v3878_v29  ;;  %v3893_v0 = vpop.f32.mrb[22].mxu1  ;;  %v2724_v62 = vpop.eup %2723  ;;  %v4572_v6 = vunpack.c.l.bf16 %v3513_v30  ;;  %2733 = vpow2.f32 %v966_v22  ;;  %v982_v5 = vsub.f32 %v876_v12, %v3872_v54  ;;  %v937_v27 = vsub.f32 %v639_v23, %v3878_v29 }
 0x1dd   : > { %v3888_v11 = vadd.f32 %v1060_v56, %v1044_v3  ;;  %4571 = vst [vmem:[#allocation50_spill] sm:$0xff] %v3893_v0  ;;  %v3902_v3 = vld [vmem:[%s4442_s5 + $0x2] ss:$0 sm:$0xff]  ;;  %v3904_v10 = vpop.f32.mrb[23].mxu1  ;;  %v3906_v8 = vadd.f32 %v2724_v62, %v2722_v16  ;;  %v4575_v56 = vunpack.c.l.bf16 %v3516_v31  ;;  %2735 = vpow2.f32 %v1014_v18  ;;  %v3928_v18 = vpop.f32.mrb[24].mxu0 }
 0x1de   : > { %v1042_v45 = vmul.f32 %v2722_v16, %v4572_v6  ;;  %4573 = vst [vmem:[#allocation51_spill] sm:$0xff] %v3904_v10  ;;  %v2726_v6 = vpop.eup %2725  ;;  %v1010_v22 = vmul.f32 1.442695, %v982_v5  ;;  %v968_v25 = vmul.f32 1.442695, %v937_v27  ;;  %v985_v12 = vsub.f32 %v887_v47, %v3878_v29  ;;  %v3940_v5 = vpop.f32.mrb[24].mxu1 }
 0x1df   : > { %4570 = vst [vmem:[#allocation49_spill] sm:$0xff] %v3888_v11  ;;  %4574 = vst [vmem:[#allocation52_spill] sm:$0xff] %v3906_v8  ;;  %v1058_v60 = vmul.f32 %v2724_v62, %v4575_v56  ;;  %v962_v11 = vmul.f32 1.442695, %v934_v36  ;;  %v879_v23 = vadd.f32 %v3654_v37, %v3781_v52  ;;  %v2728_v54 = vpop.eup %2727  ;;  %v4577_v10 = vunpack.c.h.bf16 %v3521_v34  ;;  %v3922_v36 = vld [vmem:[%s4442_s5 + $0x3] ss:$0 sm:$0xff] }
 0x1e0   : > { %v1260_v62 = vadd.f32 %v3804_v32, %v3902_v3  ;;  %v3924_v27 = vadd.f32 %v2728_v54, %v2726_v6  ;;  %v4579_v47 = vunpack.c.h.bf16 %v3524_v35  ;;  %v1016_v37 = vmul.f32 1.442695, %v985_v12  ;;  %4581 = vst [vmem:[#allocation56_spill] sm:$0xff] %v3940_v5  ;;  %v3952_v56 = vpop.f32.mrb[25].mxu1 }
 0x1e1   : > { %v3913_v0 = vadd.f32 %v1058_v60, %v1042_v45  ;;  %v1045_v16 = vmul.f32 %v2726_v6, %v4577_v10  ;;  %2737 = vpow2.f32 %v962_v11  ;;  %v3931_v34 = vmax.f32 %v3882_v48, %v879_v23  ;;  %v3938_v45 = vpop.f32.mrb[25].mxu0  ;;  %4583 = vst [vmem:[#allocation58_spill] sm:$0xff] %v3952_v56 }
 0x1e2   : > { %4578 = vst [vmem:[#allocation54_spill] sm:$0xff] %v3924_v27  ;;  %v1061_v52 = vmul.f32 %v2728_v54, %v4579_v47  ;;  %2739 = vpow2.f32 %v1010_v22  ;;  %v3934_v32 = vmax.f32 %v3673_v28, %v1260_v62  ;;  %v1252_v11 = vadd.f32 %v3902_v3, %v3812_v53  ;;  %v3950_v10 = vpop.f32.mrb[26].mxu0 }
 0x1e3   : > { %4576 = vst [vmem:[#allocation53_spill] sm:$0xff] %v3913_v0  ;;  %2741 = vpow2.f32 %v968_v25  ;;  %4580 = vst [vmem:[#allocation55_spill] sm:$0xff] %v3931_v34  ;;  %v1263_v54 = vadd.f32 %v3818_v9, %v3902_v3  ;;  %v3948_v25 = vadd.f32 %v3814_v40, %v3922_v36  ;;  %v935_v53 = vsub.f32 %v3882_v48, %v3931_v34  ;;  %v3960_v12 = vpop.f32.mrb[27].mxu0  ;;  %v3962_v9 = vpop.f32.mrb[26].mxu1 }
 0x1e4   : > { %v3942_v35 = vadd.f32 %v1061_v52, %v1045_v16  ;;  %2743 = vpow2.f32 %v1016_v37  ;;  %v983_v60 = vsub.f32 %v879_v23, %v3931_v34  ;;  %v1348_v6 = vsub.f32 %v3673_v28, %v3934_v32  ;;  %4584 = vst [vmem:[#allocation59_spill] sm:$0xff] %v3960_v12  ;;  %4585 = vst [vmem:[#allocation60_spill] sm:$0xff] %v3962_v9  ;;  %v2730_v40 = vpop.eup %2729  ;;  %v3976_v28 = vpop.f32.mrb[27].mxu1 }
 0x1e5   : > { %v1396_v22 = vsub.f32 %v1260_v62, %v3934_v32  ;;  %v3965_v16 = vmax.f32 %v3679_v61, %v1252_v11  ;;  %v3968_v47 = vmax.f32 %v3685_v17, %v1263_v54  ;;  %v1772_v48 = vmax.f32 %v3934_v32, %v3948_v25  ;;  %4586 = vst [vmem:[#allocation61_spill] sm:$0xff] %v3976_v28  ;;  %v2732_v62 = vpop.eup %2731 }
 0x1e6   : > { %4582 = vst [vmem:[#allocation57_spill] sm:$0xff] %v3942_v35  ;;  %v3974_v23 = vadd.f32 %v3902_v3, %v3830_v7  ;;  %v4587_v52 = vunpack.c.h.bf16 %v3513_v30  ;;  %v964_v34 = vmul.f32 1.442695, %v935_v53  ;;  %v1012_v29 = vmul.f32 1.442695, %v983_v60  ;;  %v2734_v27 = vpop.eup %2733 }
 0x1e7   : > { %v1366_v35 = vmul.f32 1.442695, %v1348_v6  ;;  %v3980_v0 = vadd.f32 %v2732_v62, %v2730_v40  ;;  %v4588_v8 = vunpack.c.h.bf16 %v3516_v31  ;;  %v1414_v56 = vmul.f32 1.442695, %v1396_v22  ;;  %v2736_v12 = vpop.eup %2735  ;;  %v3997_v22 = vpop.f32.mrb[28].mxu0 }
 0x1e8   : > { %v1043_v37 = vmul.f32 %v2730_v40, %v4587_v52  ;;  %v1346_v7 = vsub.f32 %v3679_v61, %v3965_v16  ;;  %v4589_v28 = vunpack.c.l.bf16 %v3537_v42  ;;  %2745 = vpow2.f32 %v964_v34  ;;  %v4004_v52 = vpop.f32.mrb[29].mxu0 }
 0x1e9   : > { %v1059_v9 = vmul.f32 %v2732_v62, %v4588_v8  ;;  %v1394_v30 = vsub.f32 %v1252_v11, %v3965_v16  ;;  %v1349_v53 = vsub.f32 %v3685_v17, %v3968_v47  ;;  %v3993_v6 = vadd.f32 %v2736_v12, %v2734_v27 }
 0x1ea   : > { %v1048_v5 = vmul.f32 %v2734_v27, %v4589_v28  ;;  %v4590_v31 = vunpack.c.l.bf16 %v3540_v43  ;;  %2747 = vpow2.f32 %v1012_v29  ;;  %v1362_v40 = vmul.f32 1.442695, %v1346_v7 }
 0x1eb   : > { %v3991_v60 = vadd.f32 %v1059_v9, %v1043_v37  ;;  %v2738_v61 = vpop.eup %2737  ;;  %2749 = vpow2.f32 %v1366_v35  ;;  %v1410_v28 = vmul.f32 1.442695, %v1394_v30  ;;  %v1368_v34 = vmul.f32 1.442695, %v1349_v53  ;;  %v4013_v30 = vpop.f32.mrb[30].mxu0 }
 0x1ec   : > { %v1064_v8 = vmul.f32 %v2736_v12, %v4590_v31  ;;  %v2740_v62 = vpop.eup %2739  ;;  %v4592_v17 = vunpack.c.l.bf16 %v3529_v38  ;;  %2751 = vpow2.f32 %v1414_v56  ;;  %v1397_v27 = vsub.f32 %v1263_v54, %v3968_v47  ;;  %v4006_v12 = vpop.f32.mrb[28].mxu1 }
 0x1ed   : > { %v2742_v29 = vpop.eup %2741  ;;  %v4008_v37 = vadd.f32 %v2740_v62, %v2738_v61  ;;  %v4594_v35 = vunpack.c.l.bf16 %v3532_v39  ;;  %2753 = vpow2.f32 %v1362_v40  ;;  %v4015_v53 = vpop.f32.mrb[29].mxu1  ;;  %v4595_v54 = vunpack.c.h.bf16 %v3537_v42 }
 0x1ee   : > { %v3999_v11 = vadd.f32 %v1064_v8, %v1048_v5  ;;  %v1046_v9 = vmul.f32 %v2738_v61, %v4592_v17  ;;  %v1788_v5 = vsub.f32 %v3934_v32, %v1772_v48  ;;  %v2744_v56 = vpop.eup %2743  ;;  %2755 = vpow2.f32 %v1410_v28  ;;  %v4020_v61 = vpop.f32.mrb[31].mxu0 }
 0x1ef   : > { %4593 = vst [vmem:[#allocation63_spill] sm:$0xff] %v4008_v37  ;;  %v1062_v7 = vmul.f32 %v2740_v62, %v4594_v35  ;;  %v1049_v31 = vmul.f32 %v2742_v29, %v4595_v54  ;;  %v1416_v8 = vmul.f32 1.442695, %v1397_v27  ;;  %v1836_v17 = vsub.f32 %v3948_v25, %v1772_v48  ;;  %v4022_v37 = vpop.f32.mrb[30].mxu1 }
 0x1f0   : > { %4591 = vst [vmem:[#allocation62_spill] sm:$0xff] %v3999_v11  ;;  %v4026_v40 = vadd.f32 %v2744_v56, %v2742_v29  ;;  %v4597_v32 = vunpack.c.h.bf16 %v3540_v43  ;;  %2757 = vpow2.f32 %v1368_v34  ;;  %v4030_v11 = vpop.f32.mrb[31].mxu1  ;;  %v1806_v42 = vmul.f32 1.442695, %v1788_v5 }
 0x1f1   : > { %v4024_v62 = vadd.f32 %v1062_v7, %v1046_v9  ;;  %2759 = vpow2.f32 %v1416_v8  ;;  %v1854_v28 = vmul.f32 1.442695, %v1836_v17  ;;  %v4034_v25 = vmax.f32 %v3690_v15, %v3974_v23 }
 0x1f2   : > { %4596 = vst [vmem:[#allocation64_spill] sm:$0xff] %v4026_v40  ;;  %v1065_v35 = vmul.f32 %v2744_v56, %v4597_v32  ;;  %v1692_v9 = vadd.f32 %v3922_v36, %v3820_v57  ;;  %v1703_v27 = vadd.f32 %v3832_v26, %v3922_v36  ;;  %v1695_v43 = vadd.f32 %v3922_v36, %v3840_v33  ;;  %v2746_v5 = vpop.eup %2745 }
 0x1f3   : > { %2761 = vpow2.f32 %v1806_v42  ;;  %v1347_v34 = vsub.f32 %v3690_v15, %v4034_v25  ;;  %v1395_v29 = vsub.f32 %v3974_v23, %v4034_v25  ;;  %v4050_v7 = vadd.f32 %v3865_v49, %v3902_v3 }
 0x1f4   : > { %v4036_v48 = vadd.f32 %v1065_v35, %v1049_v31  ;;  %2763 = vpow2.f32 %v1854_v28  ;;  %v1770_v57 = vmax.f32 %v3965_v16, %v1692_v9  ;;  %v1773_v26 = vmax.f32 %v3968_v47, %v1703_v27  ;;  %v2748_v33 = vpop.eup %2747 }
 0x1f5   : > { %v1771_v56 = vmax.f32 %v4034_v25, %v1695_v43  ;;  %v4599_v54 = vunpack.c.h.bf16 %v3529_v38  ;;  %v1364_v15 = vmul.f32 1.442695, %v1347_v34  ;;  %v1412_v8 = vmul.f32 1.442695, %v1395_v29  ;;  %v2750_v49 = vpop.eup %2749 }
 0x1f6   : > { %4598 = vst [vmem:[#allocation65_spill] sm:$0xff] %v4036_v48  ;;  %v4059_v23 = vmax.f32 %v3701_v24, %v4050_v7  ;;  %v4061_v17 = vadd.f32 %v2748_v33, %v2746_v5  ;;  %v4601_v32 = vunpack.c.h.bf16 %v3532_v39  ;;  %v1786_v42 = vsub.f32 %v3965_v16, %v1770_v57  ;;  %v2752_v48 = vpop.eup %2751 }
 0x1f7   : > { %v1047_v31 = vmul.f32 %v2746_v5, %v4599_v54  ;;  %v1834_v28 = vsub.f32 %v1692_v9, %v1770_v57  ;;  %v1444_v40 = vmul.f32 %v2750_v49, %v3728_v13  ;;  %v1476_v38 = vmul.f32 %v2750_v49, %v3740_v1  ;;  %v2754_v29 = vpop.eup %2753 }
 0x1f8   : > { %4600 = vst [vmem:[#allocation66_spill] sm:$0xff] %v4061_v17  ;;  %v1063_v35 = vmul.f32 %v2748_v33, %v4601_v32  ;;  %2765 = vpow2.f32 %v1364_v15  ;;  %v1789_v34 = vsub.f32 %v3968_v47, %v1773_v26  ;;  %v4602_v5 = vunpack.c.l.bf16 %v3553_v50  ;;  %v2756_v33 = vpop.eup %2755 }
 0x1f9   : > { %2767 = vpow2.f32 %v1412_v8  ;;  %v1802_v39 = vmul.f32 1.442695, %v1786_v42  ;;  %v1460_v32 = vadd.f32 %v2752_v48, %v1444_v40  ;;  %v1442_v16 = vmul.f32 %v2754_v29, %v3742_v4 }
 0x1fa   : > { %v4069_v54 = vadd.f32 %v1063_v35, %v1047_v31  ;;  %v1492_v17 = vmul.f32 %v2752_v48, %v4602_v5  ;;  %v1474_v9 = vmul.f32 %v2754_v29, %v3756_v14  ;;  %v1850_v13 = vmul.f32 1.442695, %v1834_v28  ;;  %v2758_v57 = vpop.eup %2757 }
 0x1fb   : > { %v4603_v15 = vunpack.c.l.bf16 %v3545_v46  ;;  %2769 = vpow2.f32 %v1802_v39  ;;  %v1808_v31 = vmul.f32 1.442695, %v1789_v34  ;;  %v2760_v49 = vpop.eup %2759  ;;  %v1458_v35 = vadd.f32 %v2756_v33, %v1442_v16 }
 0x1fc   : > { %v1508_v1 = vadd.f32 %v1492_v17, %v1476_v38  ;;  %v1445_v5 = vmul.f32 %v2758_v57, %v3758_v63  ;;  %v1477_v8 = vmul.f32 %v2758_v57, %v3774_v2  ;;  %2771 = vpow2.f32 %v1850_v13 }
 0x1fd   : > { %v1490_v47 = vmul.f32 %v2756_v33, %v4603_v15  ;;  %v4604_v4 = vunpack.c.h.bf16 %v3553_v50  ;;  %2773 = vpow2.f32 %v1808_v31  ;;  %v1837_v14 = vsub.f32 %v1703_v27, %v1773_v26  ;;  %v2762_v42 = vpop.eup %2761 }
 0x1fe   : > { %v1461_v17 = vadd.f32 %v2760_v49, %v1445_v5  ;;  %v1787_v28 = vsub.f32 %v4034_v25, %v1771_v56  ;;  %v1835_v38 = vsub.f32 %v1695_v43, %v1771_v56  ;;  %v1352_v34 = vsub.f32 %v3701_v24, %v4059_v23  ;;  %v2764_v29 = vpop.eup %2763  ;;  %v4607_v5 = vld [vmem:[#allocation31_spill] sm:$0xff] }
 0x1ff   : > { %v1506_v40 = vadd.f32 %v1490_v47, %v1474_v9  ;;  %v1493_v48 = vmul.f32 %v2760_v49, %v4604_v4  ;;  %v1884_v63 = vmul.f32 %v2762_v42, %v1460_v32  ;;  %v1916_v33 = vmul.f32 %v2762_v42, %v1508_v1 }
 0x200   : > { %v1856_v2 = vmul.f32 1.442695, %v1837_v14  ;;  %v4605_v16 = vunpack.c.l.bf16 %v3556_v51  ;;  %v1804_v50 = vmul.f32 1.442695, %v1787_v28  ;;  %v1852_v13 = vmul.f32 1.442695, %v1835_v38 }
 0x201   : > { %v1509_v39 = vadd.f32 %v1493_v48, %v1477_v8  ;;  %v1374_v57 = vmul.f32 1.442695, %v1352_v34  ;;  %v1900_v27 = vadd.f32 %v2764_v29, %v1884_v63  ;;  %v1400_v25 = vsub.f32 %v4050_v7, %v4059_v23  ;;  %v4608_v28 = vld [vmem:[#allocation20_spill] sm:$0xff] }
 0x202   : > { %v1932_v9 = vmul.f32 %v2764_v29, %v4605_v16  ;;  %2775 = vpow2.f32 %v1856_v2  ;;  %v1268_v43 = vadd.f32 %v3902_v3, %v3874_v59  ;;  %v2766_v24 = vpop.eup %2765  ;;  %v1279_v56 = vadd.f32 %v3884_v58, %v3902_v3 }
 0x203   : > { %2777 = vpow2.f32 %v1804_v50  ;;  %v1716_v32 = vadd.f32 %v3876_v55, %v3922_v36  ;;  %v2768_v1 = vpop.eup %2767  ;;  %v1443_v15 = vmul.f32 %v2766_v24, %v3776_v19  ;;  %v1475_v47 = vmul.f32 %v2766_v24, %v3786_v44 }
 0x204   : > { %v4090_v26 = vadd.f32 %v1932_v9, %v1916_v33  ;;  %2779 = vrcp.f32 %v1900_v27  ;;  %v1422_v7 = vmul.f32 1.442695, %v1400_v25  ;;  %v4606_v31 = vunpack.c.h.bf16 %v3545_v46 }
 0x205   : > { %2781 = vpow2.f32 %v1852_v13  ;;  %v4101_v49 = vmax.f32 %v3706_v20, %v1268_v43  ;;  %v4104_v8 = vmax.f32 %v4607_v5, %v1279_v56  ;;  %v2770_v58 = vpop.eup %2769  ;;  %v1459_v4 = vadd.f32 %v2768_v1, %v1443_v15 }
 0x206   : > { %v1491_v59 = vmul.f32 %v2768_v1, %v4606_v31  ;;  %2783 = vpow2.f32 %v1374_v57  ;;  %v1776_v55 = vmax.f32 %v4059_v23, %v1716_v32  ;;  %v1271_v19 = vadd.f32 %v3902_v3, %v3891_v21  ;;  %v2772_v44 = vpop.eup %2771 }
 0x207   : > { %v1882_v14 = vmul.f32 %v2770_v58, %v1458_v35  ;;  %v1914_v46 = vmul.f32 %v2770_v58, %v1506_v40  ;;  %2785 = vpow2.f32 %v1422_v7  ;;  %v2774_v42 = vpop.eup %2773  ;;  %v4609_v38 = vunpack.c.l.bf16 %v4608_v28 }
 0x208   : > { %v1507_v48 = vadd.f32 %v1491_v59, %v1475_v47  ;;  %v1350_v29 = vsub.f32 %v3706_v20, %v4101_v49  ;;  %v1398_v63 = vsub.f32 %v1268_v43, %v4101_v49  ;;  %v1353_v33 = vsub.f32 %v4607_v5, %v4104_v8  ;;  %v4610_v43 = vld [vmem:[#allocation32_spill] sm:$0xff] }
 0x209   : > { %v1930_v34 = vmul.f32 %v2772_v44, %v4609_v38  ;;  %v1898_v2 = vadd.f32 %v2772_v44, %v1882_v14  ;;  %v1885_v16 = vmul.f32 %v2774_v42, %v1461_v17  ;;  %v1917_v21 = vmul.f32 %v2774_v42, %v1509_v39  ;;  %v4611_v39 = vld [vmem:[#allocation50_spill] sm:$0xff] }
 0x20a   : > { %v1401_v9 = vsub.f32 %v1279_v56, %v4104_v8  ;;  %v1370_v40 = vmul.f32 1.442695, %v1350_v29  ;;  %v1418_v50 = vmul.f32 1.442695, %v1398_v63  ;;  %v1376_v13 = vmul.f32 1.442695, %v1353_v33 }
 0x20b   : > { %v4117_v35 = vadd.f32 %v1930_v34, %v1914_v46  ;;  %2787 = vrcp.f32 %v1898_v2  ;;  %v1792_v25 = vsub.f32 %v4059_v23, %v1776_v55  ;;  %v1840_v20 = vsub.f32 %v1716_v32, %v1776_v55  ;;  %v4615_v63 = vld [vmem:[#allocation37_spill] sm:$0xff] }
 0x20c   : > { %v1424_v57 = vmul.f32 1.442695, %v1401_v9  ;;  %v2776_v24 = vpop.eup %2775  ;;  %2789 = vpow2.f32 %v1370_v40  ;;  %v4121_v1 = vmax.f32 %v4610_v43, %v1271_v19  ;;  %v1708_v17 = vadd.f32 %v3922_v36, %v3886_v41 }
 0x20d   : > { %v4127_v56 = vadd.f32 %v4611_v39, %v3922_v36  ;;  %v2778_v15 = vpop.eup %2777  ;;  %v4129_v47 = vadd.f32 %v2776_v24, %v1885_v16  ;;  %v4612_v7 = vunpack.c.h.bf16 %v3556_v51  ;;  %2791 = vpow2.f32 %v1418_v50  ;;  %v4618_v39 = vld [vmem:[#allocation51_spill] sm:$0xff] }
 0x20e   : > { %v1814_v23 = vmul.f32 1.442695, %v1792_v25  ;;  %v2780_v32 = vpop.eup %2779  ;;  %v1883_v59 = vmul.f32 %v2778_v15, %v1459_v4  ;;  %v1915_v5 = vmul.f32 %v2778_v15, %v1507_v48  ;;  %2793 = vpow2.f32 %v1376_v13 }
 0x20f   : > { %v1933_v31 = vmul.f32 %v2776_v24, %v4612_v7  ;;  %v1862_v58 = vmul.f32 1.442695, %v1840_v20  ;;  %v2782_v55 = vpop.eup %2781  ;;  %v1980_v41 = vmul.f32 %v2780_v32, %v1900_v27  ;;  %2795 = vrcp.f32 %v4129_v47  ;;  %v4614_v27 = vld [vmem:[#allocation36_spill] sm:$0xff] }
 0x210   : > { %v1351_v14 = vsub.f32 %v4610_v43, %v4121_v1  ;;  %v2784_v46 = vpop.eup %2783  ;;  %v4138_v51 = vadd.f32 %v2782_v55, %v1883_v59  ;;  %v4613_v42 = vunpack.c.h.bf16 %v4608_v28  ;;  %2797 = vpow2.f32 %v1424_v57 }
 0x211   : > { %v4133_v44 = vadd.f32 %v1933_v31, %v1917_v21  ;;  %v1399_v4 = vsub.f32 %v1271_v19, %v4121_v1  ;;  %v2786_v48 = vpop.eup %2785  ;;  %v1996_v34 = vsub.f32 2.0, %v1980_v41  ;;  %v1448_v29 = vmul.f32 %v2784_v46, %v4614_v27  ;;  %v4616_v21 = vld [vmem:[#allocation23_spill] sm:$0xff]  ;;  %v4623_v27 = vld [vmem:[#allocation40_spill] sm:$0xff] }
 0x212   : > { %v1931_v38 = vmul.f32 %v2782_v55, %v4613_v42  ;;  %v1480_v33 = vmul.f32 %v2784_v46, %v4615_v63  ;;  %2799 = vpow2.f32 %v1814_v23  ;;  %v4617_v9 = vunpack.c.l.bf16 %v4616_v21  ;;  %v4620_v41 = vld [vmem:[#allocation39_spill] sm:$0xff]  ;;  %v4624_v63 = vld [vmem:[#allocation42_spill] sm:$0xff] }
 0x213   : > { %2801 = vrcp.f32 %v4138_v51  ;;  %v1372_v28 = vmul.f32 1.442695, %v1351_v14  ;;  %v2012_v50 = vmul.f32 %v2780_v32, %v1996_v34  ;;  %v1464_v13 = vadd.f32 %v2786_v48, %v1448_v29 }
 0x214   : > { %v4146_v16 = vadd.f32 %v1931_v38, %v1915_v5  ;;  %v1496_v40 = vmul.f32 %v2786_v48, %v4617_v9  ;;  %2803 = vpow2.f32 %v1862_v58  ;;  %v1420_v19 = vmul.f32 1.442695, %v1399_v4 }
 0x215   : > { %2805 = vpow2.f32 %v1372_v28  ;;  %v1774_v25 = vmax.f32 %v4101_v49, %v1708_v17  ;;  %v1777_v20 = vmax.f32 %v4104_v8, %v4127_v56  ;;  %v2788_v24 = vpop.eup %2787  ;;  %v2028_v43 = vmul.f32 %v2012_v50, %v4090_v26  ;;  %v4619_v26 = vld [vmem:[#allocation38_spill] sm:$0xff] }
 0x216   : > { %v1512_v57 = vadd.f32 %v1496_v40, %v1480_v33  ;;  %2807 = vpow2.f32 %v1420_v19  ;;  %v4157_v15 = vadd.f32 %v3922_v36, %v4618_v39  ;;  %v4161_v7 = vadd.f32 %v3928_v18, %v3902_v3  ;;  %v2790_v31 = vpop.eup %2789 }
 0x217   : > { %v1978_v23 = vmul.f32 %v2788_v24, %v1898_v2  ;;  %v1790_v32 = vsub.f32 %v4101_v49, %v1774_v25  ;;  %v1838_v59 = vsub.f32 %v1708_v17, %v1774_v25  ;;  %v1793_v5 = vsub.f32 %v4104_v8, %v1777_v20  ;;  %v2792_v58 = vpop.eup %2791  ;;  %2044 = vst [vmem:[%s4165_s4 + $0x10] sm:$0xff] %v2028_v43  ;;  %v4621_v49 = vld [vmem:[#allocation21_spill] sm:$0xff] }
 0x218   : > { %v1446_v55 = vmul.f32 %v2790_v31, %v4619_v26  ;;  %v1478_v14 = vmul.f32 %v2790_v31, %v4620_v41  ;;  %v1841_v46 = vsub.f32 %v4127_v56, %v1777_v20  ;;  %v1775_v18 = vmax.f32 %v4121_v1, %v4157_v15  ;;  %v2794_v2 = vpop.eup %2793 }
 0x219   : > { %v1994_v42 = vsub.f32 2.0, %v1978_v23  ;;  %v4622_v17 = vunpack.c.l.bf16 %v4621_v49  ;;  %v1810_v8 = vmul.f32 1.442695, %v1790_v32  ;;  %v1858_v4 = vmul.f32 1.442695, %v1838_v59  ;;  %v2796_v48 = vpop.eup %2795 }
 0x21a   : > { %v1462_v34 = vadd.f32 %v2792_v58, %v1446_v55  ;;  %v1449_v29 = vmul.f32 %v2794_v2, %v4623_v27  ;;  %v1481_v33 = vmul.f32 %v2794_v2, %v4624_v63  ;;  %v1816_v9 = vmul.f32 1.442695, %v1793_v5  ;;  %v2798_v40 = vpop.eup %2797 }
 0x21b   : > { %v1494_v38 = vmul.f32 %v2792_v58, %v4622_v17  ;;  %v2010_v28 = vmul.f32 %v2788_v24, %v1994_v42  ;;  %v1981_v56 = vmul.f32 %v2796_v48, %v4129_v47  ;;  %2809 = vpow2.f32 %v1810_v8  ;;  %v4629_v17 = vld [vmem:[#allocation45_spill] sm:$0xff] }
 0x21c   : > { %v2800_v19 = vpop.eup %2799  ;;  %v4178_v25 = vadd.f32 %v2798_v40, %v1449_v29  ;;  %v4625_v20 = vunpack.c.h.bf16 %v4616_v21  ;;  %2811 = vpow2.f32 %v1858_v4  ;;  %v1864_v39 = vmul.f32 1.442695, %v1841_v46 }
 0x21d   : > { %v1510_v50 = vadd.f32 %v1494_v38, %v1478_v14  ;;  %v2802_v31 = vpop.eup %2801  ;;  %v2026_v23 = vmul.f32 %v2010_v28, %v4117_v35  ;;  %v1997_v32 = vsub.f32 2.0, %v1981_v56  ;;  %v1888_v59 = vmul.f32 %v2800_v19, %v1464_v13  ;;  %v4626_v14 = vld [vmem:[#allocation24_spill] sm:$0xff]  ;;  %v4628_v13 = vld [vmem:[#allocation43_spill] sm:$0xff] }
 0x21e   : > { %v1497_v43 = vmul.f32 %v2798_v40, %v4625_v20  ;;  %v1920_v5 = vmul.f32 %v2800_v19, %v1512_v57  ;;  %v2804_v24 = vpop.eup %2803  ;;  %v1979_v47 = vmul.f32 %v2802_v31, %v4138_v51  ;;  %2813 = vpow2.f32 %v1816_v9  ;;  %v4631_v9 = vld [vmem:[#allocation33_spill] sm:$0xff]  ;;  %v4632_v19 = vld [vmem:[#allocation56_spill] sm:$0xff] }
 0x21f   : > { %v1791_v26 = vsub.f32 %v4121_v1, %v1775_v18  ;;  %v2806_v55 = vpop.eup %2805  ;;  %2042 = vst [vmem:[%s4165_s4] sm:$0xff] %v2026_v23  ;;  %v2013_v41 = vmul.f32 %v2796_v48, %v1997_v32  ;;  %v1904_v21 = vadd.f32 %v2804_v24, %v1888_v59  ;;  %v4627_v2 = vunpack.c.l.bf16 %v4626_v14  ;;  %v4634_v23 = vld [vmem:[#allocation34_spill] sm:$0xff]  ;;  %v4635_v32 = vld [vmem:[#allocation35_spill] sm:$0xff] }
 0x220   : > { %v1513_v58 = vadd.f32 %v1497_v43, %v1481_v33  ;;  %2815 = vpow2.f32 %v1864_v39  ;;  %v2808_v35 = vpop.eup %2807  ;;  %v1995_v42 = vsub.f32 2.0, %v1979_v47  ;;  %v1447_v57 = vmul.f32 %v2806_v55, %v4628_v13  ;;  %v4633_v43 = vld [vmem:[#allocation59_spill] sm:$0xff]  ;;  %v4636_v47 = vld [vmem:[#allocation22_spill] sm:$0xff] }
 0x221   : > { %v1936_v46 = vmul.f32 %v2804_v24, %v4627_v2  ;;  %v1479_v38 = vmul.f32 %v2806_v55, %v4629_v17  ;;  %v1812_v51 = vmul.f32 1.442695, %v1791_v26  ;;  %v2029_v8 = vmul.f32 %v2013_v41, %v4133_v44 }
 0x222   : > { %2817 = vrcp.f32 %v1904_v21  ;;  %v4630_v1 = vunpack.c.h.bf16 %v4621_v49  ;;  %v2011_v27 = vmul.f32 %v2802_v31, %v1995_v42  ;;  %v1463_v29 = vadd.f32 %v2808_v35, %v1447_v57 }
 0x223   : > { %v4191_v4 = vadd.f32 %v1936_v46, %v1920_v5  ;;  %2819 = vpow2.f32 %v1812_v51  ;;  %v1839_v63 = vsub.f32 %v4157_v15, %v1775_v18  ;;  %2045 = vst [vmem:[%s4165_s4 + $0x18] sm:$0xff] %v2029_v8  ;;  %v1340_v40 = vmax.f32 %v4631_v9, %v4161_v7 }
 0x224   : > { %v1495_v48 = vmul.f32 %v2808_v35, %v4630_v1  ;;  %v1284_v44 = vadd.f32 %v3902_v3, %v3938_v45  ;;  %v1295_v28 = vadd.f32 %v3950_v10, %v3902_v3  ;;  %v2027_v49 = vmul.f32 %v2011_v27, %v4146_v16 }
 0x225   : > { %v1860_v56 = vmul.f32 1.442695, %v1839_v63  ;;  %v1732_v20 = vadd.f32 %v4632_v19, %v3922_v36  ;;  %v4208_v15 = vadd.f32 %v3902_v3, %v4633_v43  ;;  %v2810_v18 = vpop.eup %2809  ;;  %v1356_v39 = vsub.f32 %v4631_v9, %v1340_v40 }
 0x226   : > { %v1511_v33 = vadd.f32 %v1495_v48, %v1479_v38  ;;  %v1404_v31 = vsub.f32 %v4161_v7, %v1340_v40  ;;  %v4213_v45 = vmax.f32 %v4634_v23, %v1284_v44  ;;  %v4216_v10 = vmax.f32 %v4635_v32, %v1295_v28  ;;  %v2812_v16 = vpop.eup %2811  ;;  %2043 = vst [vmem:[%s4165_s4 + $0x8] sm:$0xff] %v2027_v49 }
 0x227   : > { %v1886_v59 = vmul.f32 %v2810_v18, %v1462_v34  ;;  %v1918_v5 = vmul.f32 %v2810_v18, %v1510_v50  ;;  %2821 = vpow2.f32 %v1860_v56  ;;  %v1780_v24 = vmax.f32 %v1340_v40, %v1732_v20 }
 0x228   : > { %v4637_v26 = vunpack.c.l.bf16 %v4636_v47  ;;  %v1382_v41 = vmul.f32 1.442695, %v1356_v39  ;;  %v1430_v2 = vmul.f32 1.442695, %v1404_v31  ;;  %v1354_v7 = vsub.f32 %v4634_v23, %v4213_v45  ;;  %v2814_v46 = vpop.eup %2813  ;;  %v4639_v39 = vld [vmem:[#allocation41_spill] sm:$0xff] }
 0x229   : > { %v1902_v35 = vadd.f32 %v2812_v16, %v1886_v59  ;;  %v1402_v42 = vsub.f32 %v1284_v44, %v4213_v45  ;;  %v1357_v13 = vsub.f32 %v4635_v32, %v4216_v10  ;;  %v1405_v34 = vsub.f32 %v1295_v28, %v4216_v10  ;;  %v4640_v32 = vld [vmem:[#allocation58_spill] sm:$0xff] }
 0x22a   : > { %v1934_v55 = vmul.f32 %v2812_v16, %v4637_v26  ;;  %v2816_v50 = vpop.eup %2815  ;;  %v1889_v17 = vmul.f32 %v2814_v46, %v4178_v25  ;;  %v1921_v38 = vmul.f32 %v2814_v46, %v1513_v58  ;;  %2823 = vpow2.f32 %v1382_v41  ;;  %v4641_v16 = vld [vmem:[#allocation60_spill] sm:$0xff] }
 0x22b   : > { %2825 = vrcp.f32 %v1902_v35  ;;  %v4638_v51 = vunpack.c.h.bf16 %v4626_v14  ;;  %v1378_v1 = vmul.f32 1.442695, %v1354_v7  ;;  %v1426_v48 = vmul.f32 1.442695, %v1402_v42 }
 0x22c   : > { %v4227_v57 = vadd.f32 %v1934_v55, %v1918_v5  ;;  %v2818_v27 = vpop.eup %2817  ;;  %v1905_v63 = vadd.f32 %v2816_v50, %v1889_v17  ;;  %2827 = vpow2.f32 %v1430_v2  ;;  %v1384_v9 = vmul.f32 1.442695, %v1357_v13  ;;  %v4644_v17 = vld [vmem:[#allocation49_spill] sm:$0xff] }
 0x22d   : > { %v1937_v8 = vmul.f32 %v2816_v50, %v4638_v51  ;;  %v1432_v44 = vmul.f32 1.442695, %v1405_v34  ;;  %v2820_v49 = vpop.eup %2819  ;;  %v1984_v28 = vmul.f32 %v2818_v27, %v1904_v21  ;;  %2829 = vpow2.f32 %v1378_v1 }
 0x22e   : > { %v1796_v19 = vsub.f32 %v1340_v40, %v1780_v24  ;;  %2831 = vrcp.f32 %v1905_v63  ;;  %v1887_v25 = vmul.f32 %v2820_v49, %v1463_v29  ;;  %v1919_v58 = vmul.f32 %v2820_v49, %v1511_v33 }
 0x22f   : > { %v4232_v56 = vadd.f32 %v1937_v8, %v1921_v38  ;;  %v1844_v43 = vsub.f32 %v1732_v20, %v1780_v24  ;;  %v2000_v18 = vsub.f32 2.0, %v1984_v28  ;;  %2833 = vpow2.f32 %v1426_v48 }
 0x230   : > { %v1822_v14 = vmul.f32 1.442695, %v1796_v19  ;;  %v4236_v31 = vmax.f32 %v4639_v39, %v4208_v15  ;;  %2835 = vpow2.f32 %v1384_v9  ;;  %v1724_v21 = vadd.f32 %v3922_v36, %v4640_v32 }
 0x231   : > { %v1870_v23 = vmul.f32 1.442695, %v1844_v43  ;;  %v1735_v59 = vadd.f32 %v4641_v16, %v3922_v36  ;;  %v2822_v40 = vpop.eup %2821  ;;  %v2016_v5 = vmul.f32 %v2818_v27, %v2000_v18  ;;  %2837 = vpow2.f32 %v1432_v44  ;;  %v4645_v44 = vld [vmem:[#allocation27_spill] sm:$0xff]  ;;  %v4647_v43 = vld [vmem:[#allocation52_spill] sm:$0xff] }
 0x232   : > { %v1355_v29 = vsub.f32 %v4639_v39, %v4236_v31  ;;  %v1403_v33 = vsub.f32 %v4208_v15, %v4236_v31  ;;  %v4246_v20 = vadd.f32 %v2822_v40, %v1887_v25  ;;  %v4642_v24 = vunpack.c.h.bf16 %v4636_v47  ;;  %v4643_v47 = vld [vmem:[#allocation46_spill] sm:$0xff] }
 0x233   : > { %2839 = vpow2.f32 %v1822_v14  ;;  %v1778_v55 = vmax.f32 %v4213_v45, %v1724_v21  ;;  %v2032_v41 = vmul.f32 %v2016_v5, %v4191_v4  ;;  %v1781_v4 = vmax.f32 %v4216_v10, %v1735_v59  ;;  %v4648_v14 = vld [vmem:[#allocation53_spill] sm:$0xff] }
 0x234   : > { %v1935_v26 = vmul.f32 %v2822_v40, %v4642_v24  ;;  %2841 = vpow2.f32 %v1870_v23  ;;  %v1380_v2 = vmul.f32 1.442695, %v1355_v29  ;;  %v1428_v7 = vmul.f32 1.442695, %v1403_v33  ;;  %v2824_v46 = vpop.eup %2823  ;;  %v4649_v29 = vld [vmem:[#allocation25_spill] sm:$0xff] }
 0x235   : > { %2843 = vrcp.f32 %v4246_v20  ;;  %v1794_v15 = vsub.f32 %v4213_v45, %v1778_v55  ;;  %v1842_v13 = vsub.f32 %v1724_v21, %v1778_v55  ;;  %v2826_v34 = vpop.eup %2825  ;;  %2048 = vst [vmem:[%s4165_s4 + $0x30] sm:$0xff] %v2032_v41  ;;  %v1452_v50 = vmul.f32 %v2824_v46, %v4643_v47  ;;  %v4651_v55 = vld [vmem:[#allocation54_spill] sm:$0xff] }
 0x236   : > { %v4252_v42 = vadd.f32 %v1935_v26, %v1919_v58  ;;  %v1484_v38 = vmul.f32 %v2824_v46, %v4644_v17  ;;  %2845 = vpow2.f32 %v1380_v2  ;;  %v2828_v51 = vpop.eup %2827  ;;  %v1982_v8 = vmul.f32 %v2826_v34, %v1902_v35  ;;  %v4652_v2 = vld [vmem:[#allocation57_spill] sm:$0xff] }
 0x237   : > { %2847 = vpow2.f32 %v1428_v7  ;;  %v1818_v1 = vmul.f32 1.442695, %v1794_v15  ;;  %v1866_v48 = vmul.f32 1.442695, %v1842_v13  ;;  %v2830_v27 = vpop.eup %2829  ;;  %v1468_v9 = vadd.f32 %v2828_v51, %v1452_v50 }
 0x238   : > { %v4646_v49 = vunpack.c.l.bf16 %v4645_v44  ;;  %v1797_v28 = vsub.f32 %v4216_v10, %v1781_v4  ;;  %v1845_v19 = vsub.f32 %v1735_v59, %v1781_v4  ;;  %v2832_v25 = vpop.eup %2831  ;;  %v1998_v58 = vsub.f32 2.0, %v1982_v8 }
 0x239   : > { %v1450_v18 = vmul.f32 %v2830_v27, %v4647_v43  ;;  %v1482_v39 = vmul.f32 %v2830_v27, %v4648_v14  ;;  %2849 = vpow2.f32 %v1818_v1  ;;  %v2834_v23 = vpop.eup %2833  ;;  %v1985_v35 = vmul.f32 %v2832_v25, %v1905_v63  ;;  %v4654_v1 = vld [vmem:[#allocation28_spill] sm:$0xff] }
 0x23a   : > { %v1500_v45 = vmul.f32 %v2828_v51, %v4646_v49  ;;  %2851 = vpow2.f32 %v1866_v48  ;;  %v1824_v21 = vmul.f32 1.442695, %v1797_v28  ;;  %v2836_v16 = vpop.eup %2835  ;;  %v2014_v40 = vmul.f32 %v2826_v34, %v1998_v58  ;;  %v4656_v49 = vld [vmem:[#allocation61_spill] sm:$0xff] }
 0x23b   : > { %v1466_v5 = vadd.f32 %v2834_v23, %v1450_v18  ;;  %v4650_v33 = vunpack.c.l.bf16 %v4649_v29  ;;  %v1872_v10 = vmul.f32 1.442695, %v1845_v19  ;;  %v2838_v59 = vpop.eup %2837  ;;  %v2001_v26 = vsub.f32 2.0, %v1985_v35 }
 0x23c   : > { %v1516_v32 = vadd.f32 %v1500_v45, %v1484_v38  ;;  %v1453_v41 = vmul.f32 %v2836_v16, %v4651_v55  ;;  %v1485_v7 = vmul.f32 %v2836_v16, %v4652_v2  ;;  %2853 = vpow2.f32 %v1824_v21 }
 0x23d   : > { %v1498_v24 = vmul.f32 %v2834_v23, %v4650_v33  ;;  %v2840_v46 = vpop.eup %2839  ;;  %v2030_v63 = vmul.f32 %v2014_v40, %v4227_v57  ;;  %v4653_v13 = vunpack.c.h.bf16 %v4645_v44  ;;  %2855 = vpow2.f32 %v1872_v10  ;;  %v4659_v40 = vld [vmem:[#allocation47_spill] sm:$0xff] }
 0x23e   : > { %v2842_v47 = vpop.eup %2841  ;;  %v2017_v50 = vmul.f32 %v2832_v25, %v2001_v26  ;;  %v1469_v17 = vadd.f32 %v2838_v59, %v1453_v41  ;;  %v1892_v38 = vmul.f32 %v2840_v46, %v1468_v9  ;;  %v1924_v4 = vmul.f32 %v2840_v46, %v1516_v32  ;;  %v4660_v26 = vld [vmem:[#allocation26_spill] sm:$0xff] }
 0x23f   : > { %v1514_v15 = vadd.f32 %v1498_v24, %v1482_v39  ;;  %v1501_v34 = vmul.f32 %v2838_v59, %v4653_v13  ;;  %v2844_v51 = vpop.eup %2843  ;;  %2046 = vst [vmem:[%s4165_s4 + $0x20] sm:$0xff] %v2030_v63  ;;  %v4655_v48 = vunpack.c.l.bf16 %v4654_v1  ;;  %v1727_v57 = vadd.f32 %v3922_v36, %v4656_v49 }
 0x240   : > { %v1308_v44 = vadd.f32 %v3997_v22, %v3902_v3  ;;  %v2846_v45 = vpop.eup %2845  ;;  %v2033_v28 = vmul.f32 %v2017_v50, %v4232_v56  ;;  %v1983_v19 = vmul.f32 %v2844_v51, %v4246_v20  ;;  %v1908_v9 = vadd.f32 %v2842_v47, %v1892_v38  ;;  %v4658_v20 = vld [vmem:[#allocation44_spill] sm:$0xff] }
 0x241   : > { %v1517_v8 = vadd.f32 %v1501_v34, %v1485_v7  ;;  %v1940_v27 = vmul.f32 %v2842_v47, %v4655_v48  ;;  %v1300_v25 = vadd.f32 %v3902_v3, %v4004_v52  ;;  %v2848_v58 = vpop.eup %2847  ;;  %v1451_v18 = vmul.f32 %v2846_v45, %v3980_v0 }
 0x242   : > { %v1483_v14 = vmul.f32 %v2846_v45, %v3991_v60  ;;  %v1779_v39 = vmax.f32 %v4236_v31, %v1727_v57  ;;  %2049 = vst [vmem:[%s4165_s4 + $0x38] sm:$0xff] %v2033_v28  ;;  %v1999_v22 = vsub.f32 2.0, %v1983_v19  ;;  %2857 = vrcp.f32 %v1908_v9  ;;  %v4663_v19 = vld [vmem:[#allocation48_spill] sm:$0xff] }
 0x243   : > { %v4283_v43 = vadd.f32 %v1940_v27, %v1924_v4  ;;  %v4657_v56 = vunpack.c.h.bf16 %v4649_v29  ;;  %v1344_v35 = vmax.f32 %v4658_v20, %v1308_v44  ;;  %v2850_v32 = vpop.eup %2849  ;;  %v4292_v21 = vadd.f32 %v2848_v58, %v1451_v18 }
 0x244   : > { %v1795_v52 = vsub.f32 %v4236_v31, %v1779_v39  ;;  %v1843_v16 = vsub.f32 %v1727_v57, %v1779_v39  ;;  %v4296_v0 = vmax.f32 %v4659_v40, %v1300_v25  ;;  %v2852_v60 = vpop.eup %2851  ;;  %v2015_v33 = vmul.f32 %v2844_v51, %v1999_v22 }
 0x245   : > { %v1499_v23 = vmul.f32 %v2848_v58, %v4657_v56  ;;  %v1890_v10 = vmul.f32 %v2850_v32, %v1466_v5  ;;  %v1922_v59 = vmul.f32 %v2850_v32, %v1514_v15  ;;  %v4661_v29 = vunpack.c.l.bf16 %v4660_v26 }
 0x246   : > { %v1820_v41 = vmul.f32 1.442695, %v1795_v52  ;;  %v1868_v2 = vmul.f32 1.442695, %v1843_v16  ;;  %v1360_v7 = vsub.f32 %v4658_v20, %v1344_v35  ;;  %v2854_v46 = vpop.eup %2853  ;;  %v2031_v31 = vmul.f32 %v2015_v33, %v4252_v42 }
 0x247   : > { %v1515_v24 = vadd.f32 %v1499_v23, %v1483_v14  ;;  %v1938_v55 = vmul.f32 %v2852_v60, %v4661_v29  ;;  %v1906_v63 = vadd.f32 %v2852_v60, %v1890_v10  ;;  %v1408_v13 = vsub.f32 %v1308_v44, %v1344_v35  ;;  %v2856_v47 = vpop.eup %2855 }
 0x248   : > { %v1358_v34 = vsub.f32 %v4659_v40, %v4296_v0  ;;  %v1893_v5 = vmul.f32 %v2854_v46, %v1469_v17  ;;  %v1925_v15 = vmul.f32 %v2854_v46, %v1517_v8  ;;  %2859 = vpow2.f32 %v1820_v41  ;;  %2047 = vst [vmem:[%s4165_s4 + $0x28] sm:$0xff] %v2031_v31 }
 0x249   : > { %v4304_v50 = vadd.f32 %v1938_v55, %v1922_v59  ;;  %2861 = vrcp.f32 %v1906_v63  ;;  %v4662_v38 = vunpack.c.h.bf16 %v4654_v1  ;;  %v1390_v51 = vmul.f32 1.442695, %v1360_v7 }
 0x24a   : > { %v1438_v48 = vmul.f32 1.442695, %v1408_v13  ;;  %v1909_v27 = vadd.f32 %v2856_v47, %v1893_v5  ;;  %2863 = vpow2.f32 %v1868_v2  ;;  %v1386_v42 = vmul.f32 1.442695, %v1358_v34  ;;  %v4666_v5 = vld [vmem:[#allocation62_spill] sm:$0xff] }
 0x24b   : > { %v1941_v4 = vmul.f32 %v2856_v47, %v4662_v38  ;;  %v1406_v49 = vsub.f32 %v1300_v25, %v4296_v0  ;;  %2865 = vpow2.f32 %v1390_v51  ;;  %v1311_v17 = vadd.f32 %v4013_v30, %v3902_v3 }
 0x24c   : > { %v1748_v8 = vadd.f32 %v4006_v12, %v3922_v36  ;;  %2867 = vrcp.f32 %v1909_v27  ;;  %v1303_v1 = vadd.f32 %v3902_v3, %v4020_v61  ;;  %v1740_v45 = vadd.f32 %v3922_v36, %v4015_v53  ;;  %v2858_v28 = vpop.eup %2857  ;;  %v4664_v12 = vld [vmem:[#allocation55_spill] sm:$0xff] }
 0x24d   : > { %v4310_v57 = vadd.f32 %v1941_v4, %v1925_v15  ;;  %v1434_v44 = vmul.f32 1.442695, %v1406_v49  ;;  %2869 = vpow2.f32 %v1438_v48  ;;  %v4321_v25 = vmax.f32 %v4663_v19, %v1311_v17 }
 0x24e   : > { %v1784_v58 = vmax.f32 %v1344_v35, %v1748_v8  ;;  %v4325_v30 = vadd.f32 %v4022_v37, %v3922_v36  ;;  %v1988_v18 = vmul.f32 %v2858_v28, %v1908_v9  ;;  %2871 = vpow2.f32 %v1386_v42  ;;  %v4667_v42 = vld [vmem:[#allocation30_spill] sm:$0xff] }
 0x24f   : > { %v4328_v14 = vmax.f32 %v4664_v12, %v1303_v1  ;;  %v1782_v3 = vmax.f32 %v4296_v0, %v1740_v45  ;;  %2873 = vpow2.f32 %v1434_v44  ;;  %v1361_v53 = vsub.f32 %v4663_v19, %v4321_v25  ;;  %v4669_v44 = vld [vmem:[#allocation63_spill] sm:$0xff]  ;;  %v4670_v19 = vld [vmem:[#allocation29_spill] sm:$0xff] }
 0x250   : > { %v1409_v61 = vsub.f32 %v1311_v17, %v4321_v25  ;;  %v1800_v39 = vsub.f32 %v1344_v35, %v1784_v58  ;;  %v2004_v22 = vsub.f32 2.0, %v1988_v18  ;;  %v1848_v56 = vsub.f32 %v1748_v8, %v1784_v58 }
 0x251   : > { %v1359_v36 = vsub.f32 %v4664_v12, %v4328_v14  ;;  %v1407_v37 = vsub.f32 %v1303_v1, %v4328_v14  ;;  %v1392_v9 = vmul.f32 1.442695, %v1361_v53  ;;  %v1798_v32 = vsub.f32 %v4296_v0, %v1782_v3 }
 0x252   : > { %v1440_v23 = vmul.f32 1.442695, %v1409_v61  ;;  %v1830_v20 = vmul.f32 1.442695, %v1800_v39  ;;  %v2860_v52 = vpop.eup %2859  ;;  %v2020_v16 = vmul.f32 %v2858_v28, %v2004_v22  ;;  %v1878_v40 = vmul.f32 1.442695, %v1848_v56 }
 0x253   : > { %v1388_v60 = vmul.f32 1.442695, %v1359_v36  ;;  %v1436_v33 = vmul.f32 1.442695, %v1407_v37  ;;  %v2862_v10 = vpop.eup %2861  ;;  %v1891_v35 = vmul.f32 %v2860_v52, %v4292_v21  ;;  %v1923_v59 = vmul.f32 %v2860_v52, %v1515_v24  ;;  %v2910_v56 = vld [vmem:[%s3472_s10 + $0x38] sm:$0xff]  }
 0x254   : > { %2875 = vpow2.f32 %v1392_v9  ;;  %v1826_v29 = vmul.f32 1.442695, %v1798_v32  ;;  %v2864_v55 = vpop.eup %2863  ;;  %v2036_v41 = vmul.f32 %v2020_v16, %v4283_v43  ;;  %v1986_v2 = vmul.f32 %v2862_v10, %v1906_v63  ;;  %v4673_v32 = vld [vmem:[#allocation65_spill] sm:$0xff] }
 0x255   : > { %2877 = vpow2.f32 %v1440_v23  ;;  %v1846_v7 = vsub.f32 %v1740_v45, %v1782_v3  ;;  %v2866_v46 = vpop.eup %2865  ;;  %v4340_v0 = vadd.f32 %v2864_v55, %v1891_v35  ;;  %v4665_v31 = vunpack.c.h.bf16 %v4660_v26 }
 0x256   : > { %2879 = vpow2.f32 %v1830_v20  ;;  %v1785_v34 = vmax.f32 %v4321_v25, %v4325_v30  ;;  %v2868_v21 = vpop.eup %2867  ;;  %2052 = vst [vmem:[%s4165_s4 + $0x50] sm:$0xff] %v2036_v41  ;;  %v2002_v24 = vsub.f32 2.0, %v1986_v2  ;;  %v1456_v47 = vmul.f32 %v2866_v46, %v3993_v6 }
 0x257   : > { %v1939_v13 = vmul.f32 %v2864_v55, %v4665_v31  ;;  %v1488_v43 = vmul.f32 %v2866_v46, %v4666_v5  ;;  %2881 = vpow2.f32 %v1878_v40  ;;  %v2870_v63 = vpop.eup %2869  ;;  %v1989_v15 = vmul.f32 %v2868_v21, %v1909_v27 }
 0x258   : > { %2883 = vrcp.f32 %v4340_v0  ;;  %v1874_v26 = vmul.f32 1.442695, %v1846_v7  ;;  %v2872_v4 = vpop.eup %2871  ;;  %v2018_v51 = vmul.f32 %v2862_v10, %v2002_v24  ;;  %v1472_v48 = vadd.f32 %v2870_v63, %v1456_v47 }
 0x259   : > { %v4349_v38 = vadd.f32 %v1939_v13, %v1923_v59  ;;  %v4668_v49 = vunpack.c.l.bf16 %v4667_v42  ;;  %2885 = vpow2.f32 %v1388_v60  ;;  %v2874_v8 = vpop.eup %2873  ;;  %v2005_v6 = vsub.f32 2.0, %v1989_v15  ;;  %v2911_v60 = vld [vmem:[%s3470_s20 + $0x30] sm:$0xff]   ;;  %s4390_s20 = scalar_lea.hbm %s4443_s6, %s2320_s7 }
 0x25a   : > { %v1454_v1 = vmul.f32 %v2872_v4, %v4669_v44  ;;  %v1486_v45 = vmul.f32 %v2872_v4, %v4024_v62  ;;  %2887 = vpow2.f32 %v1436_v33  ;;  %v2034_v27 = vmul.f32 %v2018_v51, %v4304_v50  ;;  %v2909_v62 = vld [vmem:[%s4442_s5 + $0x3] ss:$0 sm:$0xff]  ;;  %v2912_v13 = vld [vmem:[%s3472_s10 + $0x30] sm:$0xff]   ;;  %s3061_s10 = scalar_lea.vmem %s4392_s28, 2048 }
 0x25b   : > { %v1504_v17 = vmul.f32 %v2870_v63, %v4668_v49  ;;  %v4671_v58 = vunpack.c.l.bf16 %v4670_v19  ;;  %2889 = vpow2.f32 %v1826_v29  ;;  %v2021_v12 = vmul.f32 %v2868_v21, %v2005_v6  ;;  %p3062_p9 = scmp.ne.s32.totalorder %s4392_s28, %s3061_s10  ;;  %p3069_p11 = scmp.lt.s32.totalorder %s3067_s19, %s3061_s10 }
 0x25c   : > { %v1470_v3 = vadd.f32 %v2874_v8, %v1454_v1  ;;  %2891 = vpow2.f32 %v1874_v26  ;;  %v1801_v53 = vsub.f32 %v4321_v25, %v1785_v34  ;;  %2050 = vst [vmem:[%s4165_s4 + $0x40] sm:$0xff] %v2034_v27  ;;  %v1849_v39 = vsub.f32 %v4325_v30, %v1785_v34  ;;  %v4672_v25 = vld [vmem:[#allocation64_spill] sm:$0xff] }
 0x25d   : > { %v1520_v28 = vadd.f32 %v1504_v17, %v1488_v43  ;;  %v1502_v18 = vmul.f32 %v2874_v8, %v4671_v58  ;;  %v1743_v50 = vadd.f32 %v2909_v62, %v4030_v11  ;;  %v1768_v36 = vunpack.c.l.bf16 %v2910_v56  ;;  %v4675_v43 = vld [vmem:[#allocation66_spill] sm:$0xff]  ;;  %p3063_p8 = pnand %p3062_p9, %p4676_p10  ;;  %p3070_p4 = por %p3069_p11, %p3068_p5 }
 0x25e   : > { %v2876_v22 = vpop.eup %2875  ;;  %v2037_v37 = vmul.f32 %v2021_v12, %v4310_v57  ;;  %v1832_v9 = vmul.f32 1.442695, %v1801_v53  ;;  %v1880_v16 = vmul.f32 1.442695, %v1849_v39  ;;  %v1327_v33 = vunpack.c.h.bf16 %v2911_v60 }
 0x25f   : > { %v1518_v61 = vadd.f32 %v1502_v18, %v1486_v45  ;;  %v2878_v23 = vpop.eup %2877  ;;  %v1457_v20 = vmul.f32 %v2876_v22, %v4672_v25  ;;  %v1489_v52 = vmul.f32 %v2876_v22, %v4673_v32  ;;  %v1783_v30 = vmax.f32 %v4328_v14, %v1743_v50  ;;  %p3064_p1 = pneg %p3063_p8 }
 0x260   : > { %v2880_v40 = vpop.eup %2879  ;;  %2053 = vst [vmem:[%s4165_s4 + $0x58] sm:$0xff] %v2037_v37  ;;  %v4674_v11 = vunpack.c.h.bf16 %v4667_v42  ;;  %2893 = vpow2.f32 %v1832_v9  ;;  %v1766_v34 = vunpack.c.l.bf16 %v2912_v13  ;;  %v1769_v1 = vunpack.c.h.bf16 %v2910_v56 }
 0x261   : > { %v2882_v35 = vpop.eup %2881  ;;  %v1473_v57 = vadd.f32 %v2878_v23, %v1457_v20  ;;  %v1896_v59 = vmul.f32 %v2880_v40, %v1472_v48  ;;  %v1928_v29 = vmul.f32 %v2880_v40, %v1520_v28  ;;  %2895 = vpow2.f32 %v1880_v16  ;;  %p3071_p13 = pnand %p3070_p4, %p3064_p1 }
 0x262   : > { %v1505_v10 = vmul.f32 %v2878_v23, %v4674_v11  ;;  %v2884_v55 = vpop.eup %2883  ;;  %v1944_v2 = vmul.f32 %v2882_v35, %v1768_v36  ;;  %v1799_v7 = vsub.f32 %v4328_v14, %v1783_v30  ;;  %v1847_v46 = vsub.f32 %v1743_v50, %v1783_v30 }
 0x263   : > { %v2886_v31 = vpop.eup %2885  ;;  %v1987_v21 = vmul.f32 %v2884_v55, %v4340_v0  ;;  %v1912_v24 = vadd.f32 %v2882_v35, %v1896_v59 }
 0x264   : > { %v1521_v41 = vadd.f32 %v1505_v10, %v1489_v52  ;;  %v2888_v47 = vpop.eup %2887  ;;  %v1960_v5 = vadd.f32 %v1944_v2, %v1928_v29  ;;  %v1455_v63 = vmul.f32 %v2886_v31, %v4675_v43  ;;  %v1487_v15 = vmul.f32 %v2886_v31, %v4069_v54 }
 0x265   : > { %v1828_v26 = vmul.f32 1.442695, %v1799_v7  ;;  %v2890_v4 = vpop.eup %2889  ;;  %v2003_v51 = vsub.f32 2.0, %v1987_v21  ;;  %2897 = vrcp.f32 %v1912_v24  ;;  %v1503_v48 = vmul.f32 %v2888_v47, %v1327_v33 }
 0x266   : > { %v1876_v42 = vmul.f32 1.442695, %v1847_v46  ;;  %v2892_v14 = vpop.eup %2891  ;;  %v1471_v49 = vadd.f32 %v2888_v47, %v1455_v63  ;;  %v1894_v17 = vmul.f32 %v2890_v4, %v1470_v3  ;;  %v1926_v8 = vmul.f32 %v2890_v4, %v1518_v61 }
 0x267   : > { %2899 = vpow2.f32 %v1828_v26  ;;  %v2019_v0 = vmul.f32 %v2884_v55, %v2003_v51  ;;  %v1519_v6 = vadd.f32 %v1503_v48, %v1487_v15  ;;  %v1942_v44 = vmul.f32 %v2892_v14, %v1766_v34 }
 0x268   : > { %2901 = vpow2.f32 %v1876_v42  ;;  %v1910_v45 = vadd.f32 %v2892_v14, %v1894_v17  ;;  %v1767_v3 = vunpack.c.h.bf16 %v2912_v13 }
 0x269   : > { %v2035_v54 = vmul.f32 %v2019_v0, %v4349_v38  ;;  %v1958_v27 = vadd.f32 %v1942_v44, %v1926_v8 }
 0x26a   : > { %v2894_v28 = vpop.eup %2893  ;;  %2903 = vrcp.f32 %v1910_v45 }
 0x26b   : > { %v2896_v19 = vpop.eup %2895  ;;  %2051 = vst [vmem:[%s4165_s4 + $0x48] sm:$0xff] %v2035_v54  ;;  %v1897_v58 = vmul.f32 %v2894_v28, %v1473_v57  ;;  %v1929_v18 = vmul.f32 %v2894_v28, %v1521_v41 }
 0x26c   : > { %v1945_v12 = vmul.f32 %v2896_v19, %v1769_v1 }
 0x26d   : > { %v1913_v53 = vadd.f32 %v2896_v19, %v1897_v58 }
 0x26e   : > { %v1961_v61 = vadd.f32 %v1945_v12, %v1929_v18 }
 0x26f   : > { %v2898_v39 = vpop.eup %2897  ;;  %2905 = vrcp.f32 %v1913_v53 }
 0x270   : > { %v1992_v50 = vmul.f32 %v2898_v39, %v1912_v24 }
 0x271   : > { %v2900_v62 = vpop.eup %2899 }
 0x272   : > { %v2902_v22 = vpop.eup %2901  ;;  %v1895_v56 = vmul.f32 %v2900_v62, %v1471_v49  ;;  %v1927_v36 = vmul.f32 %v2900_v62, %v1519_v6  ;;  %v2008_v38 = vsub.f32 2.0, %v1992_v50 }
 0x273   : > { %v1943_v37 = vmul.f32 %v2902_v22, %v1767_v3 }
 0x274   : > { %v1911_v9 = vadd.f32 %v2902_v22, %v1895_v56  ;;  %v2904_v23 = vpop.eup %2903  ;;  %v2024_v25 = vmul.f32 %v2898_v39, %v2008_v38 }
 0x275   : > { %v1959_v20 = vadd.f32 %v1943_v37, %v1927_v36  ;;  %v1990_v32 = vmul.f32 %v2904_v23, %v1910_v45 }
 0x276   : > { %2907 = vrcp.f32 %v1911_v9  ;;  %v2040_v52 = vmul.f32 %v2024_v25, %v1960_v5 }
 0x277   : > { %v2006_v16 = vsub.f32 2.0, %v1990_v32 }
 0x278   : > { %2056 = vst [vmem:[%s4165_s4 + $0x70] sm:$0xff] %v2040_v52 }
 0x279   : > { %v2906_v30 = vpop.eup %2905  ;;  %v2022_v40 = vmul.f32 %v2904_v23, %v2006_v16 }
 0x27a   : > { %v1993_v60 = vmul.f32 %v2906_v30, %v1913_v53 }
 0x27b   : > { %v2038_v33 = vmul.f32 %v2022_v40, %v1958_v27 }
 0x27c   : > { %v2009_v11 = vsub.f32 2.0, %v1993_v60 }
 0x27d   : > { %2054 = vst [vmem:[%s4165_s4 + $0x60] sm:$0xff] %v2038_v33 }
 0x27e   : > { %v2025_v10 = vmul.f32 %v2906_v30, %v2009_v11 }
 0x280   : > { %v2908_v35 = vpop.eup %2907  ;;  %v2041_v57 = vmul.f32 %v2025_v10, %v1961_v61 }
 0x281   : > { %v1991_v59 = vmul.f32 %v2908_v35, %v1911_v9 }
 0x282   : > { %2057 = vst [vmem:[%s4165_s4 + $0x78] sm:$0xff] %v2041_v57 }
 0x283   : > { %v2007_v29 = vsub.f32 2.0, %v1991_v59 }
 0x285   : > { %v2023_v55 = vmul.f32 %v2908_v35, %v2007_v29 }
 0x287   : > { %v2039_v41 = vmul.f32 %v2023_v55, %v1959_v20 }
 0x289   : > { %2055 = vst [vmem:[%s4165_s4 + $0x68] sm:$0xff] %v2039_v41 }
 0x28a   : > { %3074 = shalt.err (!%p3071_p13)
}
 0x28b   : > { %s3075_s13 = scalar_lea.hbm %s4390_s20, 2048  ;;  %s3079_s15 = scalar_lea.hbm %s4443_s6, 4096 }
 0x28c   : > { %p3076_p3 = scmp.ne.s32.totalorder %s4390_s20, %s3075_s13  ;;  %p3080_p0 = scmp.lt.u32.totalorder %s4390_s20, %s4443_s6 }
 0x28d   : > { %p3081_p6 = scmp.lt.u32.totalorder %s3079_s15, %s3075_s13  ;;  %p3083_p9 = scmp.lt.u32.totalorder %s3075_s13, %s4390_s20 }
 0x28e   : > { %p3077_p2 = pnand %p3076_p3, %p4676_p10 }
 0x28f   : > { %p3082_p7 = por %p3081_p6, %p3080_p0 }
 0x290   : > { %p3078_p12 = pneg %p3077_p2 }
 0x291   : > { %p3084_p8 = por %p3083_p9, %p3082_p7 }
 0x293   : > { %p3085_p1 = pnand %p3084_p8, %p3078_p12 }
 0x295   : > { %3088 = shalt.err (!%p3085_p1)
}
 0x296   : > { %s3149_s30 = smov 128   ;;  %s3150_s4 = smov 8  }
 0x297   : > { %2525 = dma.vmem_to_hbm [thread:$0]  (%p4676_p10), %s4392_s28, 2048, %s4390_s20, %s2059_s29, %s3149_s30, %s3149_s30, %s3150_s4  }
 0x298 PF: > { %s4677_s27 = sld [smem:[#allocation19_spill]]  ;;  %s2087_s12 = sand.u32 1, %s3127_s21  }
 0x299   : > { %p4679_p11 = scmp.ge.s32.totalorder %s3139_s24, 2  ;;  %s2088_s7 = scalar_lea.sflag [#allocation4], %s2087_s12 }
 0x29e   : > { %p4678_p5 = scmp.ne.s32.totalorder %s4677_s27, 0 }
 0x2a0   : > { %p2545_p4 = pnand %p4679_p11, %p4678_p5 }
 0x2a2   : > { %3122 = dma.done.wait (!%p2545_p4), %s2088_s7, 2048  }
 0x2a3   : > { %3124 = vsyncadd (!%p2545_p4), %s2088_s7, 4294965248  ;;  %s4680_s24 = sld [smem:[#allocation17_spill]]  ;;  %s4681_s11 = sld [smem:[#allocation18_spill]] }
 0x2a4   : > { %s4682_s21 = smov %s3131_s22  ;;  %s4683_s22 = smov %s3135_s23 }
 0x2a9   : > { %p25_p13 = scmp.ge.s32.totalorder %s4680_s24, 4   ;;  %s4684_s23 = smov %s4681_s11 }
 0x2ab   :  { %27 = sbr.rel (!%p25_p13) target bundleno = 12 (0xc), region = 133 }
 0x2b2   :  { %2093 = vsyncpa [#allocation3], 1 }
 0x2b3   :  { %2095 = vsyncpa [#allocation3 + $0x1], 1 }
 0x2b4   :  { %2096 = vsyncpa [#allocation6], 1 }
 0x2b5   :  { %2098 = vsyncpa [#allocation6 + $0x1], 1 }
 0x2b6   :  { %2099 = vsyncpa [#allocation9], 1 }
 0x2b7   :  { %2101 = vsyncpa [#allocation9 + $0x1], 1 }
 0x2b8   :  { %2102 = vsyncpa [#allocation4], 1 }
 0x2b9   :  { %2104 = vsyncpa [#allocation4 + $0x1], 1 }

// kernel: tpu_custom_call.1
= control target key start
LH: loop header
LB: loop body
LE: loop exit
PB: predicated region body
PF: predicated region fallthrough
CT: control target
= control target key end

     0   :  { %s4437_s0 = inlined_call_operand.hbm [shape: bf16[256,128], index: 0, kind: input, shape index: {}]   ;;  %s4438_s1 = inlined_call_operand.hbm [shape: bf16[256,128], index: 1, kind: input, shape index: {}]   ;;  %s4439_s2 = inlined_call_operand.hbm [shape: bf16[256,128], index: 2, kind: input, shape index: {}]   ;;  %s4440_s3 = inlined_call_operand.hbm [shape: bf16[256,128], index: 3, kind: input, shape index: {}]   ;;  %s4441_s4 = inlined_call_operand.hbm [shape: bf16[4,128,128], index: 4, kind: input, shape index: {}]   ;;  %s4442_s5 = inlined_call_operand.vmem [shape: f32[4,1,128], index: 5, kind: input, shape index: {}]   ;;  %s4443_s6 = inlined_call_operand.hbm [shape: f32[256,128], index: 6, kind: output, shape index: {}]  }
   0x1   :  { %4498 = sst [smem:[#allocation67_spill]] %s4438_s1 }
   0x2   :  { %4499 = sst [smem:[#allocation68_spill]] %s4441_s4 }
   0x3   :  { %11 = vsyncpa [#allocation3], 0 }
   0x4   :  { %13 = vsyncpa [#allocation3 + $0x1], 0 }
   0x5   :  { %14 = vsyncpa [#allocation6], 0 }
   0x6   :  { %16 = vsyncpa [#allocation6 + $0x1], 0 }
   0x7   :  { %17 = vsyncpa [#allocation9], 0 }
   0x8   :  { %19 = vsyncpa [#allocation9 + $0x1], 0 }
   0x9   :  { %20 = vsyncpa [#allocation4], 0 }
   0xa   :  { %22 = vsyncpa [#allocation4 + $0x1], 0  ;;  %s3186_s21 = smov 0   ;;  %s3188_s22 = smov 0  }
   0xb   :  { %s3190_s23 = smov 0   ;;  %s3192_s24 = smov 0  }
   0xc LB: > { %s3207_s25 = sadd.s32 4294967295, %s3139_s24   ;;  %s2220_s26 = sadd.s32 4294967294, %s3139_s24   ;;  %s3139_s24 = sphi %s3192_s24, %s4680_s24   ;;  %s3135_s23 = sphi %s3190_s23, %s4684_s23   ;;  %s3131_s22 = sphi %s3188_s22, %s4683_s22   ;;  %s3127_s21 = sphi %s3186_s21, %s4682_s21  }
   0xd   : > { %s3211_s27 = sadd.s32 1, %s3139_s24   ;;  %s35_s28 = sadd.s32 1, %s3135_s23 }
   0xe   : > { %4500 = sst [smem:[#allocation17_spill]] %s3211_s27  ;;  %s32_s29 = ssub.s32 %s3139_s24, %s3211_s27 }
   0xf   : > { %p42_p0 = scmp.ne.s32.totalorder %s3135_s23, %s3131_s22  ;;  %p33_p1 = scmp.eq.s32.totalorder %s32_s29, 0 }
  0x10   : > { %p43_p2 = scmp.eq.s32.totalorder %s3139_s24, 0  ;;  %p48_p3 = scmp.ne.s32.totalorder %s3131_s22, %s3127_s21 }
  0x11   : > { %p4444_p4 = scmp.eq.s32.totalorder %s3207_s25, 0  ;;  %p192_p7 = scmp.eq.s32.totalorder %s3207_s25, 1 }
  0x12   : > { %s3223_s30 = scalar_select %p33_p1, %s3135_s23, %s35_s28  }
  0x13   : > { %p3225_p5 = por %p43_p2, %p42_p0  ;;  %p3231_p6 = por %p4444_p4, %p48_p3 }
  0x14   : > { %4501 = sst [smem:[#allocation18_spill]] %s3223_s30  ;;  %p198_p8 = scmp.eq.s32.totalorder %s2220_s26, 1 }
  0x15   : > { %s4502_s7 = scalar_select %p3225_p5, 1, 0 }
  0x16   : > { %s4503_s8 = scalar_select %p3231_p6, 1, 0 }
  0x17   : > { %p2221_p9 = scmp.ge.s32.totalorder %s3139_s24, 1  ;;  %p205_p10 = scmp.lt.s32.totalorder %s3139_s24, 3 }
  0x18   : > { %p3238_p11 = por %p192_p7, %p42_p0  ;;  %p3242_p12 = por %p198_p8, %p48_p3 }
  0x19   : > { %p3246_p13 = pnand %p2221_p9, %p205_p10  ;;  %s3141_s12 = smov [#allocation10]  }
  0x1a   : > { %s4504_s9 = scalar_select %p3238_p11, 1, 0 }
  0x1b   : > { %s4505_s10 = scalar_select %p3242_p12, 1, 0 }
  0x1c   : > { %s4507_s11 = scalar_select %p3246_p13, 1, 0 }
  0x1d   : > { %4506 = sst [smem:[#allocation19_spill]] %s4505_s10  ;;  %p2527_p1 = pneg %p3246_p13 }
  0x1e   : > { %s217_s13 = sshll.u32 %s3141_s12, 4  ;;  %s4448_s15 = sand.u32 1, %s3135_s23   ;;  %s218_s13 = int_to_ptr.vmem [resolvable:$true] %s217_s13 }
  0x1f   : > { %p3254_p2 = pnand %p2527_p1, %p4444_p4  ;;  %s3263_s16 = sshll.u32 %s4448_s15, 6 }
  0x20   : > { %s4509_s4 = sld [smem:[#allocation68_spill]] }
  0x21   : > { %p2915_p8 = pneg %p3254_p2 }
  0x26   : > { %s2913_s19 = scalar_lea.hbm %s4509_s4, 4096 }
  0x27   : > { %p2914_p7 = scmp.ne.s32.totalorder %s4509_s4, %s2913_s19  ;;  %p2920_p1 = scmp.lt.u32.totalorder %s2913_s19, %s4509_s4 }
  0x29   : > { %p2916_p9 = pnand %p2915_p8, %p2914_p7 }
  0x2b   : > { %p2917_p10 = pneg %p2916_p9 }
  0x2d   : > { %p2922_p0 = pnand %p2920_p1, %p2917_p10 }
  0x2f   : > { %2925 = shalt.err (!%p2922_p0)
}
  0x30   : > { %s2926_s12 = scalar_lea.vmem %s218_s13, 4096  ;;  %p2934_p11 = scmp.lt.s32.totalorder %s218_s13, %s218_s13 }
  0x31   : > { %p2927_p4 = scmp.ne.s32.totalorder %s218_s13, %s2926_s12  ;;  %p2935_p6 = scmp.lt.s32.totalorder %s2926_s12, %s2926_s12 }
  0x33   : > { %p2929_p3 = pnand %p2927_p4, %p2915_p8  ;;  %p2936_p13 = por %p2935_p6, %p2934_p11 }
  0x35   : > { %p2930_p12 = pneg %p2929_p3 }
  0x37   : > { %p2937_p5 = pnand %p2936_p13, %p2930_p12 }
  0x39   : > { %2940 = shalt.err (!%p2937_p5)
}
  0x3a   : > { %s4449_s17 = smov 64   ;;  %s4451_s18 = smov 4  }
  0x3b   : > { %2530 = dma.hbm_to_vmem [thread:$0]  (!%p3254_p2), %s4509_s4, 4096, %s218_s13, [#allocation9], %s4449_s17, %s4449_s17, %s4451_s18  }
  0x3c   : > { %s3285_s26 = sshll.u32 %s3139_s24, 10  ;;  %p4510_p4 = scmp.ne.s32.totalorder %s4502_s7, 0 }
  0x3d   : > { %p4511_p5 = scmp.lt.s32.totalorder %s3139_s24, 2  ;;  %s4453_s29 = sand.u32 1, %s3139_s24  }
  0x3e   : > { %s4513_s1 = sld [smem:[#allocation67_spill]]  ;;  %s259_s13 = scalar_lea.vmem [#allocation5], %s3263_s16 }
  0x3f   : > { %p3291_p6 = pnand %p4511_p5, %p4510_p4  ;;  %s266_s19 = sshll.u32 %s259_s13, 4  ;;  %s3303_s19 = int_to_ptr.vmem [resolvable:$true] %s266_s19 }
  0x40   : > { %s3307_s7 = scalar_lea.sflag [#allocation6], %s4453_s29 }
  0x41   : > { %p3313_p12 = pneg %p3291_p6 }
  0x44   : > { %s3300_s15 = scalar_lea.hbm %s4513_s1, %s3285_s26  ;;  %s2946_s13 = scalar_lea.hbm %s4513_s1, 2048 }
  0x45   : > { %s2941_s20 = scalar_lea.hbm %s3300_s15, 1024  ;;  %p2947_p0 = scmp.lt.u32.totalorder %s3300_s15, %s4513_s1 }
  0x46   : > { %p2942_p11 = scmp.ne.s32.totalorder %s3300_s15, %s2941_s20  ;;  %p2948_p3 = scmp.lt.u32.totalorder %s2946_s13, %s2941_s20 }
  0x47   : > { %p2950_p8 = scmp.lt.u32.totalorder %s2941_s20, %s3300_s15 }
  0x48   : > { %p2944_p13 = pnand %p3313_p12, %p2942_p11  ;;  %p2949_p7 = por %p2948_p3, %p2947_p0 }
  0x4a   : > { %p2945_p2 = pneg %p2944_p13  ;;  %p2951_p9 = por %p2950_p8, %p2949_p7 }
  0x4c   : > { %p2952_p10 = pnand %p2951_p9, %p2945_p2 }
  0x4e   : > { %2955 = shalt.err (!%p2952_p10)
}
  0x4f   : > { %s2956_s29 = scalar_lea.vmem %s3303_s19, 1024  ;;  %s3144_s12 = smov [#allocation5]  }
  0x50   : > { %p2957_p1 = scmp.ne.s32.totalorder %s3303_s19, %s2956_s29  ;;  %s2961_s14 = sshll.u32 %s3144_s12, 4  ;;  %s2962_s14 = int_to_ptr.vmem [resolvable:$false] %s2961_s14 }
  0x51   : > { %s2963_s4 = scalar_lea.vmem %s2962_s14, 2048  ;;  %p2964_p11 = scmp.lt.s32.totalorder %s3303_s19, %s2962_s14 }
  0x52   : > { %p2959_p4 = pnand %p2957_p1, %p3313_p12  ;;  %p2965_p13 = scmp.lt.s32.totalorder %s2963_s4, %s2956_s29 }
  0x54   : > { %p2960_p5 = pneg %p2959_p4  ;;  %p2966_p0 = por %p2965_p13, %p2964_p11 }
  0x56   : > { %p2967_p3 = pnand %p2966_p0, %p2960_p5 }
  0x58   : > { %2970 = shalt.err (!%p2967_p3)
}
  0x59   : > { %s4515_s18 = smov 4   ;;  %s4516_s20 = smov 64  }
  0x5a   : > { %2537 = dma.hbm_to_vmem [thread:$0]  (!%p3291_p6), %s3300_s15, 1024, %s3303_s19, %s3307_s7, %s4516_s20, %s4516_s20, %s4515_s18  }
  0x5b   : > { %s3344_s29 = scalar_lea.hbm %s4437_s0, %s3285_s26  ;;  %s238_s14 = scalar_lea.vmem [#allocation2], %s3263_s16 }
  0x5c   : > { %s245_s4 = sshll.u32 %s238_s14, 4  ;;  %s4517_s1 = sand.u32 1, %s3135_s23   ;;  %s3347_s4 = int_to_ptr.vmem [resolvable:$true] %s245_s4 }
  0x5d   : > { %s3351_s30 = scalar_lea.sflag [#allocation3], %s4517_s1  ;;  %s2971_s27 = scalar_lea.hbm %s3344_s29, 1024 }
  0x5e   : > { %p2972_p2 = scmp.ne.s32.totalorder %s3344_s29, %s2971_s27  ;;  %s2976_s13 = scalar_lea.hbm %s4437_s0, 2048 }
  0x5f   : > { %p2977_p9 = scmp.lt.u32.totalorder %s3344_s29, %s4437_s0  ;;  %p2978_p10 = scmp.lt.u32.totalorder %s2976_s13, %s2971_s27 }
  0x60   : > { %p2974_p7 = pnand %p2972_p2, %p3313_p12  ;;  %p2980_p4 = scmp.lt.u32.totalorder %s2971_s27, %s3344_s29 }
  0x61   : > { %p2979_p1 = por %p2978_p10, %p2977_p9 }
  0x62   : > { %p2975_p8 = pneg %p2974_p7 }
  0x63   : > { %p2981_p5 = por %p2980_p4, %p2979_p1 }
  0x65   : > { %p2982_p11 = pnand %p2981_p5, %p2975_p8 }
  0x67   : > { %2985 = shalt.err (!%p2982_p11)
}
  0x68   : > { %s2986_s1 = scalar_lea.vmem %s3347_s4, 1024  ;;  %s3145_s14 = smov [#allocation2]  }
  0x69   : > { %p2987_p13 = scmp.ne.s32.totalorder %s3347_s4, %s2986_s1  ;;  %s2991_s15 = sshll.u32 %s3145_s14, 4  ;;  %s2992_s15 = int_to_ptr.vmem [resolvable:$false] %s2991_s15 }
  0x6a   : > { %s2993_s10 = scalar_lea.vmem %s2992_s15, 2048  ;;  %p2994_p2 = scmp.lt.s32.totalorder %s3347_s4, %s2992_s15 }
  0x6b   : > { %p2989_p0 = pnand %p2987_p13, %p3313_p12  ;;  %p2995_p7 = scmp.lt.s32.totalorder %s2993_s10, %s2986_s1 }
  0x6d   : > { %p2990_p3 = pneg %p2989_p0  ;;  %p2996_p9 = por %p2995_p7, %p2994_p2 }
  0x6f   : > { %p2997_p10 = pnand %p2996_p9, %p2990_p3 }
  0x71   : > { %3000 = shalt.err (!%p2997_p10)
}
  0x72   : > { %2534 = dma.hbm_to_vmem [thread:$0]  (!%p3291_p6), %s3344_s29, 1024, %s3347_s4, %s3351_s30, %s4516_s20, %s4516_s20, %s4515_s18  }
  0x73   : > { %s3382_s13 = scalar_lea.hbm %s4439_s2, %s3285_s26  ;;  %s280_s12 = scalar_lea.vmem [#allocation7], %s3263_s16 }
  0x74   : > { %s287_s1 = sshll.u32 %s280_s12, 4  ;;  %s3001_s14 = scalar_lea.hbm %s3382_s13, 1024  ;;  %s3385_s1 = int_to_ptr.vmem [resolvable:$true] %s287_s1 }
  0x75   : > { %p3002_p8 = scmp.ne.s32.totalorder %s3382_s13, %s3001_s14  ;;  %s3006_s29 = scalar_lea.hbm %s4439_s2, 2048 }
  0x76   : > { %p3007_p5 = scmp.lt.u32.totalorder %s3382_s13, %s4439_s2  ;;  %p3008_p11 = scmp.lt.u32.totalorder %s3006_s29, %s3001_s14 }
  0x77   : > { %p3004_p1 = pnand %p3002_p8, %p3313_p12  ;;  %p3010_p0 = scmp.lt.u32.totalorder %s3001_s14, %s3382_s13 }
  0x78   : > { %p3009_p13 = por %p3008_p11, %p3007_p5 }
  0x79   : > { %p3005_p4 = pneg %p3004_p1 }
  0x7a   : > { %p3011_p3 = por %p3010_p0, %p3009_p13 }
  0x7c   : > { %p3012_p2 = pnand %p3011_p3, %p3005_p4 }
  0x7e   : > { %3015 = shalt.err (!%p3012_p2)
}
  0x7f   : > { %s3016_s27 = scalar_lea.vmem %s3385_s1, 1024  ;;  %s3146_s19 = smov [#allocation7]  }
  0x80   : > { %p3017_p7 = scmp.ne.s32.totalorder %s3385_s1, %s3016_s27  ;;  %s3021_s12 = sshll.u32 %s3146_s19, 4  ;;  %s3022_s12 = int_to_ptr.vmem [resolvable:$false] %s3021_s12 }
  0x81   : > { %s3023_s15 = scalar_lea.vmem %s3022_s12, 2048  ;;  %p3024_p8 = scmp.lt.s32.totalorder %s3385_s1, %s3022_s12 }
  0x82   : > { %p3019_p9 = pnand %p3017_p7, %p3313_p12  ;;  %p3025_p1 = scmp.lt.s32.totalorder %s3023_s15, %s3016_s27 }
  0x84   : > { %p3020_p10 = pneg %p3019_p9  ;;  %p3026_p5 = por %p3025_p1, %p3024_p8 }
  0x86   : > { %p3027_p11 = pnand %p3026_p5, %p3020_p10 }
  0x88   : > { %3030 = shalt.err (!%p3027_p11)
}
  0x89   : > { %2540 = dma.hbm_to_vmem [thread:$0]  (!%p3291_p6), %s3382_s13, 1024, %s3385_s1, %s3307_s7, %s4516_s20, %s4516_s20, %s4515_s18  }
  0x8a   : > { %s3416_s29 = scalar_lea.hbm %s4440_s3, %s3285_s26  ;;  %s301_s4 = scalar_lea.vmem [#allocation8], %s3263_s16 }
  0x8b   : > { %s308_s10 = sshll.u32 %s301_s4, 4  ;;  %s4518_s27 = sand.u32 1, %s3139_s24   ;;  %s3419_s10 = int_to_ptr.vmem [resolvable:$true] %s308_s10 }
  0x8c   : > { %s3423_s19 = scalar_lea.sflag [#allocation9], %s4518_s27  ;;  %s3031_s12 = scalar_lea.hbm %s3416_s29, 1024 }
  0x8d   : > { %p3032_p4 = scmp.ne.s32.totalorder %s3416_s29, %s3031_s12  ;;  %s3036_s26 = scalar_lea.hbm %s4440_s3, 2048 }
  0x8e   : > { %p3037_p3 = scmp.lt.u32.totalorder %s3416_s29, %s4440_s3  ;;  %p3038_p2 = scmp.lt.u32.totalorder %s3036_s26, %s3031_s12 }
  0x8f   : > { %p3034_p13 = pnand %p3032_p4, %p3313_p12  ;;  %p3040_p9 = scmp.lt.u32.totalorder %s3031_s12, %s3416_s29 }
  0x90   : > { %p3039_p7 = por %p3038_p2, %p3037_p3 }
  0x91   : > { %p3035_p0 = pneg %p3034_p13 }
  0x92   : > { %p3041_p10 = por %p3040_p9, %p3039_p7 }
  0x94   : > { %p3042_p8 = pnand %p3041_p10, %p3035_p0 }
  0x96   : > { %3045 = shalt.err (!%p3042_p8)
}
  0x97   : > { %s3046_s16 = scalar_lea.vmem %s3419_s10, 1024  ;;  %s3147_s14 = smov [#allocation8]  }
  0x98   : > { %p3047_p1 = scmp.ne.s32.totalorder %s3419_s10, %s3046_s16  ;;  %s3051_s30 = sshll.u32 %s3147_s14, 4  ;;  %s3052_s30 = int_to_ptr.vmem [resolvable:$false] %s3051_s30 }
  0x99   : > { %s3053_s4 = scalar_lea.vmem %s3052_s30, 2048  ;;  %p3054_p4 = scmp.lt.s32.totalorder %s3419_s10, %s3052_s30 }
  0x9a   : > { %p3049_p5 = pnand %p3047_p1, %p3313_p12  ;;  %p3055_p13 = scmp.lt.s32.totalorder %s3053_s4, %s3046_s16 }
  0x9c   : > { %p3050_p11 = pneg %p3049_p5  ;;  %p3056_p3 = por %p3055_p13, %p3054_p4 }
  0x9e   : > { %p3057_p2 = pnand %p3056_p3, %p3050_p11 }
  0xa0   : > { %3060 = shalt.err (!%p3057_p2)
}
  0xa1   : > { %2543 = dma.hbm_to_vmem [thread:$0]  (!%p3291_p6), %s3416_s29, 1024, %s3419_s10, %s3423_s19, %s4516_s20, %s4516_s20, %s4515_s18  }
  0xa2   : > { %p4519_p12 = scmp.ne.s32.totalorder %s4507_s11, 0 }
  0xa4   : > { %320 = sbr.rel (%p4519_p12) target bundleno = 664 (0x298), region = 44 }
  0xab   : > { %s3453_s17 = sand.u32 1, %s3131_s22   ;;  %p4520_p0 = scmp.ne.s32.totalorder %s4503_s8, 0 }
  0xac   : > { %s2237_s27 = sshll.u32 %s3453_s17, 6  ;;  %s323_s12 = scalar_lea.sflag [#allocation3], %s3453_s17 }
  0xad   : > { %s3457_s7 = scalar_lea.vmem [#allocation2], %s2237_s27 }
  0xae   : > { %3106 = dma.done.wait (%p4520_p0), %s323_s12, 1024  }
  0xaf   : > { %3108 = vsyncadd (%p4520_p0), %s323_s12, 4294966272  ;;  %s331_s28 = sand.u32 1, %s3207_s25   ;;  %s3464_s18 = scalar_lea.vmem [#allocation5], %s2237_s27 }
  0xb0   : > { %s332_s11 = scalar_lea.sflag [#allocation6], %s331_s28 }
  0xb1   : > { %3110 = dma.done.wait (%p4520_p0), %s332_s11, 2048  }
  0xb2   : > { %3112 = vsyncadd (%p4520_p0), %s332_s11, 4294965248  ;;  %s3470_s20 = scalar_lea.vmem [#allocation7], %s2237_s27  ;;  %s350_s29 = scalar_lea.sflag [#allocation9], %s331_s28 }
  0xb3   : > { %s3472_s10 = scalar_lea.vmem [#allocation8], %s2237_s27 }
  0xb4   : > { %3114 = dma.done.wait (%p4520_p0), %s350_s29, 1024  }
  0xb5   : > { %3116 = vsyncadd (%p4520_p0), %s350_s29, 4294966272  ;;  %p4521_p6 = scmp.eq.s32.totalorder %s3207_s25, 0 }
  0xb7   : > { %3118 = dma.done.wait (%p4521_p6), [#allocation9], 4096   ;;  %p4522_p7 = pmov %p4521_p6 }
  0xb8   : > { %v2589_v0 = vld [vmem:[#allocation10] sm:$0xff]   ;;  %v2591_v2 = vld [vmem:[#allocation10 + $0x8] sm:$0xff]   ;;  %v2593_v4 = vld [vmem:[#allocation10 + $0x10] sm:$0xff]   ;;  %s2242_s30 = sshll.u32 %s3453_s17, 7  ;;  %s2059_s29 = scalar_lea.sflag [#allocation4], %s3453_s17 }
  0xb9   : > { %3120 = vsyncadd (%p4522_p7), [#allocation9], 4294963200  ;;  %v2590_v1 = vld [vmem:[#allocation10 + $0x40] sm:$0xff]   ;;  %2385 = vmatprep.subr.bf16.mxu0 %v2589_v0  ;;  %v2592_v3 = vld [vmem:[#allocation10 + $0x48] sm:$0xff]   ;;  %s4165_s4 = scalar_lea.vmem [#allocation11], %s2242_s30  ;;  %p4676_p10 = scmp.ne.s32.totalorder %s4504_s9, 0 }
  0xba   : > { %2417 = vmatprep.subr.bf16.mxu1 %v2590_v1  ;;  %2386 = vmatpush3.bf16.msra.mxu0 %v2589_v0  ;;  %v2594_v5 = vld [vmem:[#allocation10 + $0x50] sm:$0xff]   ;;  %v2595_v6 = vld [vmem:[#allocation10 + $0x18] sm:$0xff]   ;;  %v2597_v8 = vld [vmem:[#allocation10 + $0x20] sm:$0xff]   ;;  %s2072_s28 = sshll.u32 %s4165_s4, 4  ;;  %s4392_s28 = int_to_ptr.vmem [resolvable:$true] %s2072_s28 }
  0xbb   : > { %2418 = vmatpush3.bf16.msra.mxu1 %v2590_v1  ;;  %2387 = vmatprep.subr.bf16.mxu0 %v2591_v2  ;;  %v2596_v7 = vld [vmem:[#allocation10 + $0x58] sm:$0xff]   ;;  %v2598_v9 = vld [vmem:[#allocation10 + $0x60] sm:$0xff]   ;;  %v2599_v10 = vld [vmem:[#allocation10 + $0x28] sm:$0xff]  }
  0xbc   : > { %2419 = vmatprep.subr.bf16.mxu1 %v2592_v3  ;;  %v3483_v11 = vld [vmem:[%s3457_s7] sm:$0xff]   ;;  %v2600_v13 = vld [vmem:[#allocation10 + $0x68] sm:$0xff]   ;;  %v2601_v14 = vld [vmem:[#allocation10 + $0x30] sm:$0xff]  }
  0xbd   : > { %v3486_v12 = vld [vmem:[%s3464_s18] sm:$0xff]   ;;  %2401 = vmatprep.mubr.bf16.mxu0 %v3483_v11  ;;  %v2602_v15 = vld [vmem:[#allocation10 + $0x70] sm:$0xff]   ;;  %v2603_v16 = vld [vmem:[#allocation10 + $0x38] sm:$0xff]  }
  0xbe   : > { %2388 = vmatpush3.bf16.msra.mxu0 %v2591_v2  ;;  %2433 = vmatprep.mubr.bf16.mxu1 %v3486_v12  ;;  %v2604_v17 = vld [vmem:[#allocation10 + $0x78] sm:$0xff]   ;;  %v3491_v18 = vld [vmem:[%s3457_s7 + $0x8] sm:$0xff]   ;;  %v2609_v20 = vld [vmem:[#allocation10 + $0x80] sm:$0xff]  }
  0xbf   : > { %2420 = vmatpush3.bf16.msra.mxu1 %v2592_v3  ;;  %2389 = vmatprep.subr.bf16.mxu0 %v2593_v4  ;;  %v3494_v19 = vld [vmem:[%s3464_s18 + $0x8] sm:$0xff]   ;;  %v2610_v21 = vld [vmem:[#allocation10 + $0xc0] sm:$0xff]   ;;  %v3497_v22 = vld [vmem:[%s3457_s7 + $0x10] sm:$0xff]  }
  0xc0   : > { %2421 = vmatprep.subr.bf16.mxu1 %v2594_v5  ;;  %v3500_v23 = vld [vmem:[%s3464_s18 + $0x10] sm:$0xff]   ;;  %v2611_v24 = vld [vmem:[#allocation10 + $0x88] sm:$0xff]   ;;  %v3504_v26 = vld [vmem:[%s3457_s7 + $0x18] sm:$0xff]  }
  0xc1   : > { %v2612_v25 = vld [vmem:[#allocation10 + $0xc8] sm:$0xff]   ;;  %v3508_v27 = vld [vmem:[%s3464_s18 + $0x18] sm:$0xff]   ;;  %v2617_v28 = vld [vmem:[#allocation10 + $0x90] sm:$0xff]  }
  0xc2   : > { %2390 = vmatpush3.bf16.msra.mxu0 %v2593_v4  ;;  %v2618_v29 = vld [vmem:[#allocation10 + $0xd0] sm:$0xff]   ;;  %v3513_v30 = vld [vmem:[%s3457_s7 + $0x20] sm:$0xff]   ;;  %v2619_v32 = vld [vmem:[#allocation10 + $0x98] sm:$0xff]  }
  0xc3   : > { %2422 = vmatpush3.bf16.msra.mxu1 %v2594_v5  ;;  %2391 = vmatprep.subr.bf16.mxu0 %v2595_v6  ;;  %v3516_v31 = vld [vmem:[%s3464_s18 + $0x20] sm:$0xff]   ;;  %v2620_v33 = vld [vmem:[#allocation10 + $0xd8] sm:$0xff]   ;;  %v3521_v34 = vld [vmem:[%s3457_s7 + $0x28] sm:$0xff]  }
  0xc4   : > { %2423 = vmatprep.subr.bf16.mxu1 %v2596_v7  ;;  %v3524_v35 = vld [vmem:[%s3464_s18 + $0x28] sm:$0xff]   ;;  %v2625_v36 = vld [vmem:[#allocation10 + $0xa0] sm:$0xff]   ;;  %v3529_v38 = vld [vmem:[%s3457_s7 + $0x30] sm:$0xff]  }
  0xc5   : > { %v2626_v37 = vld [vmem:[#allocation10 + $0xe0] sm:$0xff]   ;;  %v3532_v39 = vld [vmem:[%s3464_s18 + $0x30] sm:$0xff]   ;;  %v2627_v40 = vld [vmem:[#allocation10 + $0xa8] sm:$0xff]  }
  0xc6   : > { %2392 = vmatpush3.bf16.msra.mxu0 %v2595_v6  ;;  %v2628_v41 = vld [vmem:[#allocation10 + $0xe8] sm:$0xff]   ;;  %v3537_v42 = vld [vmem:[%s3457_s7 + $0x38] sm:$0xff]   ;;  %v2633_v44 = vld [vmem:[#allocation10 + $0xb0] sm:$0xff]   ;;  %s2320_s7 = sshll.u32 %s3207_s25, 11  ;;  %s3148_s25 = smov [#allocation11]  }
  0xc7   : > { %2424 = vmatpush3.bf16.msra.mxu1 %v2596_v7  ;;  %2393 = vmatprep.subr.bf16.mxu0 %v2597_v8  ;;  %v3540_v43 = vld [vmem:[%s3464_s18 + $0x38] sm:$0xff]   ;;  %v2634_v45 = vld [vmem:[#allocation10 + $0xf0] sm:$0xff]   ;;  %v3545_v46 = vld [vmem:[%s3470_s20] sm:$0xff]   ;;  %s3065_s8 = sshll.u32 %s3148_s25, 4  ;;  %s3066_s8 = int_to_ptr.vmem [resolvable:$false] %s3065_s8 }
  0xc8   : > { %2425 = vmatprep.subr.bf16.mxu1 %v2598_v9  ;;  %v3548_v47 = vld [vmem:[%s3472_s10] sm:$0xff]   ;;  %v2635_v48 = vld [vmem:[#allocation10 + $0xb8] sm:$0xff]   ;;  %v3553_v50 = vld [vmem:[%s3470_s20 + $0x8] sm:$0xff]   ;;  %s3067_s19 = scalar_lea.vmem %s3066_s8, 4096  ;;  %p3068_p5 = scmp.lt.s32.totalorder %s4392_s28, %s3066_s8 }
  0xc9   : > { %4523 = vst [vmem:[#allocation20_spill] sm:$0xff] %v3548_v47  ;;  %v2636_v49 = vld [vmem:[#allocation10 + $0xf8] sm:$0xff]   ;;  %v3556_v51 = vld [vmem:[%s3472_s10 + $0x8] sm:$0xff]   ;;  %v3559_v52 = vld [vmem:[%s3470_s20 + $0x10] sm:$0xff]  }
  0xca   : > { %2394 = vmatpush3.bf16.msra.mxu0 %v2597_v8  ;;  %4524 = vst [vmem:[#allocation21_spill] sm:$0xff] %v3559_v52  ;;  %v3563_v53 = vld [vmem:[%s3472_s10 + $0x10] sm:$0xff]   ;;  %v3570_v54 = vld [vmem:[%s3470_s20 + $0x18] sm:$0xff]   ;;  %v3577_v56 = vld [vmem:[%s3470_s20 + $0x20] sm:$0xff]  }
  0xcb   : > { %2426 = vmatpush3.bf16.msra.mxu1 %v2598_v9  ;;  %2395 = vmatprep.subr.bf16.mxu0 %v2599_v10  ;;  %4525 = vst [vmem:[#allocation22_spill] sm:$0xff] %v3563_v53  ;;  %4526 = vst [vmem:[#allocation23_spill] sm:$0xff] %v3570_v54  ;;  %v3574_v55 = vld [vmem:[%s3472_s10 + $0x18] sm:$0xff]   ;;  %v3580_v57 = vld [vmem:[%s3472_s10 + $0x20] sm:$0xff]  }
  0xcc   : > { %2427 = vmatprep.subr.bf16.mxu1 %v2600_v13  ;;  %4527 = vst [vmem:[#allocation24_spill] sm:$0xff] %v3574_v55  ;;  %4528 = vst [vmem:[#allocation25_spill] sm:$0xff] %v3577_v56  ;;  %v3586_v58 = vld [vmem:[%s3470_s20 + $0x28] sm:$0xff]   ;;  %v3593_v60 = vld [vmem:[%s3470_s20 + $0x30] sm:$0xff]  }
  0xcd   : > { %4529 = vst [vmem:[#allocation26_spill] sm:$0xff] %v3580_v57  ;;  %4530 = vst [vmem:[#allocation27_spill] sm:$0xff] %v3586_v58  ;;  %v3590_v59 = vld [vmem:[%s3472_s10 + $0x28] sm:$0xff]   ;;  %v1534_v61 = vld [vmem:[%s3472_s10 + $0x30] sm:$0xff]  }
  0xce   : > { %2396 = vmatpush3.bf16.msra.mxu0 %v2599_v10  ;;  %4531 = vst [vmem:[#allocation28_spill] sm:$0xff] %v3590_v59  ;;  %4532 = vst [vmem:[#allocation29_spill] sm:$0xff] %v3593_v60  ;;  %v3600_v62 = vld [vmem:[%s3470_s20 + $0x38] sm:$0xff]  }
  0xcf   : > { %2428 = vmatpush3.bf16.msra.mxu1 %v2600_v13  ;;  %2397 = vmatprep.subr.bf16.mxu0 %v2601_v14  ;;  %4533 = vst [vmem:[#allocation30_spill] sm:$0xff] %v3600_v62  ;;  %v1536_v63 = vld [vmem:[%s3472_s10 + $0x38] sm:$0xff]  }
  0xd0   : > { %2429 = vmatprep.subr.bf16.mxu1 %v2602_v15 }
  0xd2   : > { %2398 = vmatpush3.bf16.msra.mxu0 %v2601_v14 }
  0xd3   : > { %2430 = vmatpush3.bf16.msra.mxu1 %v2602_v15  ;;  %2399 = vmatprep.subr.bf16.mxu0 %v2603_v16 }
  0xd4   : > { %2431 = vmatprep.subr.bf16.mxu1 %v2604_v17 }
  0xd6   : > { %2400 = vmatpush3.bf16.msra.mxu0 %v2603_v16 }
  0xd7   : > { %2432 = vmatpush3.bf16.msra.mxu1 %v2604_v17  ;;  %2449 = vmatprep.subr.bf16.mxu0 %v2609_v20 }
  0xd8   : > { %2481 = vmatprep.subr.bf16.mxu1 %v2610_v21 }
  0xd9   : > { %2402 = vmatmul.mubr.bf16.vlgmr.msra.gmra.mrb[0].mxu0 %v3491_v18 }
  0xda   : > { %2434 = vmatmul.mubr.bf16.vlgmr.msra.gmra.mrb[0].mxu1 %v3494_v19  ;;  %2450 = vmatpush3.bf16.msra.mxu0 %v2609_v20 }
  0xdb   : > { %2482 = vmatpush3.bf16.msra.mxu1 %v2610_v21  ;;  %2451 = vmatprep.subr.bf16.mxu0 %v2611_v24 }
  0xdc   : > { %2483 = vmatprep.subr.bf16.mxu1 %v2612_v25  ;;  %2405 = vmatprep.mubr.bf16.mxu0 %v3497_v22 }
  0xdd   : > { %2437 = vmatprep.mubr.bf16.mxu1 %v3500_v23 }
  0xde   : > { %2452 = vmatpush3.bf16.msra.mxu0 %v2611_v24 }
  0xdf   : > { %2484 = vmatpush3.bf16.msra.mxu1 %v2612_v25  ;;  %2453 = vmatprep.subr.bf16.mxu0 %v2617_v28 }
  0xe0   : > { %2485 = vmatprep.subr.bf16.mxu1 %v2618_v29 }
  0xe1   : > { %2406 = vmatmul.mubr.bf16.gmra.mrb[4].mxu0 %v3504_v26 }
  0xe2   : > { %2438 = vmatmul.mubr.bf16.gmra.mrb[4].mxu1 %v3508_v27  ;;  %2454 = vmatpush3.bf16.msra.mxu0 %v2617_v28 }
  0xe3   : > { %2486 = vmatpush3.bf16.msra.mxu1 %v2618_v29  ;;  %2455 = vmatprep.subr.bf16.mxu0 %v2619_v32 }
  0xe4   : > { %2487 = vmatprep.subr.bf16.mxu1 %v2620_v33  ;;  %2409 = vmatprep.mubr.bf16.mxu0 %v3513_v30 }
  0xe5   : > { %2441 = vmatprep.mubr.bf16.mxu1 %v3516_v31 }
  0xe6   : > { %2456 = vmatpush3.bf16.msra.mxu0 %v2619_v32 }
  0xe7   : > { %2488 = vmatpush3.bf16.msra.mxu1 %v2620_v33  ;;  %2457 = vmatprep.subr.bf16.mxu0 %v2625_v36 }
  0xe8   : > { %2489 = vmatprep.subr.bf16.mxu1 %v2626_v37 }
  0xe9   : > { %2410 = vmatmul.mubr.bf16.gmra.mrb[8].mxu0 %v3521_v34 }
  0xea   : > { %2442 = vmatmul.mubr.bf16.gmra.mrb[8].mxu1 %v3524_v35  ;;  %2458 = vmatpush3.bf16.msra.mxu0 %v2625_v36 }
  0xeb   : > { %2490 = vmatpush3.bf16.msra.mxu1 %v2626_v37  ;;  %2459 = vmatprep.subr.bf16.mxu0 %v2627_v40  ;;  %v3654_v37 = vld [vmem:[%s4442_s5 + $0x1] ss:$0 sm:$0xff] }
  0xec   : > { %2491 = vmatprep.subr.bf16.mxu1 %v2628_v41  ;;  %2413 = vmatprep.mubr.bf16.mxu0 %v3529_v38 }
  0xed   : > { %2445 = vmatprep.mubr.bf16.mxu1 %v3532_v39 }
  0xee   : > { %2460 = vmatpush3.bf16.msra.mxu0 %v2627_v40 }
  0xef   : > { %2492 = vmatpush3.bf16.msra.mxu1 %v2628_v41  ;;  %2461 = vmatprep.subr.bf16.mxu0 %v2633_v44 }
  0xf0   : > { %2493 = vmatprep.subr.bf16.mxu1 %v2634_v45 }
  0xf1   : > { %2414 = vmatmul.mubr.bf16.gmra.mrb[12].mxu0 %v3537_v42 }
  0xf2   : > { %2446 = vmatmul.mubr.bf16.gmra.mrb[12].mxu1 %v3540_v43  ;;  %2462 = vmatpush3.bf16.msra.mxu0 %v2633_v44 }
  0xf3   : > { %2494 = vmatpush3.bf16.msra.mxu1 %v2634_v45  ;;  %2463 = vmatprep.subr.bf16.mxu0 %v2635_v48  ;;  %v3645_v45 = vld [vmem:[%s4442_s5] ss:$0 sm:$0xff] }
  0xf4   : > { %2495 = vmatprep.subr.bf16.mxu1 %v2636_v49  ;;  %2465 = vmatprep.mubr.bf16.mxu0 %v3545_v46 }
  0xf5   : > { %2497 = vmatprep.mubr.bf16.mxu1 %v3548_v47 }
  0xf6   : > { %2464 = vmatpush3.bf16.msra.mxu0 %v2635_v48 }
  0xf7   : > { %2496 = vmatpush3.bf16.msra.mxu1 %v2636_v49 }
  0xf9   : > { %2466 = vmatmul.mubr.bf16.vlgmr.msra.gmra.mrb[16].mxu0 %v3553_v50 }
  0xfa   : > { %2498 = vmatmul.mubr.bf16.vlgmr.msra.gmra.mrb[16].mxu1 %v3556_v51  ;;  %2469 = vmatprep.mubr.bf16.mxu0 %v3559_v52 }
  0xfb   : > { %2501 = vmatprep.mubr.bf16.mxu1 %v3563_v53 }
 0x101   : > { %2470 = vmatmul.mubr.bf16.gmra.mrb[20].mxu0 %v3570_v54 }
 0x102   : > { %2502 = vmatmul.mubr.bf16.gmra.mrb[20].mxu1 %v3574_v55  ;;  %2473 = vmatprep.mubr.bf16.mxu0 %v3577_v56 }
 0x103   : > { %2505 = vmatprep.mubr.bf16.mxu1 %v3580_v57  ;;  %v4537_v57 = vunpack.c.l.bf16 %v3494_v19 }
 0x109   : > { %2474 = vmatmul.mubr.bf16.gmra.mrb[24].mxu0 %v3586_v58 }
 0x10a   : > { %2506 = vmatmul.mubr.bf16.gmra.mrb[24].mxu1 %v3590_v59  ;;  %2477 = vmatprep.mubr.bf16.mxu0 %v3593_v60 }
 0x10b   : > { %2509 = vmatprep.mubr.bf16.mxu1 %v1534_v61 }
 0x111   : > { %2478 = vmatmul.mubr.bf16.gmra.mrb[28].mxu0 %v3600_v62 }
 0x112   : > { %2510 = vmatmul.mubr.bf16.gmra.mrb[28].mxu1 %v1536_v63 }
 0x1ac   : > { %v2403_v48 = vpop.f32.mrb[0].mxu0 }
 0x1ad   : > { %v588_v25 = vadd.f32 %v2403_v48, %v3645_v45  ;;  %v2435_v21 = vpop.f32.mrb[0].mxu1  ;;  %v579_v33 = vpop.f32.mrb[1].mxu0 }
 0x1ae   : > { %v836_v40 = vadd.f32 %v2435_v21, %v3654_v37  ;;  %v580_v36 = vadd.f32 %v3645_v45, %v579_v33  ;;  %v827_v44 = vpop.f32.mrb[1].mxu1  ;;  %v2404_v24 = vpop.f32.mrb[2].mxu0 }
 0x1af   : > { %v828_v63 = vadd.f32 %v3654_v37, %v827_v44  ;;  %v591_v48 = vadd.f32 %v2404_v24, %v3645_v45  ;;  %v2436_v20 = vpop.f32.mrb[2].mxu1  ;;  %v582_v32 = vpop.f32.mrb[3].mxu0 }
 0x1b0   : > { %v3673_v28 = vmax.f32 %v588_v25, %v836_v40  ;;  %v839_v21 = vadd.f32 %v2436_v20, %v3654_v37  ;;  %v583_v33 = vadd.f32 %v3645_v45, %v582_v32  ;;  %v830_v41 = vpop.f32.mrb[3].mxu1 }
 0x1b1   : > { %v3679_v61 = vmax.f32 %v580_v36, %v828_v63  ;;  %v831_v44 = vadd.f32 %v3654_v37, %v830_v41 }
 0x1b2   : > { %v924_v9 = vsub.f32 %v588_v25, %v3673_v28  ;;  %v972_v29 = vsub.f32 %v836_v40, %v3673_v28  ;;  %v3685_v17 = vmax.f32 %v591_v48, %v839_v21 }
 0x1b3   : > { %v922_v32 = vsub.f32 %v580_v36, %v3679_v61  ;;  %v970_v13 = vsub.f32 %v828_v63, %v3679_v61  ;;  %v3690_v15 = vmax.f32 %v583_v33, %v831_v44 }
 0x1b4   : > { %v942_v49 = vmul.f32 1.442695, %v924_v9  ;;  %v990_v10 = vmul.f32 1.442695, %v972_v29  ;;  %v925_v41 = vsub.f32 %v591_v48, %v3685_v17  ;;  %v973_v24 = vsub.f32 %v839_v21, %v3685_v17  ;;  %v2407_v8 = vpop.f32.mrb[4].mxu0 }
 0x1b5   : > { %v938_v25 = vmul.f32 1.442695, %v922_v32  ;;  %v986_v16 = vmul.f32 1.442695, %v970_v13  ;;  %v923_v40 = vsub.f32 %v583_v33, %v3690_v15  ;;  %v971_v14 = vsub.f32 %v831_v44, %v3690_v15  ;;  %v2439_v20 = vpop.f32.mrb[4].mxu1  ;;  %v595_v3 = vpop.f32.mrb[5].mxu0 }
 0x1b6   : > { %2685 = vpow2.f32 %v942_v49  ;;  %v944_v36 = vmul.f32 1.442695, %v925_v41  ;;  %v992_v63 = vmul.f32 1.442695, %v973_v24  ;;  %v604_v1 = vadd.f32 %v2407_v8, %v3645_v45  ;;  %v843_v9 = vpop.f32.mrb[5].mxu1  ;;  %v2408_v29 = vpop.f32.mrb[6].mxu0 }
 0x1b7   : > { %2687 = vpow2.f32 %v990_v10  ;;  %v940_v48 = vmul.f32 1.442695, %v923_v40  ;;  %v988_v7 = vmul.f32 1.442695, %v971_v14  ;;  %v852_v21 = vadd.f32 %v2439_v20, %v3654_v37  ;;  %v2440_v32 = vpop.f32.mrb[6].mxu1  ;;  %v598_v13 = vpop.f32.mrb[7].mxu0 }
 0x1b8   : > { %2689 = vpow2.f32 %v938_v25  ;;  %v596_v33 = vadd.f32 %v3645_v45, %v595_v3  ;;  %v844_v44 = vadd.f32 %v3654_v37, %v843_v9  ;;  %v607_v49 = vadd.f32 %v2408_v29, %v3645_v45  ;;  %v846_v41 = vpop.f32.mrb[7].mxu1 }
 0x1b9   : > { %2691 = vpow2.f32 %v986_v16  ;;  %v3701_v24 = vmax.f32 %v604_v1, %v852_v21  ;;  %v855_v8 = vadd.f32 %v2440_v32, %v3654_v37  ;;  %v599_v10 = vadd.f32 %v3645_v45, %v598_v13 }
 0x1ba   : > { %2693 = vpow2.f32 %v944_v36  ;;  %v3706_v20 = vmax.f32 %v596_v33, %v844_v44  ;;  %v847_v25 = vadd.f32 %v3654_v37, %v846_v41 }
 0x1bb   : > { %2695 = vpow2.f32 %v992_v63  ;;  %v928_v3 = vsub.f32 %v604_v1, %v3701_v24  ;;  %v976_v40 = vsub.f32 %v852_v21, %v3701_v24  ;;  %v3711_v9 = vmax.f32 %v607_v49, %v855_v8 }
 0x1bc   : > { %2697 = vpow2.f32 %v940_v48  ;;  %v926_v16 = vsub.f32 %v596_v33, %v3706_v20  ;;  %v974_v29 = vsub.f32 %v844_v44, %v3706_v20  ;;  %v3715_v32 = vmax.f32 %v599_v10, %v847_v25  ;;  %v2411_v13 = vpop.f32.mrb[8].mxu0 }
 0x1bd   : > { %4534 = vst [vmem:[#allocation31_spill] sm:$0xff] %v3711_v9  ;;  %2699 = vpow2.f32 %v988_v7  ;;  %v950_v36 = vmul.f32 1.442695, %v928_v3  ;;  %v998_v14 = vmul.f32 1.442695, %v976_v40  ;;  %v929_v41 = vsub.f32 %v607_v49, %v3711_v9  ;;  %v2443_v63 = vpop.f32.mrb[8].mxu1 }
 0x1be   : > { %4535 = vst [vmem:[#allocation32_spill] sm:$0xff] %v3715_v32  ;;  %v611_v5 = vpop.f32.mrb[9].mxu0  ;;  %v946_v1 = vmul.f32 1.442695, %v926_v16  ;;  %v994_v2 = vmul.f32 1.442695, %v974_v29  ;;  %v977_v21 = vsub.f32 %v855_v8, %v3711_v9  ;;  %v927_v48 = vsub.f32 %v599_v10, %v3715_v32 }
 0x1bf   : > { %v859_v0 = vpop.f32.mrb[9].mxu1  ;;  %v2412_v33 = vpop.f32.mrb[10].mxu0  ;;  %2701 = vpow2.f32 %v950_v36  ;;  %v952_v44 = vmul.f32 1.442695, %v929_v41  ;;  %v975_v6 = vsub.f32 %v847_v25, %v3715_v32  ;;  %v620_v7 = vadd.f32 %v2411_v13, %v3645_v45 }
 0x1c0   : > { %v2444_v3 = vpop.f32.mrb[10].mxu1  ;;  %v614_v40 = vpop.f32.mrb[11].mxu0  ;;  %2703 = vpow2.f32 %v998_v14  ;;  %v1000_v49 = vmul.f32 1.442695, %v977_v21  ;;  %v948_v60 = vmul.f32 1.442695, %v927_v48  ;;  %v868_v16 = vadd.f32 %v2443_v63, %v3654_v37 }
 0x1c1   : > { %v2686_v4 = vpop.eup %2685  ;;  %v3723_v29 = vpop.f32.mrb[11].mxu1  ;;  %v4536_v10 = vunpack.c.l.bf16 %v3491_v18  ;;  %2705 = vpow2.f32 %v946_v1  ;;  %v996_v36 = vmul.f32 1.442695, %v975_v6  ;;  %v612_v25 = vadd.f32 %v3645_v45, %v611_v5 }
 0x1c2   : > { %v2688_v8 = vpop.eup %2687  ;;  %2707 = vpow2.f32 %v994_v2  ;;  %v3732_v21 = vmax.f32 %v620_v7, %v868_v16  ;;  %v4539_v48 = vunpack.c.l.bf16 %v3483_v11  ;;  %v3738_v6 = vadd.f32 %v2412_v33, %v3645_v45 }
 0x1c3   : > { %v1036_v62 = vmul.f32 %v2686_v4, %v4536_v10  ;;  %v2690_v41 = vpop.eup %2689  ;;  %v3728_v13 = vadd.f32 %v2688_v8, %v2686_v4  ;;  %v1052_v14 = vmul.f32 %v2688_v8, %v4537_v57  ;;  %2709 = vpow2.f32 %v952_v44 }
 0x1c4   : > { %4538 = vst [vmem:[#allocation33_spill] sm:$0xff] %v3732_v21  ;;  %v2692_v63 = vpop.eup %2691  ;;  %v1034_v59 = vmul.f32 %v2690_v41, %v4539_v48  ;;  %v860_v10 = vadd.f32 %v3654_v37, %v859_v0  ;;  %v4540_v57 = vunpack.c.l.bf16 %v3486_v12  ;;  %2711 = vpow2.f32 %v1000_v49  ;;  %v3746_v8 = vpop.f32.mrb[12].mxu0 }
 0x1c5   : > { %v2694_v5 = vpop.eup %2693  ;;  %v3740_v1 = vadd.f32 %v1052_v14, %v1036_v62  ;;  %v3742_v4 = vadd.f32 %v2692_v63, %v2690_v41  ;;  %v4541_v48 = vunpack.c.h.bf16 %v3491_v18  ;;  %2713 = vpow2.f32 %v948_v60  ;;  %v3752_v58 = vpop.f32.mrb[12].mxu1 }
 0x1c6   : > { %v1050_v2 = vmul.f32 %v2692_v63, %v4540_v57  ;;  %v2696_v56 = vpop.eup %2695  ;;  %v932_v0 = vsub.f32 %v620_v7, %v3732_v21  ;;  %v980_v33 = vsub.f32 %v868_v16, %v3732_v21  ;;  %v3754_v62 = vpop.f32.mrb[13].mxu0  ;;  %v4542_v49 = vunpack.c.h.bf16 %v3494_v19 }
 0x1c7   : > { %v1037_v44 = vmul.f32 %v2694_v5, %v4541_v48  ;;  %v2698_v41 = vpop.eup %2697  ;;  %v3758_v63 = vadd.f32 %v2696_v56, %v2694_v5  ;;  %2715 = vpow2.f32 %v996_v36  ;;  %v3762_v18 = vpop.f32.mrb[13].mxu1  ;;  %v4543_v16 = vunpack.c.h.bf16 %v3483_v11 }
 0x1c8   : > { %v3756_v14 = vadd.f32 %v1050_v2, %v1034_v59  ;;  %v1053_v57 = vmul.f32 %v2696_v56, %v4542_v49  ;;  %v3764_v60 = vpop.f32.mrb[14].mxu0  ;;  %v2700_v7 = vpop.eup %2699  ;;  %v958_v53 = vmul.f32 1.442695, %v932_v0  ;;  %v1006_v21 = vmul.f32 1.442695, %v980_v33 }
 0x1c9   : > { %v1035_v48 = vmul.f32 %v2698_v41, %v4543_v16  ;;  %v3768_v55 = vmax.f32 %v612_v25, %v860_v10  ;;  %v3770_v59 = vpop.f32.mrb[14].mxu1  ;;  %v3772_v5 = vpop.f32.mrb[15].mxu0  ;;  %v3776_v19 = vadd.f32 %v2700_v7, %v2698_v41  ;;  %v4545_v56 = vunpack.c.h.bf16 %v3486_v12 }
 0x1ca   : > { %v3774_v2 = vadd.f32 %v1053_v57, %v1037_v44  ;;  %v871_v49 = vadd.f32 %v2444_v3, %v3654_v37  ;;  %v3781_v52 = vpop.f32.mrb[15].mxu1  ;;  %v2702_v11 = vpop.eup %2701  ;;  %2717 = vpow2.f32 %v958_v53  ;;  %v615_v16 = vadd.f32 %v3645_v45, %v614_v40 }
 0x1cb   : > { %4544 = vst [vmem:[#allocation34_spill] sm:$0xff] %v3768_v55  ;;  %v1051_v36 = vmul.f32 %v2700_v7, %v4545_v56  ;;  %v930_v0 = vsub.f32 %v612_v25, %v3768_v55  ;;  %v978_v33 = vsub.f32 %v860_v10, %v3768_v55  ;;  %v2704_v54 = vpop.eup %2703  ;;  %v4546_v41 = vunpack.c.l.bf16 %v3504_v26 }
 0x1cc   : > { %2719 = vpow2.f32 %v1006_v21  ;;  %v3791_v12 = vmax.f32 %v3738_v6, %v871_v49  ;;  %v2706_v3 = vpop.eup %2705  ;;  %v3793_v7 = vadd.f32 %v2704_v54, %v2702_v11  ;;  %v4549_v53 = vunpack.c.l.bf16 %v3508_v27  ;;  %v3804_v32 = vpop.f32.mrb[16].mxu0 }
 0x1cd   : > { %v3786_v44 = vadd.f32 %v1051_v36, %v1035_v48  ;;  %v1040_v57 = vmul.f32 %v2702_v11, %v4546_v41  ;;  %v954_v56 = vmul.f32 1.442695, %v930_v0  ;;  %v1002_v10 = vmul.f32 1.442695, %v978_v33  ;;  %v2708_v55 = vpop.eup %2707 }
 0x1ce   : > { %4547 = vst [vmem:[#allocation35_spill] sm:$0xff] %v3791_v12  ;;  %4548 = vst [vmem:[#allocation36_spill] sm:$0xff] %v3793_v7  ;;  %v1056_v25 = vmul.f32 %v2704_v54, %v4549_v53  ;;  %v4550_v40 = vunpack.c.l.bf16 %v3497_v22  ;;  %v933_v36 = vsub.f32 %v3738_v6, %v3791_v12  ;;  %v981_v21 = vsub.f32 %v871_v49, %v3791_v12  ;;  %v2710_v11 = vpop.eup %2709  ;;  %v3812_v53 = vpop.f32.mrb[17].mxu0 }
 0x1cf   : > { %v863_v41 = vadd.f32 %v3654_v37, %v3723_v29  ;;  %v3808_v54 = vadd.f32 %v2708_v55, %v2706_v3  ;;  %v4553_v0 = vunpack.c.l.bf16 %v3500_v23  ;;  %2721 = vpow2.f32 %v954_v56  ;;  %v2712_v6 = vpop.eup %2711  ;;  %v3818_v9 = vpop.f32.mrb[18].mxu0 }
 0x1d0   : > { %v1038_v48 = vmul.f32 %v2706_v3, %v4550_v40  ;;  %v3806_v7 = vadd.f32 %v1056_v25, %v1040_v57  ;;  %v3814_v40 = vpop.f32.mrb[16].mxu1  ;;  %v4554_v49 = vunpack.c.h.bf16 %v3504_v26  ;;  %2723 = vpow2.f32 %v1002_v10  ;;  %v2714_v3 = vpop.eup %2713 }
 0x1d1   : > { %4552 = vst [vmem:[#allocation38_spill] sm:$0xff] %v3808_v54  ;;  %v1054_v33 = vmul.f32 %v2708_v55, %v4553_v0  ;;  %v960_v29 = vmul.f32 1.442695, %v933_v36  ;;  %v1008_v47 = vmul.f32 1.442695, %v981_v21  ;;  %v3820_v57 = vpop.f32.mrb[17].mxu1  ;;  %v3824_v55 = vadd.f32 %v2712_v6, %v2710_v11  ;;  %v2716_v10 = vpop.eup %2715 }
 0x1d2   : > { %4551 = vst [vmem:[#allocation37_spill] sm:$0xff] %v3806_v7  ;;  %v1041_v12 = vmul.f32 %v2710_v11, %v4554_v49  ;;  %v4557_v56 = vunpack.c.h.bf16 %v3508_v27  ;;  %v3828_v54 = vmax.f32 %v615_v16, %v863_v41  ;;  %v3830_v7 = vpop.f32.mrb[19].mxu0  ;;  %v3832_v26 = vpop.f32.mrb[18].mxu1  ;;  %v4559_v36 = vunpack.c.h.bf16 %v3497_v22 }
 0x1d3   : > { %v3822_v25 = vadd.f32 %v1054_v33, %v1038_v48  ;;  %4556 = vst [vmem:[#allocation40_spill] sm:$0xff] %v3824_v55  ;;  %2725 = vpow2.f32 %v960_v29  ;;  %v636_v48 = vadd.f32 %v3746_v8, %v3645_v45  ;;  %v884_v11 = vadd.f32 %v3752_v58, %v3654_v37  ;;  %v3840_v33 = vpop.f32.mrb[19].mxu1 }
 0x1d4   : > { %v1057_v0 = vmul.f32 %v2712_v6, %v4557_v56  ;;  %4558 = vst [vmem:[#allocation41_spill] sm:$0xff] %v3828_v54  ;;  %v1039_v21 = vmul.f32 %v2714_v3, %v4559_v36  ;;  %v3844_v6 = vadd.f32 %v2716_v10, %v2714_v3  ;;  %v4562_v49 = vunpack.c.h.bf16 %v3500_v23  ;;  %v2718_v58 = vpop.eup %2717 }
 0x1d5   : > { %4555 = vst [vmem:[#allocation39_spill] sm:$0xff] %v3822_v25  ;;  %2727 = vpow2.f32 %v1008_v47  ;;  %v931_v22 = vsub.f32 %v615_v16, %v3828_v54  ;;  %v979_v29 = vsub.f32 %v863_v41, %v3828_v54  ;;  %v3850_v36 = vmax.f32 %v636_v48, %v884_v11 }
 0x1d6   : > { %v3842_v27 = vadd.f32 %v1057_v0, %v1041_v12  ;;  %4561 = vst [vmem:[#allocation43_spill] sm:$0xff] %v3844_v6  ;;  %v1055_v56 = vmul.f32 %v2716_v10, %v4562_v49  ;;  %v628_v8 = vadd.f32 %v3645_v45, %v3754_v62  ;;  %v876_v12 = vadd.f32 %v3654_v37, %v3762_v18  ;;  %v2720_v16 = vpop.eup %2719  ;;  %v3865_v49 = vpop.f32.mrb[20].mxu0 }
 0x1d7   : > { %4563 = vst [vmem:[#allocation44_spill] sm:$0xff] %v3850_v36  ;;  %v639_v23 = vadd.f32 %v3764_v60, %v3645_v45  ;;  %v887_v47 = vadd.f32 %v3770_v59, %v3654_v37  ;;  %v4565_v41 = vunpack.c.l.bf16 %v3521_v34  ;;  %v956_v0 = vmul.f32 1.442695, %v931_v22  ;;  %v3874_v59 = vpop.f32.mrb[21].mxu0 }
 0x1d8   : > { %4560 = vst [vmem:[#allocation42_spill] sm:$0xff] %v3842_v27  ;;  %v3854_v55 = vadd.f32 %v1055_v56, %v1039_v21  ;;  %v1004_v10 = vmul.f32 1.442695, %v979_v29  ;;  %v936_v62 = vsub.f32 %v636_v48, %v3850_v36  ;;  %v3867_v21 = vadd.f32 %v2720_v16, %v2718_v58 }
 0x1d9   : > { %v1044_v3 = vmul.f32 %v2718_v58, %v4565_v41  ;;  %v4567_v18 = vunpack.c.l.bf16 %v3524_v35  ;;  %v984_v60 = vsub.f32 %v884_v11, %v3850_v36  ;;  %v3872_v54 = vmax.f32 %v628_v8, %v876_v12  ;;  %v3884_v58 = vpop.f32.mrb[22].mxu0 }
 0x1da   : > { %4564 = vst [vmem:[#allocation45_spill] sm:$0xff] %v3854_v55  ;;  %4566 = vst [vmem:[#allocation46_spill] sm:$0xff] %v3867_v21  ;;  %v3876_v55 = vpop.f32.mrb[20].mxu1  ;;  %2729 = vpow2.f32 %v956_v0  ;;  %v966_v22 = vmul.f32 1.442695, %v936_v62  ;;  %v3878_v29 = vmax.f32 %v639_v23, %v887_v47  ;;  %v3882_v48 = vadd.f32 %v3645_v45, %v3772_v5  ;;  %v3891_v21 = vpop.f32.mrb[23].mxu0 }
 0x1db   : > { %v1060_v56 = vmul.f32 %v2720_v16, %v4567_v18  ;;  %4568 = vst [vmem:[#allocation47_spill] sm:$0xff] %v3872_v54  ;;  %v3886_v41 = vpop.f32.mrb[21].mxu1  ;;  %v2722_v16 = vpop.eup %2721  ;;  %2731 = vpow2.f32 %v1004_v10  ;;  %v1014_v18 = vmul.f32 1.442695, %v984_v60  ;;  %v934_v36 = vsub.f32 %v628_v8, %v3872_v54 }
 0x1dc   : > { %4569 = vst [vmem:[#allocation48_spill] sm:$0xff] %v3878_v29  ;;  %v3893_v0 = vpop.f32.mrb[22].mxu1  ;;  %v2724_v62 = vpop.eup %2723  ;;  %v4572_v6 = vunpack.c.l.bf16 %v3513_v30  ;;  %2733 = vpow2.f32 %v966_v22  ;;  %v982_v5 = vsub.f32 %v876_v12, %v3872_v54  ;;  %v937_v27 = vsub.f32 %v639_v23, %v3878_v29 }
 0x1dd   : > { %v3888_v11 = vadd.f32 %v1060_v56, %v1044_v3  ;;  %4571 = vst [vmem:[#allocation50_spill] sm:$0xff] %v3893_v0  ;;  %v3902_v3 = vld [vmem:[%s4442_s5 + $0x2] ss:$0 sm:$0xff]  ;;  %v3904_v10 = vpop.f32.mrb[23].mxu1  ;;  %v3906_v8 = vadd.f32 %v2724_v62, %v2722_v16  ;;  %v4575_v56 = vunpack.c.l.bf16 %v3516_v31  ;;  %2735 = vpow2.f32 %v1014_v18  ;;  %v3928_v18 = vpop.f32.mrb[24].mxu0 }
 0x1de   : > { %v1042_v45 = vmul.f32 %v2722_v16, %v4572_v6  ;;  %4573 = vst [vmem:[#allocation51_spill] sm:$0xff] %v3904_v10  ;;  %v2726_v6 = vpop.eup %2725  ;;  %v1010_v22 = vmul.f32 1.442695, %v982_v5  ;;  %v968_v25 = vmul.f32 1.442695, %v937_v27  ;;  %v985_v12 = vsub.f32 %v887_v47, %v3878_v29  ;;  %v3940_v5 = vpop.f32.mrb[24].mxu1 }
 0x1df   : > { %4570 = vst [vmem:[#allocation49_spill] sm:$0xff] %v3888_v11  ;;  %4574 = vst [vmem:[#allocation52_spill] sm:$0xff] %v3906_v8  ;;  %v1058_v60 = vmul.f32 %v2724_v62, %v4575_v56  ;;  %v962_v11 = vmul.f32 1.442695, %v934_v36  ;;  %v879_v23 = vadd.f32 %v3654_v37, %v3781_v52  ;;  %v2728_v54 = vpop.eup %2727  ;;  %v4577_v10 = vunpack.c.h.bf16 %v3521_v34  ;;  %v3922_v36 = vld [vmem:[%s4442_s5 + $0x3] ss:$0 sm:$0xff] }
 0x1e0   : > { %v1260_v62 = vadd.f32 %v3804_v32, %v3902_v3  ;;  %v3924_v27 = vadd.f32 %v2728_v54, %v2726_v6  ;;  %v4579_v47 = vunpack.c.h.bf16 %v3524_v35  ;;  %v1016_v37 = vmul.f32 1.442695, %v985_v12  ;;  %4581 = vst [vmem:[#allocation56_spill] sm:$0xff] %v3940_v5  ;;  %v3952_v56 = vpop.f32.mrb[25].mxu1 }
 0x1e1   : > { %v3913_v0 = vadd.f32 %v1058_v60, %v1042_v45  ;;  %v1045_v16 = vmul.f32 %v2726_v6, %v4577_v10  ;;  %2737 = vpow2.f32 %v962_v11  ;;  %v3931_v34 = vmax.f32 %v3882_v48, %v879_v23  ;;  %v3938_v45 = vpop.f32.mrb[25].mxu0  ;;  %4583 = vst [vmem:[#allocation58_spill] sm:$0xff] %v3952_v56 }
 0x1e2   : > { %4578 = vst [vmem:[#allocation54_spill] sm:$0xff] %v3924_v27  ;;  %v1061_v52 = vmul.f32 %v2728_v54, %v4579_v47  ;;  %2739 = vpow2.f32 %v1010_v22  ;;  %v3934_v32 = vmax.f32 %v3673_v28, %v1260_v62  ;;  %v1252_v11 = vadd.f32 %v3902_v3, %v3812_v53  ;;  %v3950_v10 = vpop.f32.mrb[26].mxu0 }
 0x1e3   : > { %4576 = vst [vmem:[#allocation53_spill] sm:$0xff] %v3913_v0  ;;  %2741 = vpow2.f32 %v968_v25  ;;  %4580 = vst [vmem:[#allocation55_spill] sm:$0xff] %v3931_v34  ;;  %v1263_v54 = vadd.f32 %v3818_v9, %v3902_v3  ;;  %v3948_v25 = vadd.f32 %v3814_v40, %v3922_v36  ;;  %v935_v53 = vsub.f32 %v3882_v48, %v3931_v34  ;;  %v3960_v12 = vpop.f32.mrb[27].mxu0  ;;  %v3962_v9 = vpop.f32.mrb[26].mxu1 }
 0x1e4   : > { %v3942_v35 = vadd.f32 %v1061_v52, %v1045_v16  ;;  %2743 = vpow2.f32 %v1016_v37  ;;  %v983_v60 = vsub.f32 %v879_v23, %v3931_v34  ;;  %v1348_v6 = vsub.f32 %v3673_v28, %v3934_v32  ;;  %4584 = vst [vmem:[#allocation59_spill] sm:$0xff] %v3960_v12  ;;  %4585 = vst [vmem:[#allocation60_spill] sm:$0xff] %v3962_v9  ;;  %v2730_v40 = vpop.eup %2729  ;;  %v3976_v28 = vpop.f32.mrb[27].mxu1 }
 0x1e5   : > { %v1396_v22 = vsub.f32 %v1260_v62, %v3934_v32  ;;  %v3965_v16 = vmax.f32 %v3679_v61, %v1252_v11  ;;  %v3968_v47 = vmax.f32 %v3685_v17, %v1263_v54  ;;  %v1772_v48 = vmax.f32 %v3934_v32, %v3948_v25  ;;  %4586 = vst [vmem:[#allocation61_spill] sm:$0xff] %v3976_v28  ;;  %v2732_v62 = vpop.eup %2731 }
 0x1e6   : > { %4582 = vst [vmem:[#allocation57_spill] sm:$0xff] %v3942_v35  ;;  %v3974_v23 = vadd.f32 %v3902_v3, %v3830_v7  ;;  %v4587_v52 = vunpack.c.h.bf16 %v3513_v30  ;;  %v964_v34 = vmul.f32 1.442695, %v935_v53  ;;  %v1012_v29 = vmul.f32 1.442695, %v983_v60  ;;  %v2734_v27 = vpop.eup %2733 }
 0x1e7   : > { %v1366_v35 = vmul.f32 1.442695, %v1348_v6  ;;  %v3980_v0 = vadd.f32 %v2732_v62, %v2730_v40  ;;  %v4588_v8 = vunpack.c.h.bf16 %v3516_v31  ;;  %v1414_v56 = vmul.f32 1.442695, %v1396_v22  ;;  %v2736_v12 = vpop.eup %2735  ;;  %v3997_v22 = vpop.f32.mrb[28].mxu0 }
 0x1e8   : > { %v1043_v37 = vmul.f32 %v2730_v40, %v4587_v52  ;;  %v1346_v7 = vsub.f32 %v3679_v61, %v3965_v16  ;;  %v4589_v28 = vunpack.c.l.bf16 %v3537_v42  ;;  %2745 = vpow2.f32 %v964_v34  ;;  %v4004_v52 = vpop.f32.mrb[29].mxu0 }
 0x1e9   : > { %v1059_v9 = vmul.f32 %v2732_v62, %v4588_v8  ;;  %v1394_v30 = vsub.f32 %v1252_v11, %v3965_v16  ;;  %v1349_v53 = vsub.f32 %v3685_v17, %v3968_v47  ;;  %v3993_v6 = vadd.f32 %v2736_v12, %v2734_v27 }
 0x1ea   : > { %v1048_v5 = vmul.f32 %v2734_v27, %v4589_v28  ;;  %v4590_v31 = vunpack.c.l.bf16 %v3540_v43  ;;  %2747 = vpow2.f32 %v1012_v29  ;;  %v1362_v40 = vmul.f32 1.442695, %v1346_v7 }
 0x1eb   : > { %v3991_v60 = vadd.f32 %v1059_v9, %v1043_v37  ;;  %v2738_v61 = vpop.eup %2737  ;;  %2749 = vpow2.f32 %v1366_v35  ;;  %v1410_v28 = vmul.f32 1.442695, %v1394_v30  ;;  %v1368_v34 = vmul.f32 1.442695, %v1349_v53  ;;  %v4013_v30 = vpop.f32.mrb[30].mxu0 }
 0x1ec   : > { %v1064_v8 = vmul.f32 %v2736_v12, %v4590_v31  ;;  %v2740_v62 = vpop.eup %2739  ;;  %v4592_v17 = vunpack.c.l.bf16 %v3529_v38  ;;  %2751 = vpow2.f32 %v1414_v56  ;;  %v1397_v27 = vsub.f32 %v1263_v54, %v3968_v47  ;;  %v4006_v12 = vpop.f32.mrb[28].mxu1 }
 0x1ed   : > { %v2742_v29 = vpop.eup %2741  ;;  %v4008_v37 = vadd.f32 %v2740_v62, %v2738_v61  ;;  %v4594_v35 = vunpack.c.l.bf16 %v3532_v39  ;;  %2753 = vpow2.f32 %v1362_v40  ;;  %v4015_v53 = vpop.f32.mrb[29].mxu1  ;;  %v4595_v54 = vunpack.c.h.bf16 %v3537_v42 }
 0x1ee   : > { %v3999_v11 = vadd.f32 %v1064_v8, %v1048_v5  ;;  %v1046_v9 = vmul.f32 %v2738_v61, %v4592_v17  ;;  %v1788_v5 = vsub.f32 %v3934_v32, %v1772_v48  ;;  %v2744_v56 = vpop.eup %2743  ;;  %2755 = vpow2.f32 %v1410_v28  ;;  %v4020_v61 = vpop.f32.mrb[31].mxu0 }
 0x1ef   : > { %4593 = vst [vmem:[#allocation63_spill] sm:$0xff] %v4008_v37  ;;  %v1062_v7 = vmul.f32 %v2740_v62, %v4594_v35  ;;  %v1049_v31 = vmul.f32 %v2742_v29, %v4595_v54  ;;  %v1416_v8 = vmul.f32 1.442695, %v1397_v27  ;;  %v1836_v17 = vsub.f32 %v3948_v25, %v1772_v48  ;;  %v4022_v37 = vpop.f32.mrb[30].mxu1 }
 0x1f0   : > { %4591 = vst [vmem:[#allocation62_spill] sm:$0xff] %v3999_v11  ;;  %v4026_v40 = vadd.f32 %v2744_v56, %v2742_v29  ;;  %v4597_v32 = vunpack.c.h.bf16 %v3540_v43  ;;  %2757 = vpow2.f32 %v1368_v34  ;;  %v4030_v11 = vpop.f32.mrb[31].mxu1  ;;  %v1806_v42 = vmul.f32 1.442695, %v1788_v5 }
 0x1f1   : > { %v4024_v62 = vadd.f32 %v1062_v7, %v1046_v9  ;;  %2759 = vpow2.f32 %v1416_v8  ;;  %v1854_v28 = vmul.f32 1.442695, %v1836_v17  ;;  %v4034_v25 = vmax.f32 %v3690_v15, %v3974_v23 }
 0x1f2   : > { %4596 = vst [vmem:[#allocation64_spill] sm:$0xff] %v4026_v40  ;;  %v1065_v35 = vmul.f32 %v2744_v56, %v4597_v32  ;;  %v1692_v9 = vadd.f32 %v3922_v36, %v3820_v57  ;;  %v1703_v27 = vadd.f32 %v3832_v26, %v3922_v36  ;;  %v1695_v43 = vadd.f32 %v3922_v36, %v3840_v33  ;;  %v2746_v5 = vpop.eup %2745 }
 0x1f3   : > { %2761 = vpow2.f32 %v1806_v42  ;;  %v1347_v34 = vsub.f32 %v3690_v15, %v4034_v25  ;;  %v1395_v29 = vsub.f32 %v3974_v23, %v4034_v25  ;;  %v4050_v7 = vadd.f32 %v3865_v49, %v3902_v3 }
 0x1f4   : > { %v4036_v48 = vadd.f32 %v1065_v35, %v1049_v31  ;;  %2763 = vpow2.f32 %v1854_v28  ;;  %v1770_v57 = vmax.f32 %v3965_v16, %v1692_v9  ;;  %v1773_v26 = vmax.f32 %v3968_v47, %v1703_v27  ;;  %v2748_v33 = vpop.eup %2747 }
 0x1f5   : > { %v1771_v56 = vmax.f32 %v4034_v25, %v1695_v43  ;;  %v4599_v54 = vunpack.c.h.bf16 %v3529_v38  ;;  %v1364_v15 = vmul.f32 1.442695, %v1347_v34  ;;  %v1412_v8 = vmul.f32 1.442695, %v1395_v29  ;;  %v2750_v49 = vpop.eup %2749 }
 0x1f6   : > { %4598 = vst [vmem:[#allocation65_spill] sm:$0xff] %v4036_v48  ;;  %v4059_v23 = vmax.f32 %v3701_v24, %v4050_v7  ;;  %v4061_v17 = vadd.f32 %v2748_v33, %v2746_v5  ;;  %v4601_v32 = vunpack.c.h.bf16 %v3532_v39  ;;  %v1786_v42 = vsub.f32 %v3965_v16, %v1770_v57  ;;  %v2752_v48 = vpop.eup %2751 }
 0x1f7   : > { %v1047_v31 = vmul.f32 %v2746_v5, %v4599_v54  ;;  %v1834_v28 = vsub.f32 %v1692_v9, %v1770_v57  ;;  %v1444_v40 = vmul.f32 %v2750_v49, %v3728_v13  ;;  %v1476_v38 = vmul.f32 %v2750_v49, %v3740_v1  ;;  %v2754_v29 = vpop.eup %2753 }
 0x1f8   : > { %4600 = vst [vmem:[#allocation66_spill] sm:$0xff] %v4061_v17  ;;  %v1063_v35 = vmul.f32 %v2748_v33, %v4601_v32  ;;  %2765 = vpow2.f32 %v1364_v15  ;;  %v1789_v34 = vsub.f32 %v3968_v47, %v1773_v26  ;;  %v4602_v5 = vunpack.c.l.bf16 %v3553_v50  ;;  %v2756_v33 = vpop.eup %2755 }
 0x1f9   : > { %2767 = vpow2.f32 %v1412_v8  ;;  %v1802_v39 = vmul.f32 1.442695, %v1786_v42  ;;  %v1460_v32 = vadd.f32 %v2752_v48, %v1444_v40  ;;  %v1442_v16 = vmul.f32 %v2754_v29, %v3742_v4 }
 0x1fa   : > { %v4069_v54 = vadd.f32 %v1063_v35, %v1047_v31  ;;  %v1492_v17 = vmul.f32 %v2752_v48, %v4602_v5  ;;  %v1474_v9 = vmul.f32 %v2754_v29, %v3756_v14  ;;  %v1850_v13 = vmul.f32 1.442695, %v1834_v28  ;;  %v2758_v57 = vpop.eup %2757 }
 0x1fb   : > { %v4603_v15 = vunpack.c.l.bf16 %v3545_v46  ;;  %2769 = vpow2.f32 %v1802_v39  ;;  %v1808_v31 = vmul.f32 1.442695, %v1789_v34  ;;  %v2760_v49 = vpop.eup %2759  ;;  %v1458_v35 = vadd.f32 %v2756_v33, %v1442_v16 }
 0x1fc   : > { %v1508_v1 = vadd.f32 %v1492_v17, %v1476_v38  ;;  %v1445_v5 = vmul.f32 %v2758_v57, %v3758_v63  ;;  %v1477_v8 = vmul.f32 %v2758_v57, %v3774_v2  ;;  %2771 = vpow2.f32 %v1850_v13 }
 0x1fd   : > { %v1490_v47 = vmul.f32 %v2756_v33, %v4603_v15  ;;  %v4604_v4 = vunpack.c.h.bf16 %v3553_v50  ;;  %2773 = vpow2.f32 %v1808_v31  ;;  %v1837_v14 = vsub.f32 %v1703_v27, %v1773_v26  ;;  %v2762_v42 = vpop.eup %2761 }
 0x1fe   : > { %v1461_v17 = vadd.f32 %v2760_v49, %v1445_v5  ;;  %v1787_v28 = vsub.f32 %v4034_v25, %v1771_v56  ;;  %v1835_v38 = vsub.f32 %v1695_v43, %v1771_v56  ;;  %v1352_v34 = vsub.f32 %v3701_v24, %v4059_v23  ;;  %v2764_v29 = vpop.eup %2763  ;;  %v4607_v5 = vld [vmem:[#allocation31_spill] sm:$0xff] }
 0x1ff   : > { %v1506_v40 = vadd.f32 %v1490_v47, %v1474_v9  ;;  %v1493_v48 = vmul.f32 %v2760_v49, %v4604_v4  ;;  %v1884_v63 = vmul.f32 %v2762_v42, %v1460_v32  ;;  %v1916_v33 = vmul.f32 %v2762_v42, %v1508_v1 }
 0x200   : > { %v1856_v2 = vmul.f32 1.442695, %v1837_v14  ;;  %v4605_v16 = vunpack.c.l.bf16 %v3556_v51  ;;  %v1804_v50 = vmul.f32 1.442695, %v1787_v28  ;;  %v1852_v13 = vmul.f32 1.442695, %v1835_v38 }
 0x201   : > { %v1509_v39 = vadd.f32 %v1493_v48, %v1477_v8  ;;  %v1374_v57 = vmul.f32 1.442695, %v1352_v34  ;;  %v1900_v27 = vadd.f32 %v2764_v29, %v1884_v63  ;;  %v1400_v25 = vsub.f32 %v4050_v7, %v4059_v23  ;;  %v4608_v28 = vld [vmem:[#allocation20_spill] sm:$0xff] }
 0x202   : > { %v1932_v9 = vmul.f32 %v2764_v29, %v4605_v16  ;;  %2775 = vpow2.f32 %v1856_v2  ;;  %v1268_v43 = vadd.f32 %v3902_v3, %v3874_v59  ;;  %v2766_v24 = vpop.eup %2765  ;;  %v1279_v56 = vadd.f32 %v3884_v58, %v3902_v3 }
 0x203   : > { %2777 = vpow2.f32 %v1804_v50  ;;  %v1716_v32 = vadd.f32 %v3876_v55, %v3922_v36  ;;  %v2768_v1 = vpop.eup %2767  ;;  %v1443_v15 = vmul.f32 %v2766_v24, %v3776_v19  ;;  %v1475_v47 = vmul.f32 %v2766_v24, %v3786_v44 }
 0x204   : > { %v4090_v26 = vadd.f32 %v1932_v9, %v1916_v33  ;;  %2779 = vrcp.f32 %v1900_v27  ;;  %v1422_v7 = vmul.f32 1.442695, %v1400_v25  ;;  %v4606_v31 = vunpack.c.h.bf16 %v3545_v46 }
 0x205   : > { %2781 = vpow2.f32 %v1852_v13  ;;  %v4101_v49 = vmax.f32 %v3706_v20, %v1268_v43  ;;  %v4104_v8 = vmax.f32 %v4607_v5, %v1279_v56  ;;  %v2770_v58 = vpop.eup %2769  ;;  %v1459_v4 = vadd.f32 %v2768_v1, %v1443_v15 }
 0x206   : > { %v1491_v59 = vmul.f32 %v2768_v1, %v4606_v31  ;;  %2783 = vpow2.f32 %v1374_v57  ;;  %v1776_v55 = vmax.f32 %v4059_v23, %v1716_v32  ;;  %v1271_v19 = vadd.f32 %v3902_v3, %v3891_v21  ;;  %v2772_v44 = vpop.eup %2771 }
 0x207   : > { %v1882_v14 = vmul.f32 %v2770_v58, %v1458_v35  ;;  %v1914_v46 = vmul.f32 %v2770_v58, %v1506_v40  ;;  %2785 = vpow2.f32 %v1422_v7  ;;  %v2774_v42 = vpop.eup %2773  ;;  %v4609_v38 = vunpack.c.l.bf16 %v4608_v28 }
 0x208   : > { %v1507_v48 = vadd.f32 %v1491_v59, %v1475_v47  ;;  %v1350_v29 = vsub.f32 %v3706_v20, %v4101_v49  ;;  %v1398_v63 = vsub.f32 %v1268_v43, %v4101_v49  ;;  %v1353_v33 = vsub.f32 %v4607_v5, %v4104_v8  ;;  %v4610_v43 = vld [vmem:[#allocation32_spill] sm:$0xff] }
 0x209   : > { %v1930_v34 = vmul.f32 %v2772_v44, %v4609_v38  ;;  %v1898_v2 = vadd.f32 %v2772_v44, %v1882_v14  ;;  %v1885_v16 = vmul.f32 %v2774_v42, %v1461_v17  ;;  %v1917_v21 = vmul.f32 %v2774_v42, %v1509_v39  ;;  %v4611_v39 = vld [vmem:[#allocation50_spill] sm:$0xff] }
 0x20a   : > { %v1401_v9 = vsub.f32 %v1279_v56, %v4104_v8  ;;  %v1370_v40 = vmul.f32 1.442695, %v1350_v29  ;;  %v1418_v50 = vmul.f32 1.442695, %v1398_v63  ;;  %v1376_v13 = vmul.f32 1.442695, %v1353_v33 }
 0x20b   : > { %v4117_v35 = vadd.f32 %v1930_v34, %v1914_v46  ;;  %2787 = vrcp.f32 %v1898_v2  ;;  %v1792_v25 = vsub.f32 %v4059_v23, %v1776_v55  ;;  %v1840_v20 = vsub.f32 %v1716_v32, %v1776_v55  ;;  %v4615_v63 = vld [vmem:[#allocation37_spill] sm:$0xff] }
 0x20c   : > { %v1424_v57 = vmul.f32 1.442695, %v1401_v9  ;;  %v2776_v24 = vpop.eup %2775  ;;  %2789 = vpow2.f32 %v1370_v40  ;;  %v4121_v1 = vmax.f32 %v4610_v43, %v1271_v19  ;;  %v1708_v17 = vadd.f32 %v3922_v36, %v3886_v41 }
 0x20d   : > { %v4127_v56 = vadd.f32 %v4611_v39, %v3922_v36  ;;  %v2778_v15 = vpop.eup %2777  ;;  %v4129_v47 = vadd.f32 %v2776_v24, %v1885_v16  ;;  %v4612_v7 = vunpack.c.h.bf16 %v3556_v51  ;;  %2791 = vpow2.f32 %v1418_v50  ;;  %v4618_v39 = vld [vmem:[#allocation51_spill] sm:$0xff] }
 0x20e   : > { %v1814_v23 = vmul.f32 1.442695, %v1792_v25  ;;  %v2780_v32 = vpop.eup %2779  ;;  %v1883_v59 = vmul.f32 %v2778_v15, %v1459_v4  ;;  %v1915_v5 = vmul.f32 %v2778_v15, %v1507_v48  ;;  %2793 = vpow2.f32 %v1376_v13 }
 0x20f   : > { %v1933_v31 = vmul.f32 %v2776_v24, %v4612_v7  ;;  %v1862_v58 = vmul.f32 1.442695, %v1840_v20  ;;  %v2782_v55 = vpop.eup %2781  ;;  %v1980_v41 = vmul.f32 %v2780_v32, %v1900_v27  ;;  %2795 = vrcp.f32 %v4129_v47  ;;  %v4614_v27 = vld [vmem:[#allocation36_spill] sm:$0xff] }
 0x210   : > { %v1351_v14 = vsub.f32 %v4610_v43, %v4121_v1  ;;  %v2784_v46 = vpop.eup %2783  ;;  %v4138_v51 = vadd.f32 %v2782_v55, %v1883_v59  ;;  %v4613_v42 = vunpack.c.h.bf16 %v4608_v28  ;;  %2797 = vpow2.f32 %v1424_v57 }
 0x211   : > { %v4133_v44 = vadd.f32 %v1933_v31, %v1917_v21  ;;  %v1399_v4 = vsub.f32 %v1271_v19, %v4121_v1  ;;  %v2786_v48 = vpop.eup %2785  ;;  %v1996_v34 = vsub.f32 2.0, %v1980_v41  ;;  %v1448_v29 = vmul.f32 %v2784_v46, %v4614_v27  ;;  %v4616_v21 = vld [vmem:[#allocation23_spill] sm:$0xff]  ;;  %v4623_v27 = vld [vmem:[#allocation40_spill] sm:$0xff] }
 0x212   : > { %v1931_v38 = vmul.f32 %v2782_v55, %v4613_v42  ;;  %v1480_v33 = vmul.f32 %v2784_v46, %v4615_v63  ;;  %2799 = vpow2.f32 %v1814_v23  ;;  %v4617_v9 = vunpack.c.l.bf16 %v4616_v21  ;;  %v4620_v41 = vld [vmem:[#allocation39_spill] sm:$0xff]  ;;  %v4624_v63 = vld [vmem:[#allocation42_spill] sm:$0xff] }
 0x213   : > { %2801 = vrcp.f32 %v4138_v51  ;;  %v1372_v28 = vmul.f32 1.442695, %v1351_v14  ;;  %v2012_v50 = vmul.f32 %v2780_v32, %v1996_v34  ;;  %v1464_v13 = vadd.f32 %v2786_v48, %v1448_v29 }
 0x214   : > { %v4146_v16 = vadd.f32 %v1931_v38, %v1915_v5  ;;  %v1496_v40 = vmul.f32 %v2786_v48, %v4617_v9  ;;  %2803 = vpow2.f32 %v1862_v58  ;;  %v1420_v19 = vmul.f32 1.442695, %v1399_v4 }
 0x215   : > { %2805 = vpow2.f32 %v1372_v28  ;;  %v1774_v25 = vmax.f32 %v4101_v49, %v1708_v17  ;;  %v1777_v20 = vmax.f32 %v4104_v8, %v4127_v56  ;;  %v2788_v24 = vpop.eup %2787  ;;  %v2028_v43 = vmul.f32 %v2012_v50, %v4090_v26  ;;  %v4619_v26 = vld [vmem:[#allocation38_spill] sm:$0xff] }
 0x216   : > { %v1512_v57 = vadd.f32 %v1496_v40, %v1480_v33  ;;  %2807 = vpow2.f32 %v1420_v19  ;;  %v4157_v15 = vadd.f32 %v3922_v36, %v4618_v39  ;;  %v4161_v7 = vadd.f32 %v3928_v18, %v3902_v3  ;;  %v2790_v31 = vpop.eup %2789 }
 0x217   : > { %v1978_v23 = vmul.f32 %v2788_v24, %v1898_v2  ;;  %v1790_v32 = vsub.f32 %v4101_v49, %v1774_v25  ;;  %v1838_v59 = vsub.f32 %v1708_v17, %v1774_v25  ;;  %v1793_v5 = vsub.f32 %v4104_v8, %v1777_v20  ;;  %v2792_v58 = vpop.eup %2791  ;;  %2044 = vst [vmem:[%s4165_s4 + $0x10] sm:$0xff] %v2028_v43  ;;  %v4621_v49 = vld [vmem:[#allocation21_spill] sm:$0xff] }
 0x218   : > { %v1446_v55 = vmul.f32 %v2790_v31, %v4619_v26  ;;  %v1478_v14 = vmul.f32 %v2790_v31, %v4620_v41  ;;  %v1841_v46 = vsub.f32 %v4127_v56, %v1777_v20  ;;  %v1775_v18 = vmax.f32 %v4121_v1, %v4157_v15  ;;  %v2794_v2 = vpop.eup %2793 }
 0x219   : > { %v1994_v42 = vsub.f32 2.0, %v1978_v23  ;;  %v4622_v17 = vunpack.c.l.bf16 %v4621_v49  ;;  %v1810_v8 = vmul.f32 1.442695, %v1790_v32  ;;  %v1858_v4 = vmul.f32 1.442695, %v1838_v59  ;;  %v2796_v48 = vpop.eup %2795 }
 0x21a   : > { %v1462_v34 = vadd.f32 %v2792_v58, %v1446_v55  ;;  %v1449_v29 = vmul.f32 %v2794_v2, %v4623_v27  ;;  %v1481_v33 = vmul.f32 %v2794_v2, %v4624_v63  ;;  %v1816_v9 = vmul.f32 1.442695, %v1793_v5  ;;  %v2798_v40 = vpop.eup %2797 }
 0x21b   : > { %v1494_v38 = vmul.f32 %v2792_v58, %v4622_v17  ;;  %v2010_v28 = vmul.f32 %v2788_v24, %v1994_v42  ;;  %v1981_v56 = vmul.f32 %v2796_v48, %v4129_v47  ;;  %2809 = vpow2.f32 %v1810_v8  ;;  %v4629_v17 = vld [vmem:[#allocation45_spill] sm:$0xff] }
 0x21c   : > { %v2800_v19 = vpop.eup %2799  ;;  %v4178_v25 = vadd.f32 %v2798_v40, %v1449_v29  ;;  %v4625_v20 = vunpack.c.h.bf16 %v4616_v21  ;;  %2811 = vpow2.f32 %v1858_v4  ;;  %v1864_v39 = vmul.f32 1.442695, %v1841_v46 }
 0x21d   : > { %v1510_v50 = vadd.f32 %v1494_v38, %v1478_v14  ;;  %v2802_v31 = vpop.eup %2801  ;;  %v2026_v23 = vmul.f32 %v2010_v28, %v4117_v35  ;;  %v1997_v32 = vsub.f32 2.0, %v1981_v56  ;;  %v1888_v59 = vmul.f32 %v2800_v19, %v1464_v13  ;;  %v4626_v14 = vld [vmem:[#allocation24_spill] sm:$0xff]  ;;  %v4628_v13 = vld [vmem:[#allocation43_spill] sm:$0xff] }
 0x21e   : > { %v1497_v43 = vmul.f32 %v2798_v40, %v4625_v20  ;;  %v1920_v5 = vmul.f32 %v2800_v19, %v1512_v57  ;;  %v2804_v24 = vpop.eup %2803  ;;  %v1979_v47 = vmul.f32 %v2802_v31, %v4138_v51  ;;  %2813 = vpow2.f32 %v1816_v9  ;;  %v4631_v9 = vld [vmem:[#allocation33_spill] sm:$0xff]  ;;  %v4632_v19 = vld [vmem:[#allocation56_spill] sm:$0xff] }
 0x21f   : > { %v1791_v26 = vsub.f32 %v4121_v1, %v1775_v18  ;;  %v2806_v55 = vpop.eup %2805  ;;  %2042 = vst [vmem:[%s4165_s4] sm:$0xff] %v2026_v23  ;;  %v2013_v41 = vmul.f32 %v2796_v48, %v1997_v32  ;;  %v1904_v21 = vadd.f32 %v2804_v24, %v1888_v59  ;;  %v4627_v2 = vunpack.c.l.bf16 %v4626_v14  ;;  %v4634_v23 = vld [vmem:[#allocation34_spill] sm:$0xff]  ;;  %v4635_v32 = vld [vmem:[#allocation35_spill] sm:$0xff] }
 0x220   : > { %v1513_v58 = vadd.f32 %v1497_v43, %v1481_v33  ;;  %2815 = vpow2.f32 %v1864_v39  ;;  %v2808_v35 = vpop.eup %2807  ;;  %v1995_v42 = vsub.f32 2.0, %v1979_v47  ;;  %v1447_v57 = vmul.f32 %v2806_v55, %v4628_v13  ;;  %v4633_v43 = vld [vmem:[#allocation59_spill] sm:$0xff]  ;;  %v4636_v47 = vld [vmem:[#allocation22_spill] sm:$0xff] }
 0x221   : > { %v1936_v46 = vmul.f32 %v2804_v24, %v4627_v2  ;;  %v1479_v38 = vmul.f32 %v2806_v55, %v4629_v17  ;;  %v1812_v51 = vmul.f32 1.442695, %v1791_v26  ;;  %v2029_v8 = vmul.f32 %v2013_v41, %v4133_v44 }
 0x222   : > { %2817 = vrcp.f32 %v1904_v21  ;;  %v4630_v1 = vunpack.c.h.bf16 %v4621_v49  ;;  %v2011_v27 = vmul.f32 %v2802_v31, %v1995_v42  ;;  %v1463_v29 = vadd.f32 %v2808_v35, %v1447_v57 }
 0x223   : > { %v4191_v4 = vadd.f32 %v1936_v46, %v1920_v5  ;;  %2819 = vpow2.f32 %v1812_v51  ;;  %v1839_v63 = vsub.f32 %v4157_v15, %v1775_v18  ;;  %2045 = vst [vmem:[%s4165_s4 + $0x18] sm:$0xff] %v2029_v8  ;;  %v1340_v40 = vmax.f32 %v4631_v9, %v4161_v7 }
 0x224   : > { %v1495_v48 = vmul.f32 %v2808_v35, %v4630_v1  ;;  %v1284_v44 = vadd.f32 %v3902_v3, %v3938_v45  ;;  %v1295_v28 = vadd.f32 %v3950_v10, %v3902_v3  ;;  %v2027_v49 = vmul.f32 %v2011_v27, %v4146_v16 }
 0x225   : > { %v1860_v56 = vmul.f32 1.442695, %v1839_v63  ;;  %v1732_v20 = vadd.f32 %v4632_v19, %v3922_v36  ;;  %v4208_v15 = vadd.f32 %v3902_v3, %v4633_v43  ;;  %v2810_v18 = vpop.eup %2809  ;;  %v1356_v39 = vsub.f32 %v4631_v9, %v1340_v40 }
 0x226   : > { %v1511_v33 = vadd.f32 %v1495_v48, %v1479_v38  ;;  %v1404_v31 = vsub.f32 %v4161_v7, %v1340_v40  ;;  %v4213_v45 = vmax.f32 %v4634_v23, %v1284_v44  ;;  %v4216_v10 = vmax.f32 %v4635_v32, %v1295_v28  ;;  %v2812_v16 = vpop.eup %2811  ;;  %2043 = vst [vmem:[%s4165_s4 + $0x8] sm:$0xff] %v2027_v49 }
 0x227   : > { %v1886_v59 = vmul.f32 %v2810_v18, %v1462_v34  ;;  %v1918_v5 = vmul.f32 %v2810_v18, %v1510_v50  ;;  %2821 = vpow2.f32 %v1860_v56  ;;  %v1780_v24 = vmax.f32 %v1340_v40, %v1732_v20 }
 0x228   : > { %v4637_v26 = vunpack.c.l.bf16 %v4636_v47  ;;  %v1382_v41 = vmul.f32 1.442695, %v1356_v39  ;;  %v1430_v2 = vmul.f32 1.442695, %v1404_v31  ;;  %v1354_v7 = vsub.f32 %v4634_v23, %v4213_v45  ;;  %v2814_v46 = vpop.eup %2813  ;;  %v4639_v39 = vld [vmem:[#allocation41_spill] sm:$0xff] }
 0x229   : > { %v1902_v35 = vadd.f32 %v2812_v16, %v1886_v59  ;;  %v1402_v42 = vsub.f32 %v1284_v44, %v4213_v45  ;;  %v1357_v13 = vsub.f32 %v4635_v32, %v4216_v10  ;;  %v1405_v34 = vsub.f32 %v1295_v28, %v4216_v10  ;;  %v4640_v32 = vld [vmem:[#allocation58_spill] sm:$0xff] }
 0x22a   : > { %v1934_v55 = vmul.f32 %v2812_v16, %v4637_v26  ;;  %v2816_v50 = vpop.eup %2815  ;;  %v1889_v17 = vmul.f32 %v2814_v46, %v4178_v25  ;;  %v1921_v38 = vmul.f32 %v2814_v46, %v1513_v58  ;;  %2823 = vpow2.f32 %v1382_v41  ;;  %v4641_v16 = vld [vmem:[#allocation60_spill] sm:$0xff] }
 0x22b   : > { %2825 = vrcp.f32 %v1902_v35  ;;  %v4638_v51 = vunpack.c.h.bf16 %v4626_v14  ;;  %v1378_v1 = vmul.f32 1.442695, %v1354_v7  ;;  %v1426_v48 = vmul.f32 1.442695, %v1402_v42 }
 0x22c   : > { %v4227_v57 = vadd.f32 %v1934_v55, %v1918_v5  ;;  %v2818_v27 = vpop.eup %2817  ;;  %v1905_v63 = vadd.f32 %v2816_v50, %v1889_v17  ;;  %2827 = vpow2.f32 %v1430_v2  ;;  %v1384_v9 = vmul.f32 1.442695, %v1357_v13  ;;  %v4644_v17 = vld [vmem:[#allocation49_spill] sm:$0xff] }
 0x22d   : > { %v1937_v8 = vmul.f32 %v2816_v50, %v4638_v51  ;;  %v1432_v44 = vmul.f32 1.442695, %v1405_v34  ;;  %v2820_v49 = vpop.eup %2819  ;;  %v1984_v28 = vmul.f32 %v2818_v27, %v1904_v21  ;;  %2829 = vpow2.f32 %v1378_v1 }
 0x22e   : > { %v1796_v19 = vsub.f32 %v1340_v40, %v1780_v24  ;;  %2831 = vrcp.f32 %v1905_v63  ;;  %v1887_v25 = vmul.f32 %v2820_v49, %v1463_v29  ;;  %v1919_v58 = vmul.f32 %v2820_v49, %v1511_v33 }
 0x22f   : > { %v4232_v56 = vadd.f32 %v1937_v8, %v1921_v38  ;;  %v1844_v43 = vsub.f32 %v1732_v20, %v1780_v24  ;;  %v2000_v18 = vsub.f32 2.0, %v1984_v28  ;;  %2833 = vpow2.f32 %v1426_v48 }
 0x230   : > { %v1822_v14 = vmul.f32 1.442695, %v1796_v19  ;;  %v4236_v31 = vmax.f32 %v4639_v39, %v4208_v15  ;;  %2835 = vpow2.f32 %v1384_v9  ;;  %v1724_v21 = vadd.f32 %v3922_v36, %v4640_v32 }
 0x231   : > { %v1870_v23 = vmul.f32 1.442695, %v1844_v43  ;;  %v1735_v59 = vadd.f32 %v4641_v16, %v3922_v36  ;;  %v2822_v40 = vpop.eup %2821  ;;  %v2016_v5 = vmul.f32 %v2818_v27, %v2000_v18  ;;  %2837 = vpow2.f32 %v1432_v44  ;;  %v4645_v44 = vld [vmem:[#allocation27_spill] sm:$0xff]  ;;  %v4647_v43 = vld [vmem:[#allocation52_spill] sm:$0xff] }
 0x232   : > { %v1355_v29 = vsub.f32 %v4639_v39, %v4236_v31  ;;  %v1403_v33 = vsub.f32 %v4208_v15, %v4236_v31  ;;  %v4246_v20 = vadd.f32 %v2822_v40, %v1887_v25  ;;  %v4642_v24 = vunpack.c.h.bf16 %v4636_v47  ;;  %v4643_v47 = vld [vmem:[#allocation46_spill] sm:$0xff] }
 0x233   : > { %2839 = vpow2.f32 %v1822_v14  ;;  %v1778_v55 = vmax.f32 %v4213_v45, %v1724_v21  ;;  %v2032_v41 = vmul.f32 %v2016_v5, %v4191_v4  ;;  %v1781_v4 = vmax.f32 %v4216_v10, %v1735_v59  ;;  %v4648_v14 = vld [vmem:[#allocation53_spill] sm:$0xff] }
 0x234   : > { %v1935_v26 = vmul.f32 %v2822_v40, %v4642_v24  ;;  %2841 = vpow2.f32 %v1870_v23  ;;  %v1380_v2 = vmul.f32 1.442695, %v1355_v29  ;;  %v1428_v7 = vmul.f32 1.442695, %v1403_v33  ;;  %v2824_v46 = vpop.eup %2823  ;;  %v4649_v29 = vld [vmem:[#allocation25_spill] sm:$0xff] }
 0x235   : > { %2843 = vrcp.f32 %v4246_v20  ;;  %v1794_v15 = vsub.f32 %v4213_v45, %v1778_v55  ;;  %v1842_v13 = vsub.f32 %v1724_v21, %v1778_v55  ;;  %v2826_v34 = vpop.eup %2825  ;;  %2048 = vst [vmem:[%s4165_s4 + $0x30] sm:$0xff] %v2032_v41  ;;  %v1452_v50 = vmul.f32 %v2824_v46, %v4643_v47  ;;  %v4651_v55 = vld [vmem:[#allocation54_spill] sm:$0xff] }
 0x236   : > { %v4252_v42 = vadd.f32 %v1935_v26, %v1919_v58  ;;  %v1484_v38 = vmul.f32 %v2824_v46, %v4644_v17  ;;  %2845 = vpow2.f32 %v1380_v2  ;;  %v2828_v51 = vpop.eup %2827  ;;  %v1982_v8 = vmul.f32 %v2826_v34, %v1902_v35  ;;  %v4652_v2 = vld [vmem:[#allocation57_spill] sm:$0xff] }
 0x237   : > { %2847 = vpow2.f32 %v1428_v7  ;;  %v1818_v1 = vmul.f32 1.442695, %v1794_v15  ;;  %v1866_v48 = vmul.f32 1.442695, %v1842_v13  ;;  %v2830_v27 = vpop.eup %2829  ;;  %v1468_v9 = vadd.f32 %v2828_v51, %v1452_v50 }
 0x238   : > { %v4646_v49 = vunpack.c.l.bf16 %v4645_v44  ;;  %v1797_v28 = vsub.f32 %v4216_v10, %v1781_v4  ;;  %v1845_v19 = vsub.f32 %v1735_v59, %v1781_v4  ;;  %v2832_v25 = vpop.eup %2831  ;;  %v1998_v58 = vsub.f32 2.0, %v1982_v8 }
 0x239   : > { %v1450_v18 = vmul.f32 %v2830_v27, %v4647_v43  ;;  %v1482_v39 = vmul.f32 %v2830_v27, %v4648_v14  ;;  %2849 = vpow2.f32 %v1818_v1  ;;  %v2834_v23 = vpop.eup %2833  ;;  %v1985_v35 = vmul.f32 %v2832_v25, %v1905_v63  ;;  %v4654_v1 = vld [vmem:[#allocation28_spill] sm:$0xff] }
 0x23a   : > { %v1500_v45 = vmul.f32 %v2828_v51, %v4646_v49  ;;  %2851 = vpow2.f32 %v1866_v48  ;;  %v1824_v21 = vmul.f32 1.442695, %v1797_v28  ;;  %v2836_v16 = vpop.eup %2835  ;;  %v2014_v40 = vmul.f32 %v2826_v34, %v1998_v58  ;;  %v4656_v49 = vld [vmem:[#allocation61_spill] sm:$0xff] }
 0x23b   : > { %v1466_v5 = vadd.f32 %v2834_v23, %v1450_v18  ;;  %v4650_v33 = vunpack.c.l.bf16 %v4649_v29  ;;  %v1872_v10 = vmul.f32 1.442695, %v1845_v19  ;;  %v2838_v59 = vpop.eup %2837  ;;  %v2001_v26 = vsub.f32 2.0, %v1985_v35 }
 0x23c   : > { %v1516_v32 = vadd.f32 %v1500_v45, %v1484_v38  ;;  %v1453_v41 = vmul.f32 %v2836_v16, %v4651_v55  ;;  %v1485_v7 = vmul.f32 %v2836_v16, %v4652_v2  ;;  %2853 = vpow2.f32 %v1824_v21 }
 0x23d   : > { %v1498_v24 = vmul.f32 %v2834_v23, %v4650_v33  ;;  %v2840_v46 = vpop.eup %2839  ;;  %v2030_v63 = vmul.f32 %v2014_v40, %v4227_v57  ;;  %v4653_v13 = vunpack.c.h.bf16 %v4645_v44  ;;  %2855 = vpow2.f32 %v1872_v10  ;;  %v4659_v40 = vld [vmem:[#allocation47_spill] sm:$0xff] }
 0x23e   : > { %v2842_v47 = vpop.eup %2841  ;;  %v2017_v50 = vmul.f32 %v2832_v25, %v2001_v26  ;;  %v1469_v17 = vadd.f32 %v2838_v59, %v1453_v41  ;;  %v1892_v38 = vmul.f32 %v2840_v46, %v1468_v9  ;;  %v1924_v4 = vmul.f32 %v2840_v46, %v1516_v32  ;;  %v4660_v26 = vld [vmem:[#allocation26_spill] sm:$0xff] }
 0x23f   : > { %v1514_v15 = vadd.f32 %v1498_v24, %v1482_v39  ;;  %v1501_v34 = vmul.f32 %v2838_v59, %v4653_v13  ;;  %v2844_v51 = vpop.eup %2843  ;;  %2046 = vst [vmem:[%s4165_s4 + $0x20] sm:$0xff] %v2030_v63  ;;  %v4655_v48 = vunpack.c.l.bf16 %v4654_v1  ;;  %v1727_v57 = vadd.f32 %v3922_v36, %v4656_v49 }
 0x240   : > { %v1308_v44 = vadd.f32 %v3997_v22, %v3902_v3  ;;  %v2846_v45 = vpop.eup %2845  ;;  %v2033_v28 = vmul.f32 %v2017_v50, %v4232_v56  ;;  %v1983_v19 = vmul.f32 %v2844_v51, %v4246_v20  ;;  %v1908_v9 = vadd.f32 %v2842_v47, %v1892_v38  ;;  %v4658_v20 = vld [vmem:[#allocation44_spill] sm:$0xff] }
 0x241   : > { %v1517_v8 = vadd.f32 %v1501_v34, %v1485_v7  ;;  %v1940_v27 = vmul.f32 %v2842_v47, %v4655_v48  ;;  %v1300_v25 = vadd.f32 %v3902_v3, %v4004_v52  ;;  %v2848_v58 = vpop.eup %2847  ;;  %v1451_v18 = vmul.f32 %v2846_v45, %v3980_v0 }
 0x242   : > { %v1483_v14 = vmul.f32 %v2846_v45, %v3991_v60  ;;  %v1779_v39 = vmax.f32 %v4236_v31, %v1727_v57  ;;  %2049 = vst [vmem:[%s4165_s4 + $0x38] sm:$0xff] %v2033_v28  ;;  %v1999_v22 = vsub.f32 2.0, %v1983_v19  ;;  %2857 = vrcp.f32 %v1908_v9  ;;  %v4663_v19 = vld [vmem:[#allocation48_spill] sm:$0xff] }
 0x243   : > { %v4283_v43 = vadd.f32 %v1940_v27, %v1924_v4  ;;  %v4657_v56 = vunpack.c.h.bf16 %v4649_v29  ;;  %v1344_v35 = vmax.f32 %v4658_v20, %v1308_v44  ;;  %v2850_v32 = vpop.eup %2849  ;;  %v4292_v21 = vadd.f32 %v2848_v58, %v1451_v18 }
 0x244   : > { %v1795_v52 = vsub.f32 %v4236_v31, %v1779_v39  ;;  %v1843_v16 = vsub.f32 %v1727_v57, %v1779_v39  ;;  %v4296_v0 = vmax.f32 %v4659_v40, %v1300_v25  ;;  %v2852_v60 = vpop.eup %2851  ;;  %v2015_v33 = vmul.f32 %v2844_v51, %v1999_v22 }
 0x245   : > { %v1499_v23 = vmul.f32 %v2848_v58, %v4657_v56  ;;  %v1890_v10 = vmul.f32 %v2850_v32, %v1466_v5  ;;  %v1922_v59 = vmul.f32 %v2850_v32, %v1514_v15  ;;  %v4661_v29 = vunpack.c.l.bf16 %v4660_v26 }
 0x246   : > { %v1820_v41 = vmul.f32 1.442695, %v1795_v52  ;;  %v1868_v2 = vmul.f32 1.442695, %v1843_v16  ;;  %v1360_v7 = vsub.f32 %v4658_v20, %v1344_v35  ;;  %v2854_v46 = vpop.eup %2853  ;;  %v2031_v31 = vmul.f32 %v2015_v33, %v4252_v42 }
 0x247   : > { %v1515_v24 = vadd.f32 %v1499_v23, %v1483_v14  ;;  %v1938_v55 = vmul.f32 %v2852_v60, %v4661_v29  ;;  %v1906_v63 = vadd.f32 %v2852_v60, %v1890_v10  ;;  %v1408_v13 = vsub.f32 %v1308_v44, %v1344_v35  ;;  %v2856_v47 = vpop.eup %2855 }
 0x248   : > { %v1358_v34 = vsub.f32 %v4659_v40, %v4296_v0  ;;  %v1893_v5 = vmul.f32 %v2854_v46, %v1469_v17  ;;  %v1925_v15 = vmul.f32 %v2854_v46, %v1517_v8  ;;  %2859 = vpow2.f32 %v1820_v41  ;;  %2047 = vst [vmem:[%s4165_s4 + $0x28] sm:$0xff] %v2031_v31 }
 0x249   : > { %v4304_v50 = vadd.f32 %v1938_v55, %v1922_v59  ;;  %2861 = vrcp.f32 %v1906_v63  ;;  %v4662_v38 = vunpack.c.h.bf16 %v4654_v1  ;;  %v1390_v51 = vmul.f32 1.442695, %v1360_v7 }
 0x24a   : > { %v1438_v48 = vmul.f32 1.442695, %v1408_v13  ;;  %v1909_v27 = vadd.f32 %v2856_v47, %v1893_v5  ;;  %2863 = vpow2.f32 %v1868_v2  ;;  %v1386_v42 = vmul.f32 1.442695, %v1358_v34  ;;  %v4666_v5 = vld [vmem:[#allocation62_spill] sm:$0xff] }
 0x24b   : > { %v1941_v4 = vmul.f32 %v2856_v47, %v4662_v38  ;;  %v1406_v49 = vsub.f32 %v1300_v25, %v4296_v0  ;;  %2865 = vpow2.f32 %v1390_v51  ;;  %v1311_v17 = vadd.f32 %v4013_v30, %v3902_v3 }
 0x24c   : > { %v1748_v8 = vadd.f32 %v4006_v12, %v3922_v36  ;;  %2867 = vrcp.f32 %v1909_v27  ;;  %v1303_v1 = vadd.f32 %v3902_v3, %v4020_v61  ;;  %v1740_v45 = vadd.f32 %v3922_v36, %v4015_v53  ;;  %v2858_v28 = vpop.eup %2857  ;;  %v4664_v12 = vld [vmem:[#allocation55_spill] sm:$0xff] }
 0x24d   : > { %v4310_v57 = vadd.f32 %v1941_v4, %v1925_v15  ;;  %v1434_v44 = vmul.f32 1.442695, %v1406_v49  ;;  %2869 = vpow2.f32 %v1438_v48  ;;  %v4321_v25 = vmax.f32 %v4663_v19, %v1311_v17 }
 0x24e   : > { %v1784_v58 = vmax.f32 %v1344_v35, %v1748_v8  ;;  %v4325_v30 = vadd.f32 %v4022_v37, %v3922_v36  ;;  %v1988_v18 = vmul.f32 %v2858_v28, %v1908_v9  ;;  %2871 = vpow2.f32 %v1386_v42  ;;  %v4667_v42 = vld [vmem:[#allocation30_spill] sm:$0xff] }
 0x24f   : > { %v4328_v14 = vmax.f32 %v4664_v12, %v1303_v1  ;;  %v1782_v3 = vmax.f32 %v4296_v0, %v1740_v45  ;;  %2873 = vpow2.f32 %v1434_v44  ;;  %v1361_v53 = vsub.f32 %v4663_v19, %v4321_v25  ;;  %v4669_v44 = vld [vmem:[#allocation63_spill] sm:$0xff]  ;;  %v4670_v19 = vld [vmem:[#allocation29_spill] sm:$0xff] }
 0x250   : > { %v1409_v61 = vsub.f32 %v1311_v17, %v4321_v25  ;;  %v1800_v39 = vsub.f32 %v1344_v35, %v1784_v58  ;;  %v2004_v22 = vsub.f32 2.0, %v1988_v18  ;;  %v1848_v56 = vsub.f32 %v1748_v8, %v1784_v58 }
 0x251   : > { %v1359_v36 = vsub.f32 %v4664_v12, %v4328_v14  ;;  %v1407_v37 = vsub.f32 %v1303_v1, %v4328_v14  ;;  %v1392_v9 = vmul.f32 1.442695, %v1361_v53  ;;  %v1798_v32 = vsub.f32 %v4296_v0, %v1782_v3 }
 0x252   : > { %v1440_v23 = vmul.f32 1.442695, %v1409_v61  ;;  %v1830_v20 = vmul.f32 1.442695, %v1800_v39  ;;  %v2860_v52 = vpop.eup %2859  ;;  %v2020_v16 = vmul.f32 %v2858_v28, %v2004_v22  ;;  %v1878_v40 = vmul.f32 1.442695, %v1848_v56 }
 0x253   : > { %v1388_v60 = vmul.f32 1.442695, %v1359_v36  ;;  %v1436_v33 = vmul.f32 1.442695, %v1407_v37  ;;  %v2862_v10 = vpop.eup %2861  ;;  %v1891_v35 = vmul.f32 %v2860_v52, %v4292_v21  ;;  %v1923_v59 = vmul.f32 %v2860_v52, %v1515_v24  ;;  %v2910_v56 = vld [vmem:[%s3472_s10 + $0x38] sm:$0xff]  }
 0x254   : > { %2875 = vpow2.f32 %v1392_v9  ;;  %v1826_v29 = vmul.f32 1.442695, %v1798_v32  ;;  %v2864_v55 = vpop.eup %2863  ;;  %v2036_v41 = vmul.f32 %v2020_v16, %v4283_v43  ;;  %v1986_v2 = vmul.f32 %v2862_v10, %v1906_v63  ;;  %v4673_v32 = vld [vmem:[#allocation65_spill] sm:$0xff] }
 0x255   : > { %2877 = vpow2.f32 %v1440_v23  ;;  %v1846_v7 = vsub.f32 %v1740_v45, %v1782_v3  ;;  %v2866_v46 = vpop.eup %2865  ;;  %v4340_v0 = vadd.f32 %v2864_v55, %v1891_v35  ;;  %v4665_v31 = vunpack.c.h.bf16 %v4660_v26 }
 0x256   : > { %2879 = vpow2.f32 %v1830_v20  ;;  %v1785_v34 = vmax.f32 %v4321_v25, %v4325_v30  ;;  %v2868_v21 = vpop.eup %2867  ;;  %2052 = vst [vmem:[%s4165_s4 + $0x50] sm:$0xff] %v2036_v41  ;;  %v2002_v24 = vsub.f32 2.0, %v1986_v2  ;;  %v1456_v47 = vmul.f32 %v2866_v46, %v3993_v6 }
 0x257   : > { %v1939_v13 = vmul.f32 %v2864_v55, %v4665_v31  ;;  %v1488_v43 = vmul.f32 %v2866_v46, %v4666_v5  ;;  %2881 = vpow2.f32 %v1878_v40  ;;  %v2870_v63 = vpop.eup %2869  ;;  %v1989_v15 = vmul.f32 %v2868_v21, %v1909_v27 }
 0x258   : > { %2883 = vrcp.f32 %v4340_v0  ;;  %v1874_v26 = vmul.f32 1.442695, %v1846_v7  ;;  %v2872_v4 = vpop.eup %2871  ;;  %v2018_v51 = vmul.f32 %v2862_v10, %v2002_v24  ;;  %v1472_v48 = vadd.f32 %v2870_v63, %v1456_v47 }
 0x259   : > { %v4349_v38 = vadd.f32 %v1939_v13, %v1923_v59  ;;  %v4668_v49 = vunpack.c.l.bf16 %v4667_v42  ;;  %2885 = vpow2.f32 %v1388_v60  ;;  %v2874_v8 = vpop.eup %2873  ;;  %v2005_v6 = vsub.f32 2.0, %v1989_v15  ;;  %v2911_v60 = vld [vmem:[%s3470_s20 + $0x30] sm:$0xff]   ;;  %s4390_s20 = scalar_lea.hbm %s4443_s6, %s2320_s7 }
 0x25a   : > { %v1454_v1 = vmul.f32 %v2872_v4, %v4669_v44  ;;  %v1486_v45 = vmul.f32 %v2872_v4, %v4024_v62  ;;  %2887 = vpow2.f32 %v1436_v33  ;;  %v2034_v27 = vmul.f32 %v2018_v51, %v4304_v50  ;;  %v2909_v62 = vld [vmem:[%s4442_s5 + $0x3] ss:$0 sm:$0xff]  ;;  %v2912_v13 = vld [vmem:[%s3472_s10 + $0x30] sm:$0xff]   ;;  %s3061_s10 = scalar_lea.vmem %s4392_s28, 2048 }
 0x25b   : > { %v1504_v17 = vmul.f32 %v2870_v63, %v4668_v49  ;;  %v4671_v58 = vunpack.c.l.bf16 %v4670_v19  ;;  %2889 = vpow2.f32 %v1826_v29  ;;  %v2021_v12 = vmul.f32 %v2868_v21, %v2005_v6  ;;  %p3062_p9 = scmp.ne.s32.totalorder %s4392_s28, %s3061_s10  ;;  %p3069_p11 = scmp.lt.s32.totalorder %s3067_s19, %s3061_s10 }
 0x25c   : > { %v1470_v3 = vadd.f32 %v2874_v8, %v1454_v1  ;;  %2891 = vpow2.f32 %v1874_v26  ;;  %v1801_v53 = vsub.f32 %v4321_v25, %v1785_v34  ;;  %2050 = vst [vmem:[%s4165_s4 + $0x40] sm:$0xff] %v2034_v27  ;;  %v1849_v39 = vsub.f32 %v4325_v30, %v1785_v34  ;;  %v4672_v25 = vld [vmem:[#allocation64_spill] sm:$0xff] }
 0x25d   : > { %v1520_v28 = vadd.f32 %v1504_v17, %v1488_v43  ;;  %v1502_v18 = vmul.f32 %v2874_v8, %v4671_v58  ;;  %v1743_v50 = vadd.f32 %v2909_v62, %v4030_v11  ;;  %v1768_v36 = vunpack.c.l.bf16 %v2910_v56  ;;  %v4675_v43 = vld [vmem:[#allocation66_spill] sm:$0xff]  ;;  %p3063_p8 = pnand %p3062_p9, %p4676_p10  ;;  %p3070_p4 = por %p3069_p11, %p3068_p5 }
 0x25e   : > { %v2876_v22 = vpop.eup %2875  ;;  %v2037_v37 = vmul.f32 %v2021_v12, %v4310_v57  ;;  %v1832_v9 = vmul.f32 1.442695, %v1801_v53  ;;  %v1880_v16 = vmul.f32 1.442695, %v1849_v39  ;;  %v1327_v33 = vunpack.c.h.bf16 %v2911_v60 }
 0x25f   : > { %v1518_v61 = vadd.f32 %v1502_v18, %v1486_v45  ;;  %v2878_v23 = vpop.eup %2877  ;;  %v1457_v20 = vmul.f32 %v2876_v22, %v4672_v25  ;;  %v1489_v52 = vmul.f32 %v2876_v22, %v4673_v32  ;;  %v1783_v30 = vmax.f32 %v4328_v14, %v1743_v50  ;;  %p3064_p1 = pneg %p3063_p8 }
 0x260   : > { %v2880_v40 = vpop.eup %2879  ;;  %2053 = vst [vmem:[%s4165_s4 + $0x58] sm:$0xff] %v2037_v37  ;;  %v4674_v11 = vunpack.c.h.bf16 %v4667_v42  ;;  %2893 = vpow2.f32 %v1832_v9  ;;  %v1766_v34 = vunpack.c.l.bf16 %v2912_v13  ;;  %v1769_v1 = vunpack.c.h.bf16 %v2910_v56 }
 0x261   : > { %v2882_v35 = vpop.eup %2881  ;;  %v1473_v57 = vadd.f32 %v2878_v23, %v1457_v20  ;;  %v1896_v59 = vmul.f32 %v2880_v40, %v1472_v48  ;;  %v1928_v29 = vmul.f32 %v2880_v40, %v1520_v28  ;;  %2895 = vpow2.f32 %v1880_v16  ;;  %p3071_p13 = pnand %p3070_p4, %p3064_p1 }
 0x262   : > { %v1505_v10 = vmul.f32 %v2878_v23, %v4674_v11  ;;  %v2884_v55 = vpop.eup %2883  ;;  %v1944_v2 = vmul.f32 %v2882_v35, %v1768_v36  ;;  %v1799_v7 = vsub.f32 %v4328_v14, %v1783_v30  ;;  %v1847_v46 = vsub.f32 %v1743_v50, %v1783_v30 }
 0x263   : > { %v2886_v31 = vpop.eup %2885  ;;  %v1987_v21 = vmul.f32 %v2884_v55, %v4340_v0  ;;  %v1912_v24 = vadd.f32 %v2882_v35, %v1896_v59 }
 0x264   : > { %v1521_v41 = vadd.f32 %v1505_v10, %v1489_v52  ;;  %v2888_v47 = vpop.eup %2887  ;;  %v1960_v5 = vadd.f32 %v1944_v2, %v1928_v29  ;;  %v1455_v63 = vmul.f32 %v2886_v31, %v4675_v43  ;;  %v1487_v15 = vmul.f32 %v2886_v31, %v4069_v54 }
 0x265   : > { %v1828_v26 = vmul.f32 1.442695, %v1799_v7  ;;  %v2890_v4 = vpop.eup %2889  ;;  %v2003_v51 = vsub.f32 2.0, %v1987_v21  ;;  %2897 = vrcp.f32 %v1912_v24  ;;  %v1503_v48 = vmul.f32 %v2888_v47, %v1327_v33 }
 0x266   : > { %v1876_v42 = vmul.f32 1.442695, %v1847_v46  ;;  %v2892_v14 = vpop.eup %2891  ;;  %v1471_v49 = vadd.f32 %v2888_v47, %v1455_v63  ;;  %v1894_v17 = vmul.f32 %v2890_v4, %v1470_v3  ;;  %v1926_v8 = vmul.f32 %v2890_v4, %v1518_v61 }
 0x267   : > { %2899 = vpow2.f32 %v1828_v26  ;;  %v2019_v0 = vmul.f32 %v2884_v55, %v2003_v51  ;;  %v1519_v6 = vadd.f32 %v1503_v48, %v1487_v15  ;;  %v1942_v44 = vmul.f32 %v2892_v14, %v1766_v34 }
 0x268   : > { %2901 = vpow2.f32 %v1876_v42  ;;  %v1910_v45 = vadd.f32 %v2892_v14, %v1894_v17  ;;  %v1767_v3 = vunpack.c.h.bf16 %v2912_v13 }
 0x269   : > { %v2035_v54 = vmul.f32 %v2019_v0, %v4349_v38  ;;  %v1958_v27 = vadd.f32 %v1942_v44, %v1926_v8 }
 0x26a   : > { %v2894_v28 = vpop.eup %2893  ;;  %2903 = vrcp.f32 %v1910_v45 }
 0x26b   : > { %v2896_v19 = vpop.eup %2895  ;;  %2051 = vst [vmem:[%s4165_s4 + $0x48] sm:$0xff] %v2035_v54  ;;  %v1897_v58 = vmul.f32 %v2894_v28, %v1473_v57  ;;  %v1929_v18 = vmul.f32 %v2894_v28, %v1521_v41 }
 0x26c   : > { %v1945_v12 = vmul.f32 %v2896_v19, %v1769_v1 }
 0x26d   : > { %v1913_v53 = vadd.f32 %v2896_v19, %v1897_v58 }
 0x26e   : > { %v1961_v61 = vadd.f32 %v1945_v12, %v1929_v18 }
 0x26f   : > { %v2898_v39 = vpop.eup %2897  ;;  %2905 = vrcp.f32 %v1913_v53 }
 0x270   : > { %v1992_v50 = vmul.f32 %v2898_v39, %v1912_v24 }
 0x271   : > { %v2900_v62 = vpop.eup %2899 }
 0x272   : > { %v2902_v22 = vpop.eup %2901  ;;  %v1895_v56 = vmul.f32 %v2900_v62, %v1471_v49  ;;  %v1927_v36 = vmul.f32 %v2900_v62, %v1519_v6  ;;  %v2008_v38 = vsub.f32 2.0, %v1992_v50 }
 0x273   : > { %v1943_v37 = vmul.f32 %v2902_v22, %v1767_v3 }
 0x274   : > { %v1911_v9 = vadd.f32 %v2902_v22, %v1895_v56  ;;  %v2904_v23 = vpop.eup %2903  ;;  %v2024_v25 = vmul.f32 %v2898_v39, %v2008_v38 }
 0x275   : > { %v1959_v20 = vadd.f32 %v1943_v37, %v1927_v36  ;;  %v1990_v32 = vmul.f32 %v2904_v23, %v1910_v45 }
 0x276   : > { %2907 = vrcp.f32 %v1911_v9  ;;  %v2040_v52 = vmul.f32 %v2024_v25, %v1960_v5 }
 0x277   : > { %v2006_v16 = vsub.f32 2.0, %v1990_v32 }
 0x278   : > { %2056 = vst [vmem:[%s4165_s4 + $0x70] sm:$0xff] %v2040_v52 }
 0x279   : > { %v2906_v30 = vpop.eup %2905  ;;  %v2022_v40 = vmul.f32 %v2904_v23, %v2006_v16 }
 0x27a   : > { %v1993_v60 = vmul.f32 %v2906_v30, %v1913_v53 }
 0x27b   : > { %v2038_v33 = vmul.f32 %v2022_v40, %v1958_v27 }
 0x27c   : > { %v2009_v11 = vsub.f32 2.0, %v1993_v60 }
 0x27d   : > { %2054 = vst [vmem:[%s4165_s4 + $0x60] sm:$0xff] %v2038_v33 }
 0x27e   : > { %v2025_v10 = vmul.f32 %v2906_v30, %v2009_v11 }
 0x280   : > { %v2908_v35 = vpop.eup %2907  ;;  %v2041_v57 = vmul.f32 %v2025_v10, %v1961_v61 }
 0x281   : > { %v1991_v59 = vmul.f32 %v2908_v35, %v1911_v9 }
 0x282   : > { %2057 = vst [vmem:[%s4165_s4 + $0x78] sm:$0xff] %v2041_v57 }
 0x283   : > { %v2007_v29 = vsub.f32 2.0, %v1991_v59 }
 0x285   : > { %v2023_v55 = vmul.f32 %v2908_v35, %v2007_v29 }
 0x287   : > { %v2039_v41 = vmul.f32 %v2023_v55, %v1959_v20 }
 0x289   : > { %2055 = vst [vmem:[%s4165_s4 + $0x68] sm:$0xff] %v2039_v41 }
 0x28a   : > { %3074 = shalt.err (!%p3071_p13)
}
 0x28b   : > { %s3075_s13 = scalar_lea.hbm %s4390_s20, 2048  ;;  %s3079_s15 = scalar_lea.hbm %s4443_s6, 4096 }
 0x28c   : > { %p3076_p3 = scmp.ne.s32.totalorder %s4390_s20, %s3075_s13  ;;  %p3080_p0 = scmp.lt.u32.totalorder %s4390_s20, %s4443_s6 }
 0x28d   : > { %p3081_p6 = scmp.lt.u32.totalorder %s3079_s15, %s3075_s13  ;;  %p3083_p9 = scmp.lt.u32.totalorder %s3075_s13, %s4390_s20 }
 0x28e   : > { %p3077_p2 = pnand %p3076_p3, %p4676_p10 }
 0x28f   : > { %p3082_p7 = por %p3081_p6, %p3080_p0 }
 0x290   : > { %p3078_p12 = pneg %p3077_p2 }
 0x291   : > { %p3084_p8 = por %p3083_p9, %p3082_p7 }
 0x293   : > { %p3085_p1 = pnand %p3084_p8, %p3078_p12 }
 0x295   : > { %3088 = shalt.err (!%p3085_p1)
}
 0x296   : > { %s3149_s30 = smov 128   ;;  %s3150_s4 = smov 8  }
 0x297   : > { %2525 = dma.vmem_to_hbm [thread:$0]  (%p4676_p10), %s4392_s28, 2048, %s4390_s20, %s2059_s29, %s3149_s30, %s3149_s30, %s3150_s4  }
 0x298 PF: > { %s4677_s27 = sld [smem:[#allocation19_spill]]  ;;  %s2087_s12 = sand.u32 1, %s3127_s21  }
 0x299   : > { %p4679_p11 = scmp.ge.s32.totalorder %s3139_s24, 2  ;;  %s2088_s7 = scalar_lea.sflag [#allocation4], %s2087_s12 }
 0x29e   : > { %p4678_p5 = scmp.ne.s32.totalorder %s4677_s27, 0 }
 0x2a0   : > { %p2545_p4 = pnand %p4679_p11, %p4678_p5 }
 0x2a2   : > { %3122 = dma.done.wait (!%p2545_p4), %s2088_s7, 2048  }
 0x2a3   : > { %3124 = vsyncadd (!%p2545_p4), %s2088_s7, 4294965248  ;;  %s4680_s24 = sld [smem:[#allocation17_spill]]  ;;  %s4681_s11 = sld [smem:[#allocation18_spill]] }
 0x2a4   : > { %s4682_s21 = smov %s3131_s22  ;;  %s4683_s22 = smov %s3135_s23 }
 0x2a9   : > { %p25_p13 = scmp.ge.s32.totalorder %s4680_s24, 4   ;;  %s4684_s23 = smov %s4681_s11 }
 0x2ab   :  { %27 = sbr.rel (!%p25_p13) target bundleno = 12 (0xc), region = 133 }
 0x2b2   :  { %2093 = vsyncpa [#allocation3], 1 }
 0x2b3   :  { %2095 = vsyncpa [#allocation3 + $0x1], 1 }
 0x2b4   :  { %2096 = vsyncpa [#allocation6], 1 }
 0x2b5   :  { %2098 = vsyncpa [#allocation6 + $0x1], 1 }
 0x2b6   :  { %2099 = vsyncpa [#allocation9], 1 }
 0x2b7   :  { %2101 = vsyncpa [#allocation9 + $0x1], 1 }
 0x2b8   :  { %2102 = vsyncpa [#allocation4], 1 }
 0x2b9   :  { %2104 = vsyncpa [#allocation4 + $0x1], 1 }

</bundles_post_ra>
